<compile_context>
chip_gen: v6e
topology: v6e:2x2x1
jax: 0.10.0
libtpu: 0.0.40
codegen_flags: <defaults>
</compile_context>

<pallas_src>
import functools
import math

import jax
import jax.numpy as jnp
from jax import lax
from jax.experimental import pallas as pl
from jax.experimental.pallas import tpu as pltpu


def _fusion_kernel(x_ref, wdw_ref, b1_ref, wpw_ref, b2_ref, fcw_ref, fcb_ref,
                   out_ref, xp_ref, *, TB, H, W, C2, C):
    # --- stage the input into the halo scratch (TB, H+2, W+2, C2) ---------
    # Zero only the two H-halo rows (every step; interior is fully rewritten,
    # W-halo columns are handled by masking the taps that read them).
    zrow = jnp.zeros((TB, 1, W + 2, C2), jnp.float32)
    xp_ref[:, 0:1, :, :] = zrow
    xp_ref[:, H + 1:H + 2, :, :] = zrow
    xp_ref[:, 1:H + 1, 1:W + 1, :] = x_ref[...]

    # Column-edge keep-masks for the dx=0 / dx=2 taps (2-D iota, broadcasts
    # against the (TB, H, W, C2) tap).  jnp.where (select) guarantees the
    # never-written W-halo columns cannot leak NaN/garbage into the result.
    col = lax.broadcasted_iota(jnp.int32, (W, C2), 0)
    not_first = col > 0          # true output col 0 contribution of dx=0 is 0
    not_last = col < W - 1       # true output col W-1 contribution of dx=2 is 0

    # --- depthwise 3x3 conv, padding=1 (BN1 scale pre-folded into wdw) ----
    # Single running accumulator; one outer-offset band load per dy, value
    # slices per dx (keeps ~2 live full-size tensors instead of 9).
    wdw = wdw_ref[...]                                   # (9, C2), loaded once
    acc = None
    for dy in range(3):
        band = xp_ref[:, dy:dy + H, :, :]                # (TB, H, W+2, C2)
        for dx in range(3):
            tap = band[:, :, dx:dx + W, :]               # (TB, H, W, C2)
            if dx == 0:
                tap = jnp.where(not_first, tap, 0.0)
            elif dx == 2:
                tap = jnp.where(not_last, tap, 0.0)
            tap = tap * wdw[3 * dy + dx]
            acc = tap if acc is None else acc + tap

    # --- BN1 bias + ReLU (scale already folded into the conv weights) -----
    y = jnp.maximum(acc + b1_ref[0], 0.0)

    # --- 1x1 conv as matmul (2C -> C); M = TB*H*W fills the MXU ----------
    y2 = jnp.dot(y.reshape(TB * H * W, C2), wpw_ref[...],
                 preferred_element_type=jnp.float32)
    y2 = jnp.maximum(y2 + b2_ref[0], 0.0)                # (TB*H*W, C)

    # --- avg_pool2d(sptial): H == W == sptial => per-image global mean ----
    pooled = jnp.sum(y2.reshape(TB, H * W, C), axis=1) * (1.0 / (H * W))

    # --- fc2 (num_classes lane-padded to a multiple of 128) ---------------
    out_ref[...] = (jnp.dot(pooled, fcw_ref[...],
                            preferred_element_type=jnp.float32) + fcb_ref[...])


def _pick_batch_tile(n):
    """Grid = 1 on single-TensorCore chips (v5e/v6e); exactly 2 steps on v7x."""
    kind = ""
    try:
        kind = jax.devices()[0].device_kind.lower()
    except Exception:
        pass
    if ("v7" in kind or "7x" in kind) and n > 8:
        tb = -(-n // 2)                 # ceil(n / 2): one step per TensorCore
        return -(-tb // 8) * 8          # keep the output sublane dim /8
    return n                            # one grid step: minimum fixed overhead


def vgg_fusion_forward(fmaps, params, sptial, *, batch_tile=None):
    """fmaps: list of NCHW arrays (N, channel, H, W). Returns (N, num_classes)."""
    # NCHW -> NHWC and concat along channels (matches torch.cat(fmap, 1)).
    x = jnp.concatenate([jnp.transpose(f, (0, 2, 3, 1)) for f in fmaps],
                        axis=-1).astype(jnp.float32)
    N, H, W, C2 = x.shape
    C = params["w_pw"].shape[1]
    NC = params["fc_w"].shape[1]
    # fc2 expects `channel` features after flatten => pooled spatial must be 1x1.
    assert H == W == sptial, "forward requires H == W == sptial"

    # Fold BN scales into the conv weights (one-time constant work on weights).
    w_dw = params["w_dw"] * params["scale1"]        # (9, C2)
    w_pw = params["w_pw"] * params["scale2"]        # (C2, C)
    b1 = params["bias1"]                            # (1, C2)
    b2 = params["bias2"]                            # (1, C)

    # Lane-dense output: pad num_classes up to a multiple of 128 (zero columns).
    NCP = ((NC + 127) // 128) * 128
    fc_w = jnp.pad(params["fc_w"], ((0, 0), (0, NCP - NC)))
    fc_b = jnp.pad(params["fc_b"], ((0, 0), (0, NCP - NC)))

    # Batch tile sized per generation; pad N up to a multiple of the tile.
    TB = batch_tile if batch_tile is not None else _pick_batch_tile(N)
    TB = max(1, min(TB, max(N, 1))) if batch_tile is not None else TB
    NP = pl.cdiv(N, TB) * TB
    if NP != N:
        x = jnp.pad(x, ((0, NP - N), (0, 0), (0, 0), (0, 0)))

    kernel = functools.partial(_fusion_kernel, TB=TB, H=H, W=W, C2=C2, C=C)

    out = pl.pallas_call(
        kernel,
        out_shape=jax.ShapeDtypeStruct((NP, NCP), jnp.float32),
        grid_spec=pltpu.PrefetchScalarGridSpec(
            num_scalar_prefetch=0,
            grid=(NP // TB,),
            in_specs=[
                pl.BlockSpec((TB, H, W, C2), lambda n: (n, 0, 0, 0)),
                pl.BlockSpec((9, C2), lambda n: (0, 0)),   # dw weights (BN1 folded)
                pl.BlockSpec((1, C2), lambda n: (0, 0)),   # bn1 bias
                pl.BlockSpec((C2, C), lambda n: (0, 0)),   # 1x1 weights (BN1_1 folded)
                pl.BlockSpec((1, C), lambda n: (0, 0)),    # bn1_1 bias
                pl.BlockSpec((C, NCP), lambda n: (0, 0)),  # fc2 weight (lane-padded)
                pl.BlockSpec((1, NCP), lambda n: (0, 0)),  # fc2 bias (lane-padded)
            ],
            out_specs=pl.BlockSpec((TB, NCP), lambda n: (n, 0)),
            scratch_shapes=[pltpu.VMEM((TB, H + 2, W + 2, C2), jnp.float32)],
        ),
        compiler_params=pltpu.CompilerParams(
            dimension_semantics=("parallel",)),
    )(x, w_dw, b1, w_pw, b2, fc_w, fc_b)

    return out[:N, :NC]


def init_params(key, num_classes, channel, num_branches):
    """Deterministic parameter init mirroring the PyTorch module's __init__."""
    C2 = channel * num_branches
    eps = 1e-5
    k1, k2, k3, k4 = jax.random.split(key, 4)

    # conv1: depthwise 3x3, torch weight shape (C2, 1, 3, 3), N(0, sqrt(2/n)).
    n1 = 3 * 3 * C2
    w_dw_t = jax.random.normal(k1, (C2, 1, 3, 3), jnp.float32) * math.sqrt(2.0 / n1)
    w_dw = jnp.transpose(w_dw_t[:, 0], (1, 2, 0)).reshape(9, C2)   # (ky*3+kx, C2)

    # conv1_1: 1x1 conv, torch weight shape (channel, C2, 1, 1) -> matmul (C2, channel).
    n2 = 1 * 1 * channel
    w_pw_t = jax.random.normal(k2, (channel, C2, 1, 1), jnp.float32) * math.sqrt(2.0 / n2)
    w_pw = jnp.transpose(w_pw_t[:, :, 0, 0], (1, 0))

    # BatchNorms: gamma=1, beta=0, running_mean=0, running_var=1 -> folded scale/bias.
    def bn_fold(c):
        gamma = jnp.ones((c,), jnp.float32)
        beta = jnp.zeros((c,), jnp.float32)
        rmean = jnp.zeros((c,), jnp.float32)
        rvar = jnp.ones((c,), jnp.float32)
        scale = gamma / jnp.sqrt(rvar + eps)
        bias = beta - rmean * scale
        return scale.reshape(1, c), bias.reshape(1, c)

    scale1, bias1 = bn_fold(C2)
    scale2, bias2 = bn_fold(channel)

    # fc2: Linear(channel, num_classes) default torch init U(-1/sqrt(fan_in), +).
    bound = 1.0 / math.sqrt(channel)
    fc_w_t = jax.random.uniform(k3, (num_classes, channel), jnp.float32, -bound, bound)
    fc_w = jnp.transpose(fc_w_t)                                    # (channel, NC)
    fc_b = jax.random.uniform(k4, (1, num_classes), jnp.float32, -bound, bound)

    return dict(w_dw=w_dw, scale1=scale1, bias1=bias1, w_pw=w_pw,
                scale2=scale2, bias2=bias2, fc_w=fc_w, fc_b=fc_b)


def reference_forward(fmaps, params, channel, num_branches):
    """Independent pure-JAX reference (lax conv) for correctness checking."""
    C2 = channel * num_branches
    x = jnp.concatenate([jnp.transpose(f, (0, 2, 3, 1)) for f in fmaps],
                        axis=-1).astype(jnp.float32)                # NHWC
    N, H, W, _ = x.shape
    wdw_hwio = params["w_dw"].reshape(3, 3, 1, C2)
    y = lax.conv_general_dilated(x, wdw_hwio, (1, 1), "SAME",
                                 dimension_numbers=("NHWC", "HWIO", "NHWC"),
                                 feature_group_count=C2)
    y = jnp.maximum(y * params["scale1"] + params["bias1"], 0.0)
    y2 = jnp.einsum("nhwc,cd->nhwd", y, params["w_pw"])
    y2 = jnp.maximum(y2 * params["scale2"] + params["bias2"], 0.0)
    pooled = jnp.mean(y2, axis=(1, 2))                              # (N, C)
    return pooled @ params["fc_w"] + params["fc_b"]                 # (N, NC)


if __name__ == "__main__":
    num_classes, channel, sptial, num_branches = 10, 32, 4, 2
    batch = 16   # grid=1 on v5e/v6e (M=256 matmul), 2 steps (one per TC) on v7x

    key = jax.random.PRNGKey(0)
    pkey, xk1, xk2 = jax.random.split(key, 3)
    params = init_params(pkey, num_classes, channel, num_branches)

    # fmap is a list of `num_branches` NCHW feature maps.
    fmaps = [
        jax.random.normal(xk1, (batch, channel, sptial, sptial), jnp.float32),
        jax.random.normal(xk2, (batch, channel, sptial, sptial), jnp.float32),
    ]

    out = vgg_fusion_forward(fmaps, params, sptial)
    out = jax.block_until_ready(out)
    assert out.shape == (batch, num_classes)

    ref = reference_forward(fmaps, params, channel, num_branches)
    if not bool(jnp.allclose(out, ref, atol=1e-4, rtol=1e-4)):
        raise AssertionError("Pallas kernel output does not match JAX reference")

    print("KERNEL_OK")
</pallas_src>

<mosaic_0001>
module attributes {stable_mosaic.version = 11 : i64} {
  func.func @_fusion_kernel(%arg0: i32, %arg1: memref<16x4x4x64xf32, #tpu.memory_space<vmem>>, %arg2: memref<9x64xf32, #tpu.memory_space<vmem>>, %arg3: memref<1x64xf32, #tpu.memory_space<vmem>>, %arg4: memref<64x32xf32, #tpu.memory_space<vmem>>, %arg5: memref<1x32xf32, #tpu.memory_space<vmem>>, %arg6: memref<32x128xf32, #tpu.memory_space<vmem>>, %arg7: memref<1x128xf32, #tpu.memory_space<vmem>>, %arg8: memref<16x128xf32, #tpu.memory_space<vmem>>, %arg9: memref<16x6x6x64xf32, #tpu.memory_space<vmem>>) attributes {dimension_semantics = [#tpu.dimension_semantics<parallel>], iteration_bounds = array<i64: 1>, scalar_prefetch = 0 : i64, scratch_operands = 1 : i64, tpu.core_type = #tpu.core_type<tc>, window_params = [{transform_indices = @transform_0, window_bounds = array<i64: 16, 4, 4, 64>}, {pipeline_mode = #tpu.pipeline_mode<synchronous>, transform_indices = @transform_1, window_bounds = array<i64: 9, 64>}, {pipeline_mode = #tpu.pipeline_mode<synchronous>, transform_indices = @transform_2, window_bounds = array<i64: 1, 64>}, {pipeline_mode = #tpu.pipeline_mode<synchronous>, transform_indices = @transform_3, window_bounds = array<i64: 64, 32>}, {pipeline_mode = #tpu.pipeline_mode<synchronous>, transform_indices = @transform_4, window_bounds = array<i64: 1, 32>}, {pipeline_mode = #tpu.pipeline_mode<synchronous>, transform_indices = @transform_5, window_bounds = array<i64: 32, 128>}, {pipeline_mode = #tpu.pipeline_mode<synchronous>, transform_indices = @transform_6, window_bounds = array<i64: 1, 128>}, {transform_indices = @transform_7, window_bounds = array<i64: 16, 128>}]} {
    %cst = arith.constant 0.000000e+00 : f32
    %0 = vector.broadcast %cst : f32 to vector<16x1x6x64xf32>
    %c0 = arith.constant 0 : index
    %c0_0 = arith.constant 0 : index
    %c0_1 = arith.constant 0 : index
    %c0_2 = arith.constant 0 : index
    %1 = vector.load %arg9[%c0, %c0_0, %c0_1, %c0_2] : memref<16x6x6x64xf32, #tpu.memory_space<vmem>>, vector<16x1x6x64xf32>
    tpu.vector_store %arg9[%c0, %c0_0, %c0_1, %c0_2], %0 {strides = array<i32>} : memref<16x6x6x64xf32, #tpu.memory_space<vmem>>, vector<16x1x6x64xf32>,
    %c0_3 = arith.constant 0 : index
    %c5 = arith.constant 5 : index
    %c0_4 = arith.constant 0 : index
    %c0_5 = arith.constant 0 : index
    %2 = vector.load %arg9[%c0_3, %c5, %c0_4, %c0_5] : memref<16x6x6x64xf32, #tpu.memory_space<vmem>>, vector<16x1x6x64xf32>
    tpu.vector_store %arg9[%c0_3, %c5, %c0_4, %c0_5], %0 {strides = array<i32>} : memref<16x6x6x64xf32, #tpu.memory_space<vmem>>, vector<16x1x6x64xf32>,
    %c0_6 = arith.constant 0 : index
    %c0_7 = arith.constant 0 : index
    %c0_8 = arith.constant 0 : index
    %c0_9 = arith.constant 0 : index
    %3 = vector.load %arg1[%c0_6, %c0_7, %c0_8, %c0_9] : memref<16x4x4x64xf32, #tpu.memory_space<vmem>>, vector<16x4x4x64xf32>
    %c0_10 = arith.constant 0 : index
    %c1 = arith.constant 1 : index
    %c1_11 = arith.constant 1 : index
    %c0_12 = arith.constant 0 : index
    %4 = vector.load %arg9[%c0_10, %c1, %c1_11, %c0_12] : memref<16x6x6x64xf32, #tpu.memory_space<vmem>>, vector<16x4x4x64xf32>
    tpu.vector_store %arg9[%c0_10, %c1, %c1_11, %c0_12], %3 {strides = array<i32>} : memref<16x6x6x64xf32, #tpu.memory_space<vmem>>, vector<16x4x4x64xf32>,
    %5 = tpu.iota {dimensions = array<i32: 0>} : vector<4x64xi32>
    %c0_i32 = arith.constant 0 : i32
    %6 = vector.broadcast %c0_i32 : i32 to vector<4x64xi32>
    %7 = arith.cmpi sgt, %5, %6 : vector<4x64xi32>
    %c3_i32 = arith.constant 3 : i32
    %8 = vector.broadcast %c3_i32 : i32 to vector<4x64xi32>
    %9 = arith.cmpi slt, %5, %8 : vector<4x64xi32>
    %c0_13 = arith.constant 0 : index
    %c0_14 = arith.constant 0 : index
    %10 = vector.load %arg2[%c0_13, %c0_14] : memref<9x64xf32, #tpu.memory_space<vmem>>, vector<9x64xf32>
    %c0_15 = arith.constant 0 : index
    %c0_16 = arith.constant 0 : index
    %c0_17 = arith.constant 0 : index
    %c0_18 = arith.constant 0 : index
    %11 = vector.load %arg9[%c0_15, %c0_16, %c0_17, %c0_18] : memref<16x6x6x64xf32, #tpu.memory_space<vmem>>, vector<16x4x6x64xf32>
    %12 = vector.extract_strided_slice %11 {offsets = [0, 0, 0, 0], sizes = [16, 4, 4, 64], strides = [1, 1, 1, 1]} : vector<16x4x6x64xf32> to vector<16x4x4x64xf32>
    %cst_19 = arith.constant 0.000000e+00 : f32
    %13 = vector.shape_cast %7 : vector<4x64xi1> to vector<1x1x4x64xi1>
    %14 = vector.broadcast %13 : vector<1x1x4x64xi1> to vector<16x4x4x64xi1>
    %15 = vector.broadcast %cst_19 : f32 to vector<16x4x4x64xf32>
    %16 = arith.select %14, %12, %15 : vector<16x4x4x64xi1>, vector<16x4x4x64xf32>
    %17 = vector.extract_strided_slice %10 {offsets = [0, 0], sizes = [1, 64], strides = [1, 1]} : vector<9x64xf32> to vector<1x64xf32>
    %18 = vector.shape_cast %17 : vector<1x64xf32> to vector<64xf32>
    %19 = vector.shape_cast %18 : vector<64xf32> to vector<1x1x1x64xf32>
    %20 = vector.broadcast %19 : vector<1x1x1x64xf32> to vector<16x4x4x64xf32>
    %21 = arith.mulf %16, %20 : vector<16x4x4x64xf32>
    %22 = vector.extract_strided_slice %11 {offsets = [0, 0, 1, 0], sizes = [16, 4, 4, 64], strides = [1, 1, 1, 1]} : vector<16x4x6x64xf32> to vector<16x4x4x64xf32>
    %23 = vector.extract_strided_slice %10 {offsets = [1, 0], sizes = [1, 64], strides = [1, 1]} : vector<9x64xf32> to vector<1x64xf32>
    %24 = vector.shape_cast %23 : vector<1x64xf32> to vector<64xf32>
    %25 = vector.shape_cast %24 : vector<64xf32> to vector<1x1x1x64xf32>
    %26 = vector.broadcast %25 : vector<1x1x1x64xf32> to vector<16x4x4x64xf32>
    %27 = arith.mulf %22, %26 : vector<16x4x4x64xf32>
    %28 = arith.addf %21, %27 : vector<16x4x4x64xf32>
    %29 = vector.extract_strided_slice %11 {offsets = [0, 0, 2, 0], sizes = [16, 4, 4, 64], strides = [1, 1, 1, 1]} : vector<16x4x6x64xf32> to vector<16x4x4x64xf32>
    %cst_20 = arith.constant 0.000000e+00 : f32
    %30 = vector.shape_cast %9 : vector<4x64xi1> to vector<1x1x4x64xi1>
    %31 = vector.broadcast %30 : vector<1x1x4x64xi1> to vector<16x4x4x64xi1>
    %32 = vector.broadcast %cst_20 : f32 to vector<16x4x4x64xf32>
    %33 = arith.select %31, %29, %32 : vector<16x4x4x64xi1>, vector<16x4x4x64xf32>
    %34 = vector.extract_strided_slice %10 {offsets = [2, 0], sizes = [1, 64], strides = [1, 1]} : vector<9x64xf32> to vector<1x64xf32>
    %35 = vector.shape_cast %34 : vector<1x64xf32> to vector<64xf32>
    %36 = vector.shape_cast %35 : vector<64xf32> to vector<1x1x1x64xf32>
    %37 = vector.broadcast %36 : vector<1x1x1x64xf32> to vector<16x4x4x64xf32>
    %38 = arith.mulf %33, %37 : vector<16x4x4x64xf32>
    %39 = arith.addf %28, %38 : vector<16x4x4x64xf32>
    %c0_21 = arith.constant 0 : index
    %c1_22 = arith.constant 1 : index
    %c0_23 = arith.constant 0 : index
    %c0_24 = arith.constant 0 : index
    %40 = vector.load %arg9[%c0_21, %c1_22, %c0_23, %c0_24] : memref<16x6x6x64xf32, #tpu.memory_space<vmem>>, vector<16x4x6x64xf32>
    %41 = vector.extract_strided_slice %40 {offsets = [0, 0, 0, 0], sizes = [16, 4, 4, 64], strides = [1, 1, 1, 1]} : vector<16x4x6x64xf32> to vector<16x4x4x64xf32>
    %cst_25 = arith.constant 0.000000e+00 : f32
    %42 = vector.shape_cast %7 : vector<4x64xi1> to vector<1x1x4x64xi1>
    %43 = vector.broadcast %42 : vector<1x1x4x64xi1> to vector<16x4x4x64xi1>
    %44 = vector.broadcast %cst_25 : f32 to vector<16x4x4x64xf32>
    %45 = arith.select %43, %41, %44 : vector<16x4x4x64xi1>, vector<16x4x4x64xf32>
    %46 = vector.extract_strided_slice %10 {offsets = [3, 0], sizes = [1, 64], strides = [1, 1]} : vector<9x64xf32> to vector<1x64xf32>
    %47 = vector.shape_cast %46 : vector<1x64xf32> to vector<64xf32>
    %48 = vector.shape_cast %47 : vector<64xf32> to vector<1x1x1x64xf32>
    %49 = vector.broadcast %48 : vector<1x1x1x64xf32> to vector<16x4x4x64xf32>
    %50 = arith.mulf %45, %49 : vector<16x4x4x64xf32>
    %51 = arith.addf %39, %50 : vector<16x4x4x64xf32>
    %52 = vector.extract_strided_slice %40 {offsets = [0, 0, 1, 0], sizes = [16, 4, 4, 64], strides = [1, 1, 1, 1]} : vector<16x4x6x64xf32> to vector<16x4x4x64xf32>
    %53 = vector.extract_strided_slice %10 {offsets = [4, 0], sizes = [1, 64], strides = [1, 1]} : vector<9x64xf32> to vector<1x64xf32>
    %54 = vector.shape_cast %53 : vector<1x64xf32> to vector<64xf32>
    %55 = vector.shape_cast %54 : vector<64xf32> to vector<1x1x1x64xf32>
    %56 = vector.broadcast %55 : vector<1x1x1x64xf32> to vector<16x4x4x64xf32>
    %57 = arith.mulf %52, %56 : vector<16x4x4x64xf32>
    %58 = arith.addf %51, %57 : vector<16x4x4x64xf32>
    %59 = vector.extract_strided_slice %40 {offsets = [0, 0, 2, 0], sizes = [16, 4, 4, 64], strides = [1, 1, 1, 1]} : vector<16x4x6x64xf32> to vector<16x4x4x64xf32>
    %cst_26 = arith.constant 0.000000e+00 : f32
    %60 = vector.shape_cast %9 : vector<4x64xi1> to vector<1x1x4x64xi1>
    %61 = vector.broadcast %60 : vector<1x1x4x64xi1> to vector<16x4x4x64xi1>
    %62 = vector.broadcast %cst_26 : f32 to vector<16x4x4x64xf32>
    %63 = arith.select %61, %59, %62 : vector<16x4x4x64xi1>, vector<16x4x4x64xf32>
    %64 = vector.extract_strided_slice %10 {offsets = [5, 0], sizes = [1, 64], strides = [1, 1]} : vector<9x64xf32> to vector<1x64xf32>
    %65 = vector.shape_cast %64 : vector<1x64xf32> to vector<64xf32>
    %66 = vector.shape_cast %65 : vector<64xf32> to vector<1x1x1x64xf32>
    %67 = vector.broadcast %66 : vector<1x1x1x64xf32> to vector<16x4x4x64xf32>
    %68 = arith.mulf %63, %67 : vector<16x4x4x64xf32>
    %69 = arith.addf %58, %68 : vector<16x4x4x64xf32>
    %c0_27 = arith.constant 0 : index
    %c2 = arith.constant 2 : index
    %c0_28 = arith.constant 0 : index
    %c0_29 = arith.constant 0 : index
    %70 = vector.load %arg9[%c0_27, %c2, %c0_28, %c0_29] : memref<16x6x6x64xf32, #tpu.memory_space<vmem>>, vector<16x4x6x64xf32>
    %71 = vector.extract_strided_slice %70 {offsets = [0, 0, 0, 0], sizes = [16, 4, 4, 64], strides = [1, 1, 1, 1]} : vector<16x4x6x64xf32> to vector<16x4x4x64xf32>
    %cst_30 = arith.constant 0.000000e+00 : f32
    %72 = vector.shape_cast %7 : vector<4x64xi1> to vector<1x1x4x64xi1>
    %73 = vector.broadcast %72 : vector<1x1x4x64xi1> to vector<16x4x4x64xi1>
    %74 = vector.broadcast %cst_30 : f32 to vector<16x4x4x64xf32>
    %75 = arith.select %73, %71, %74 : vector<16x4x4x64xi1>, vector<16x4x4x64xf32>
    %76 = vector.extract_strided_slice %10 {offsets = [6, 0], sizes = [1, 64], strides = [1, 1]} : vector<9x64xf32> to vector<1x64xf32>
    %77 = vector.shape_cast %76 : vector<1x64xf32> to vector<64xf32>
    %78 = vector.shape_cast %77 : vector<64xf32> to vector<1x1x1x64xf32>
    %79 = vector.broadcast %78 : vector<1x1x1x64xf32> to vector<16x4x4x64xf32>
    %80 = arith.mulf %75, %79 : vector<16x4x4x64xf32>
    %81 = arith.addf %69, %80 : vector<16x4x4x64xf32>
    %82 = vector.extract_strided_slice %70 {offsets = [0, 0, 1, 0], sizes = [16, 4, 4, 64], strides = [1, 1, 1, 1]} : vector<16x4x6x64xf32> to vector<16x4x4x64xf32>
    %83 = vector.extract_strided_slice %10 {offsets = [7, 0], sizes = [1, 64], strides = [1, 1]} : vector<9x64xf32> to vector<1x64xf32>
    %84 = vector.shape_cast %83 : vector<1x64xf32> to vector<64xf32>
    %85 = vector.shape_cast %84 : vector<64xf32> to vector<1x1x1x64xf32>
    %86 = vector.broadcast %85 : vector<1x1x1x64xf32> to vector<16x4x4x64xf32>
    %87 = arith.mulf %82, %86 : vector<16x4x4x64xf32>
    %88 = arith.addf %81, %87 : vector<16x4x4x64xf32>
    %89 = vector.extract_strided_slice %70 {offsets = [0, 0, 2, 0], sizes = [16, 4, 4, 64], strides = [1, 1, 1, 1]} : vector<16x4x6x64xf32> to vector<16x4x4x64xf32>
    %cst_31 = arith.constant 0.000000e+00 : f32
    %90 = vector.shape_cast %9 : vector<4x64xi1> to vector<1x1x4x64xi1>
    %91 = vector.broadcast %90 : vector<1x1x4x64xi1> to vector<16x4x4x64xi1>
    %92 = vector.broadcast %cst_31 : f32 to vector<16x4x4x64xf32>
    %93 = arith.select %91, %89, %92 : vector<16x4x4x64xi1>, vector<16x4x4x64xf32>
    %94 = vector.extract_strided_slice %10 {offsets = [8, 0], sizes = [1, 64], strides = [1, 1]} : vector<9x64xf32> to vector<1x64xf32>
    %95 = vector.shape_cast %94 : vector<1x64xf32> to vector<64xf32>
    %96 = vector.shape_cast %95 : vector<64xf32> to vector<1x1x1x64xf32>
    %97 = vector.broadcast %96 : vector<1x1x1x64xf32> to vector<16x4x4x64xf32>
    %98 = arith.mulf %93, %97 : vector<16x4x4x64xf32>
    %99 = arith.addf %88, %98 : vector<16x4x4x64xf32>
    %c0_32 = arith.constant 0 : index
    %c0_33 = arith.constant 0 : index
    %100 = vector.load %arg3[%c0_32, %c0_33] : memref<1x64xf32, #tpu.memory_space<vmem>>, vector<1x64xf32>
    %101 = vector.shape_cast %100 : vector<1x64xf32> to vector<64xf32>
    %102 = vector.shape_cast %101 : vector<64xf32> to vector<1x1x1x64xf32>
    %103 = vector.broadcast %102 : vector<1x1x1x64xf32> to vector<16x4x4x64xf32>
    %104 = arith.addf %99, %103 : vector<16x4x4x64xf32>
    %cst_34 = arith.constant 0.000000e+00 : f32
    %105 = vector.broadcast %cst_34 : f32 to vector<16x4x4x64xf32>
    %106 = arith.maximumf %104, %105 : vector<16x4x4x64xf32>
    %107 = vector.shape_cast %106 : vector<16x4x4x64xf32> to vector<256x64xf32>
    %c0_35 = arith.constant 0 : index
    %c0_36 = arith.constant 0 : index
    %108 = vector.load %arg4[%c0_35, %c0_36] : memref<64x32xf32, #tpu.memory_space<vmem>>, vector<64x32xf32>
    %cst_37 = arith.constant dense<0.000000e+00> : vector<256x32xf32>
    %109 = tpu.matmul %107, %108, %cst_37 {dimension_numbers = #tpu.dot_dimension_numbers<[1], [0], [0], [1], [0, 0, 1, 1], [], []>} : vector<256x64xf32>, vector<64x32xf32>, vector<256x32xf32> -> vector<256x32xf32>
    %c0_38 = arith.constant 0 : index
    %c0_39 = arith.constant 0 : index
    %110 = vector.load %arg5[%c0_38, %c0_39] : memref<1x32xf32, #tpu.memory_space<vmem>>, vector<1x32xf32>
    %111 = vector.shape_cast %110 : vector<1x32xf32> to vector<32xf32>
    %112 = vector.shape_cast %111 : vector<32xf32> to vector<1x32xf32>
    %113 = vector.broadcast %112 : vector<1x32xf32> to vector<256x32xf32>
    %114 = arith.addf %109, %113 : vector<256x32xf32>
    %cst_40 = arith.constant 0.000000e+00 : f32
    %115 = vector.broadcast %cst_40 : f32 to vector<256x32xf32>
    %116 = arith.maximumf %114, %115 : vector<256x32xf32>
    %117 = vector.shape_cast %116 : vector<256x32xf32> to vector<16x16x32xf32>
    %cst_41 = arith.constant dense<0.000000e+00> : vector<16x32xf32>
    %118 = vector.multi_reduction <add>, %117, %cst_41 [1] : vector<16x16x32xf32> to vector<16x32xf32>
    %cst_42 = arith.constant 6.250000e-02 : f32
    %119 = vector.broadcast %cst_42 : f32 to vector<16x32xf32>
    %120 = arith.mulf %118, %119 : vector<16x32xf32>
    %c0_43 = arith.constant 0 : index
    %c0_44 = arith.constant 0 : index
    %121 = vector.load %arg6[%c0_43, %c0_44] : memref<32x128xf32, #tpu.memory_space<vmem>>, vector<32x128xf32>
    %cst_45 = arith.constant dense<0.000000e+00> : vector<16x128xf32>
    %122 = tpu.matmul %120, %121, %cst_45 {dimension_numbers = #tpu.dot_dimension_numbers<[1], [0], [0], [1], [0, 0, 1, 1], [], []>} : vector<16x32xf32>, vector<32x128xf32>, vector<16x128xf32> -> vector<16x128xf32>
    %c0_46 = arith.constant 0 : index
    %c0_47 = arith.constant 0 : index
    %123 = vector.load %arg7[%c0_46, %c0_47] : memref<1x128xf32, #tpu.memory_space<vmem>>, vector<1x128xf32>
    %124 = vector.broadcast %123 : vector<1x128xf32> to vector<16x128xf32>
    %125 = arith.addf %122, %124 : vector<16x128xf32>
    %c0_48 = arith.constant 0 : index
    %c0_49 = arith.constant 0 : index
    %126 = vector.load %arg8[%c0_48, %c0_49] : memref<16x128xf32, #tpu.memory_space<vmem>>, vector<16x128xf32>
    tpu.vector_store %arg8[%c0_48, %c0_49], %125 {strides = array<i32>} : memref<16x128xf32, #tpu.memory_space<vmem>>, vector<16x128xf32>,
    return
  }
  func.func @transform_0(%arg0: i32) -> (i32, i32, i32, i32) {
    %c0_i32 = arith.constant 0 : i32
    %c0_i32_0 = arith.constant 0 : i32
    %c0_i32_1 = arith.constant 0 : i32
    %c0_i32_2 = arith.constant 0 : i32
    return %arg0, %c0_i32, %c0_i32_0, %c0_i32_1 : i32, i32, i32, i32
  }
  func.func @transform_1(%arg0: i32) -> (i32, i32) {
    %c0_i32 = arith.constant 0 : i32
    %c0_i32_0 = arith.constant 0 : i32
    %c0_i32_1 = arith.constant 0 : i32
    return %c0_i32, %c0_i32_0 : i32, i32
  }
  func.func @transform_2(%arg0: i32) -> (i32, i32) {
    %c0_i32 = arith.constant 0 : i32
    %c0_i32_0 = arith.constant 0 : i32
    %c0_i32_1 = arith.constant 0 : i32
    return %c0_i32, %c0_i32_0 : i32, i32
  }
  func.func @transform_3(%arg0: i32) -> (i32, i32) {
    %c0_i32 = arith.constant 0 : i32
    %c0_i32_0 = arith.constant 0 : i32
    %c0_i32_1 = arith.constant 0 : i32
    return %c0_i32, %c0_i32_0 : i32, i32
  }
  func.func @transform_4(%arg0: i32) -> (i32, i32) {
    %c0_i32 = arith.constant 0 : i32
    %c0_i32_0 = arith.constant 0 : i32
    %c0_i32_1 = arith.constant 0 : i32
    return %c0_i32, %c0_i32_0 : i32, i32
  }
  func.func @transform_5(%arg0: i32) -> (i32, i32) {
    %c0_i32 = arith.constant 0 : i32
    %c0_i32_0 = arith.constant 0 : i32
    %c0_i32_1 = arith.constant 0 : i32
    return %c0_i32, %c0_i32_0 : i32, i32
  }
  func.func @transform_6(%arg0: i32) -> (i32, i32) {
    %c0_i32 = arith.constant 0 : i32
    %c0_i32_0 = arith.constant 0 : i32
    %c0_i32_1 = arith.constant 0 : i32
    return %c0_i32, %c0_i32_0 : i32, i32
  }
  func.func @transform_7(%arg0: i32) -> (i32, i32) {
    %c0_i32 = arith.constant 0 : i32
    %c0_i32_0 = arith.constant 0 : i32
    return %arg0, %c0_i32 : i32, i32
  }
}

</mosaic_0001>

<bundles_post_ra>
// kernel: tpu_custom_call.1
= control target key start
LH: loop header
LB: loop body
LE: loop exit
PB: predicated region body
PF: predicated region fallthrough
CT: control target
= control target key end

     0   :  { %12 = vsyncpa [#allocation4], 0  ;;  %s6009_s0 = inlined_call_operand.hbm [shape: f32[16,4,4,64], index: 0, kind: input, shape index: {}]   ;;  %s6010_s1 = inlined_call_operand.vmem [shape: f32[9,64], index: 1, kind: input, shape index: {}]   ;;  %s6011_s2 = inlined_call_operand.vmem [shape: f32[1,64], index: 2, kind: input, shape index: {}]   ;;  %s6012_s3 = inlined_call_operand.vmem [shape: f32[64,32], index: 3, kind: input, shape index: {}]   ;;  %s6013_s4 = inlined_call_operand.vmem [shape: f32[1,32], index: 4, kind: input, shape index: {}]   ;;  %s6014_s5 = inlined_call_operand.vmem [shape: f32[32,128], index: 5, kind: input, shape index: {}]   ;;  %s6015_s6 = inlined_call_operand.vmem [shape: f32[1,128], index: 6, kind: input, shape index: {}]   ;;  %s6016_s7 = inlined_call_operand.hbm [shape: f32[16,128], index: 7, kind: output, shape index: {}]  }
   0x1   :  { %13 = vsyncpa [#allocation5], 0  ;;  %s4177_s24 = smov [#allocation3]  }
   0x2   :  { %s19_s25 = sshll.u32 %s4177_s24, 4  ;;  %s20_s25 = int_to_ptr.vmem [resolvable:$true] %s19_s25 }
   0x3   :  { %s4141_s26 = scalar_lea.vmem %s20_s25, 4096  ;;  %p4146_p1 = scmp.lt.s32.totalorder %s20_s25, %s20_s25 }
   0x4   :  { %p4142_p0 = scmp.ne.s32.totalorder %s20_s25, %s4141_s26  ;;  %p4147_p2 = scmp.lt.s32.totalorder %s4141_s26, %s4141_s26 }
   0x6   :  { %p4148_p3 = por %p4147_p2, %p4146_p1 }
   0x8   :  { %p4149_p4 = pnand %p4148_p3, %p4142_p0 }
   0xa   :  { %4152 = shalt.err (!%p4149_p4)
}
   0xb   :  { %s4178_s27 = smov 64   ;;  %s4179_s28 = smov 4  }
   0xc   :  { %25 = dma.hbm_to_vmem [thread:$0]  %s6009_s0, 4096, %s20_s25, [#allocation4], %s4178_s27, %s4178_s27, %s4179_s28  }
   0xd   :  { %4173 = dma.done.wait [#allocation4], 4096  }
   0xe   :  { %4174 = vsyncadd [#allocation4], 4294963200  ;;  %vm41_vm0 = vcmask 521216   ;;  %v205_v0 = vlaneseq  ;;  %v4180_v1 = vmov 0.0   ;;  %v3210_v3 = vld [vmem:[%s6012_s3 + $0x38] sm:$0xff]  ;;  %v3209_v4 = vld [vmem:[%s6012_s3 + $0x30] sm:$0xff] }
   0xf   :  { %42 = vst.msk [vmem:[#allocation2] sm:$0x3f] %vm41_vm0, %v4180_v1  ;;  %43 = vst.msk [vmem:[#allocation2 + $0x30] sm:$0x3f] %vm41_vm0, %v4180_v1  ;;  %vm140_vm1 = vcmask 519168   ;;  %4027 = vmatprep.subr.mxu0 %v3210_v3  ;;  %4102 = vmatprep.subr.mxu1 %v3210_v3  ;;  %v3208_v10 = vld [vmem:[%s6012_s3 + $0x28] sm:$0xff] }
  0x10   :  { %44 = vst.msk [vmem:[#allocation2 + $0x60] sm:$0x3f] %vm41_vm0, %v4180_v1  ;;  %45 = vst.msk [vmem:[#allocation2 + $0x90] sm:$0x3f] %vm41_vm0, %v4180_v1  ;;  %v4259_v2 = vshrl.u32 %v205_v0, 7  ;;  %4028 = vmatpush3.msra.mxu0 %v3210_v3  ;;  %4110 = vmatpush3.msra.mxu1 %v3210_v3  ;;  %v209_v16 = vld [vmem:[%s6010_s1] sm:$0xff] }
  0x11   :  { %46 = vst.msk [vmem:[#allocation2 + $0xc0] sm:$0x3f] %vm41_vm0, %v4180_v1  ;;  %47 = vst.msk [vmem:[#allocation2 + $0xf0] sm:$0x3f] %vm41_vm0, %v4180_v1  ;;  %v75_v11 = vld [vmem:[#allocation3] sm:$0xf]  ;;  %4029 = vmatprep.subr.mxu0 %v3209_v4  ;;  %4103 = vmatprep.subr.mxu1 %v3209_v4 }
  0x12   :  { %48 = vst.msk [vmem:[#allocation2 + $0x120] sm:$0x3f] %vm41_vm0, %v4180_v1  ;;  %49 = vst.msk [vmem:[#allocation2 + $0x150] sm:$0x3f] %vm41_vm0, %v4180_v1  ;;  %v343_v5 = vsub.s32 0, %v4259_v2  ;;  %v411_v6 = vsub.s32 1, %v4259_v2  ;;  %4030 = vmatpush3.msra.mxu0 %v3209_v4  ;;  %4111 = vmatpush3.msra.mxu1 %v3209_v4 }
  0x13   :  { %50 = vst.msk [vmem:[#allocation2 + $0x180] sm:$0x3f] %vm41_vm0, %v4180_v1  ;;  %51 = vst.msk [vmem:[#allocation2 + $0x1b0] sm:$0x3f] %vm41_vm0, %v4180_v1  ;;  %v993_v7 = vsub.s32 2, %v4259_v2  ;;  %v1253_v8 = vsub.s32 3, %v4259_v2  ;;  %4031 = vmatprep.subr.mxu0 %v3208_v10  ;;  %4104 = vmatprep.subr.mxu1 %v3208_v10 }
  0x14   :  { %52 = vst.msk [vmem:[#allocation2 + $0x1e0] sm:$0x3f] %vm41_vm0, %v4180_v1  ;;  %53 = vst.msk [vmem:[#allocation2 + $0x210] sm:$0x3f] %vm41_vm0, %v4180_v1  ;;  %v1385_v9 = vsub.s32 4, %v4259_v2  ;;  %vm207_vm2 = vcmp.gt.s32.totalorder %v4259_v2, 0  ;;  %v4289_v20 = vrot.slane %v209_v16, %v343_v5  ;;  %v4291_v21 = vrot.slane %v209_v16, %v411_v6  ;;  %4032 = vmatpush3.msra.mxu0 %v3208_v10 }
  0x15   :  { %54 = vst.msk [vmem:[#allocation2 + $0x240] sm:$0x3f] %vm41_vm0, %v4180_v1  ;;  %55 = vst.msk [vmem:[#allocation2 + $0x270] sm:$0x3f] %vm41_vm0, %v4180_v1  ;;  %v1965_v12 = vsub.s32 5, %v4259_v2  ;;  %v2226_v13 = vsub.s32 6, %v4259_v2  ;;  %v4293_v22 = vrot.slane %v209_v16, %v993_v7  ;;  %v4302_v26 = vrot.slane %v209_v16, %v1253_v8  ;;  %4112 = vmatpush3.msra.mxu1 %v3208_v10 }
  0x16   :  { %56 = vst.msk [vmem:[#allocation2 + $0x2a0] sm:$0x3f] %vm41_vm0, %v4180_v1  ;;  %57 = vst.msk [vmem:[#allocation2 + $0x2d0] sm:$0x3f] %vm41_vm0, %v4180_v1  ;;  %v76_v14 = vld [vmem:[#allocation3 + $0x4] sm:$0xf]  ;;  %v4304_v27 = vrot.slane %v209_v16, %v1385_v9 }
  0x17   :  { %59 = vst.msk [vmem:[#allocation2 + $0x28] sm:$0x3f] %vm41_vm0, %v4180_v1  ;;  %60 = vst.msk [vmem:[#allocation2 + $0x58] sm:$0x3f] %vm41_vm0, %v4180_v1  ;;  %v77_v15 = vld [vmem:[#allocation3 + $0x8] sm:$0xf]  ;;  %v4311_v33 = vrot.slane %v209_v16, %v1965_v12  ;;  %v4318_v38 = vrot.slane %v209_v16, %v2226_v13 }
  0x18   :  { %61 = vst.msk [vmem:[#allocation2 + $0x88] sm:$0x3f] %vm41_vm0, %v4180_v1  ;;  %62 = vst.msk [vmem:[#allocation2 + $0xb8] sm:$0x3f] %vm41_vm0, %v4180_v1  ;;  %v2358_v17 = vsub.s32 7, %v4259_v2  ;;  %v3207_v18 = vld [vmem:[%s6012_s3 + $0x20] sm:$0xff] }
  0x19   :  { %63 = vst.msk [vmem:[#allocation2 + $0xe8] sm:$0x3f] %vm41_vm0, %v4180_v1  ;;  %64 = vst.msk [vmem:[#allocation2 + $0x118] sm:$0x3f] %vm41_vm0, %v4180_v1  ;;  %vm208_vm3 = vcmp.lt.s32.totalorder %v4259_v2, 3  ;;  %v3206_v30 = vld [vmem:[%s6012_s3 + $0x18] sm:$0xff]  ;;  %4033 = vmatprep.subr.mxu0 %v3207_v18  ;;  %4105 = vmatprep.subr.mxu1 %v3207_v18 }
  0x1a   :  { %65 = vst.msk [vmem:[#allocation2 + $0x148] sm:$0x3f] %vm41_vm0, %v4180_v1  ;;  %66 = vst.msk [vmem:[#allocation2 + $0x178] sm:$0x3f] %vm41_vm0, %v4180_v1  ;;  %v211_v19 = vld [vmem:[#allocation2] sm:$0x3f]  ;;  %v4320_v39 = vrot.slane %v209_v16, %v2358_v17  ;;  %4034 = vmatpush3.msra.mxu0 %v3207_v18  ;;  %4113 = vmatpush3.msra.mxu1 %v3207_v18 }
  0x1b   :  { %67 = vst.msk [vmem:[#allocation2 + $0x1a8] sm:$0x3f] %vm41_vm0, %v4180_v1  ;;  %68 = vst.msk [vmem:[#allocation2 + $0x1d8] sm:$0x3f] %vm41_vm0, %v4180_v1  ;;  %v4298_v23 = vld [vmem:[%s6010_s1 + $0x8] ss:$0 sm:$0xff]  ;;  %v413_v32 = vmul.f32 %v4291_v21, %v211_v19  ;;  %4035 = vmatprep.subr.mxu0 %v3206_v30  ;;  %4106 = vmatprep.subr.mxu1 %v3206_v30 }
  0x1c   :  { %69 = vst.msk [vmem:[#allocation2 + $0x208] sm:$0x3f] %vm41_vm0, %v4180_v1  ;;  %70 = vst.msk [vmem:[#allocation2 + $0x238] sm:$0x3f] %vm41_vm0, %v4180_v1  ;;  %v277_v24 = vsel %vm207_vm2, %v211_v19, 0.0  ;;  %v799_v25 = vrot.slane %v211_v19, 2  ;;  %4036 = vmatpush3.msra.mxu0 %v3206_v30  ;;  %4114 = vmatpush3.msra.mxu1 %v3206_v30 }
  0x1d   :  { %71 = vst.msk [vmem:[#allocation2 + $0x268] sm:$0x3f] %vm41_vm0, %v4180_v1  ;;  %72 = vst.msk [vmem:[#allocation2 + $0x298] sm:$0x3f] %vm41_vm0, %v4180_v1  ;;  %v78_v28 = vld [vmem:[#allocation3 + $0xc] sm:$0xf]  ;;  %v345_v31 = vmul.f32 %v4289_v20, %v277_v24 }
  0x1e   :  { %73 = vst.msk [vmem:[#allocation2 + $0x2c8] sm:$0x3f] %vm41_vm0, %v4180_v1  ;;  %74 = vst.msk [vmem:[#allocation2 + $0x2f8] sm:$0x3f] %vm41_vm0, %v4180_v1  ;;  %v2099_v29 = vld [vmem:[#allocation2 + $0x28] sm:$0x3f] }
  0x1f   :  { %141 = vst.msk [vmem:[#allocation2 + $0x9] sm:$0xf] %vm140_vm1, %v75_v11  ;;  %142 = vst.msk [vmem:[#allocation2 + $0x11] sm:$0xf] %vm140_vm1, %v76_v14  ;;  %v2163_v34 = vsel %vm207_vm2, %v2099_v29, 0.0  ;;  %v927_v37 = vsel %vm208_vm3, %v799_v25, 0.0  ;;  %v4345_v51 = vmul.f32 %v4320_v39, %v2099_v29 }
  0x20   :  { %143 = vst.msk [vmem:[#allocation2 + $0x19] sm:$0xf] %vm140_vm1, %v77_v15  ;;  %144 = vst.msk [vmem:[#allocation2 + $0x21] sm:$0xf] %vm140_vm1, %v78_v28  ;;  %v79_v35 = vld [vmem:[#allocation3 + $0x10] sm:$0xf]  ;;  %v995_v45 = vmul.f32 %v4293_v22, %v927_v37  ;;  %v4342_v50 = vmul.f32 %v4318_v38, %v2163_v34 }
  0x21   :  { %v80_v36 = vld [vmem:[#allocation3 + $0x14] sm:$0xf]  ;;  %v2747_v40 = vrot.slane %v2099_v29, 2  ;;  %v81_v41 = vld [vmem:[#allocation3 + $0x18] sm:$0xf]  ;;  %v541_v44 = vrot.slane %v413_v32, 1 }
  0x22   :  { %145 = vst.msk [vmem:[#allocation2 + $0x39] sm:$0xf] %vm140_vm1, %v79_v35  ;;  %146 = vst.msk [vmem:[#allocation2 + $0x41] sm:$0xf] %vm140_vm1, %v80_v36  ;;  %v4324_v42 = vld [vmem:[#allocation2 + $0x30] sm:$0x3f] }
  0x23   :  { %v3205_v43 = vld [vmem:[%s6012_s3 + $0x10] sm:$0xff]  ;;  %147 = vst.msk [vmem:[#allocation2 + $0x49] sm:$0xf] %vm140_vm1, %v81_v41  ;;  %v281_v46 = vsel %vm207_vm2, %v4324_v42, 0.0  ;;  %v4336_v47 = vmul.f32 %v4291_v21, %v4324_v42  ;;  %v82_v48 = vld [vmem:[#allocation3 + $0x1c] sm:$0xf]  ;;  %v669_v57 = vadd.f32 %v541_v44, %v345_v31 }
  0x24   :  { %v3204_v49 = vld [vmem:[%s6012_s3 + $0x8] sm:$0xff]  ;;  %v2875_v52 = vsel %vm208_vm3, %v2747_v40, 0.0  ;;  %v4350_v53 = vmul.f32 %v4289_v20, %v281_v46  ;;  %148 = vst.msk [vmem:[#allocation2 + $0x51] sm:$0xf] %vm140_vm1, %v82_v48  ;;  %v111_v54 = vld [vmem:[#allocation3 + $0x90] sm:$0xf]  ;;  %4037 = vmatprep.subr.mxu0 %v3205_v43  ;;  %4107 = vmatprep.subr.mxu1 %v3205_v43 }
  0x25   :  { %v112_v55 = vld [vmem:[#allocation3 + $0x94] sm:$0xf]  ;;  %v4354_v59 = vmul.f32 %v4298_v23, %v2875_v52  ;;  %v545_v60 = vrot.slane %v4336_v47, 1  ;;  %v803_v61 = vrot.slane %v4324_v42, 2  ;;  %177 = vst.msk [vmem:[#allocation2 + $0x1b9] sm:$0xf] %vm140_vm1, %v111_v54  ;;  %4038 = vmatpush3.msra.mxu0 %v3205_v43  ;;  %v1059_v6 = vadd.f32 %v995_v45, %v669_v57  ;;  %4115 = vmatpush3.msra.mxu1 %v3205_v43 }
  0x26   :  { %v212_v56 = vld [vmem:[#allocation2 + $0x8] sm:$0x3f]  ;;  %178 = vst.msk [vmem:[#allocation2 + $0x1c1] sm:$0xf] %vm140_vm1, %v112_v55  ;;  %v1124_v1 = vld [vmem:[#allocation2 + $0x10] sm:$0x3f]  ;;  %4039 = vmatprep.subr.mxu0 %v3204_v49  ;;  %4108 = vmatprep.subr.mxu1 %v3204_v49 }
  0x27   :  { %v1123_v58 = vld [vmem:[#allocation2 + $0x8] sm:$0x3f]  ;;  %v278_v62 = vsel %vm207_vm2, %v212_v56, 0.0  ;;  %v414_v63 = vmul.f32 %v4291_v21, %v212_v56  ;;  %v800_v0 = vrot.slane %v212_v56, 2  ;;  %v3203_v4 = vld [vmem:[%s6012_s3] sm:$0xff]  ;;  %v1188_v7 = vsel %vm207_vm2, %v1124_v1, 0.0  ;;  %4040 = vmatpush3.msra.mxu0 %v3204_v49  ;;  %4116 = vmatpush3.msra.mxu1 %v3204_v49 }
  0x28   :  { %v1187_v3 = vsel %vm207_vm2, %v1123_v58, 0.0  ;;  %v346_v5 = vmul.f32 %v4289_v20, %v278_v62  ;;  %v2096_v9 = vld [vmem:[#allocation2 + $0x10] sm:$0x3f]  ;;  %v1256_v12 = vmul.f32 %v4302_v26, %v1188_v7  ;;  %v1387_v13 = vmul.f32 %v4304_v27, %v1123_v58  ;;  %v2097_v14 = vld [vmem:[#allocation2 + $0x18] sm:$0x3f]  ;;  %4041 = vmatprep.subr.mxu0 %v3203_v4  ;;  %4109 = vmatprep.subr.mxu1 %v3203_v4  ;;  %s4181_s27 = smov [#allocation6]  }
  0x29   :  { %v1255_v8 = vmul.f32 %v4302_v26, %v1187_v3  ;;  %v542_v10 = vrot.slane %v414_v63, 1  ;;  %v928_v11 = vsel %vm208_vm3, %v800_v0, 0.0  ;;  %v1388_v17 = vmul.f32 %v4304_v27, %v1124_v1  ;;  %4042 = vmatpush3.msra.mxu0 %v3203_v4  ;;  %4117 = vmatpush3.msra.mxu1 %v3203_v4  ;;  %v213_v40 = vld [vmem:[#allocation2 + $0x10] sm:$0x3f]  ;;  %v214_v41 = vld [vmem:[#allocation2 + $0x18] sm:$0x3f] }
  0x2a   :  { %v996_v15 = vmul.f32 %v4293_v22, %v928_v11  ;;  %v1771_v18 = vrot.slane %v1123_v58, 2  ;;  %v1515_v24 = vrot.slane %v1387_v13, 1  ;;  %v1772_v25 = vrot.slane %v1124_v1, 2  ;;  %v4396_v62 = vld [vmem:[#allocation2 + $0x18] sm:$0x3f]  ;;  %s3931_s28 = sshll.u32 %s4181_s27, 4  ;;  %s3932_s28 = int_to_ptr.vmem [resolvable:$true] %s3931_s28 }
  0x2b   :  { %v1319_v16 = vadd.f32 %v1255_v8, %v1059_v6  ;;  %v670_v19 = vadd.f32 %v542_v10, %v346_v5  ;;  %v2160_v28 = vsel %vm207_vm2, %v2096_v9, 0.0  ;;  %v1516_v29 = vrot.slane %v1388_v17, 1  ;;  %v1126_v4 = vld [vmem:[#allocation2 + $0x20] sm:$0x3f]  ;;  %v113_v5 = vld [vmem:[#allocation3 + $0x98] sm:$0xf]  ;;  %p4158_p6 = scmp.lt.s32.totalorder %s3932_s28, %s3932_s28 }
  0x2c   :  { %v1899_v30 = vsel %vm208_vm3, %v1771_v18, 0.0  ;;  %v2161_v31 = vsel %vm207_vm2, %v2097_v14, 0.0  ;;  %v2228_v32 = vmul.f32 %v4318_v38, %v2160_v28  ;;  %v1900_v36 = vsel %vm208_vm3, %v1772_v25, 0.0  ;;  %179 = vst.msk [vmem:[#allocation2 + $0x1c9] sm:$0xf] %vm140_vm1, %v113_v5  ;;  %s4153_s29 = scalar_lea.vmem %s3932_s28, 256 }
  0x2d   :  { %v1060_v34 = vadd.f32 %v996_v15, %v670_v19  ;;  %v1643_v35 = vadd.f32 %v1515_v24, %v1319_v16  ;;  %v1967_v37 = vmul.f32 %v4311_v33, %v1899_v30  ;;  %v1968_v43 = vmul.f32 %v4311_v33, %v1900_v36  ;;  %v4412_v15 = vld [vmem:[%s6011_s2] ss:$0 sm:$0xff]  ;;  %v84_v36 = vld [vmem:[#allocation3 + $0x24] sm:$0xf]  ;;  %p4154_p5 = scmp.ne.s32.totalorder %s3932_s28, %s4153_s29  ;;  %p4159_p7 = scmp.lt.s32.totalorder %s4153_s29, %s4153_s29 }
  0x2e   :  { %v2229_v44 = vmul.f32 %v4318_v38, %v2161_v31  ;;  %v2360_v45 = vmul.f32 %v4320_v39, %v2096_v9  ;;  %v2361_v46 = vmul.f32 %v4320_v39, %v2097_v14  ;;  %v2744_v52 = vrot.slane %v2096_v9, 2  ;;  %v83_v30 = vld [vmem:[#allocation3 + $0x20] sm:$0xf]  ;;  %150 = vst.msk [vmem:[#allocation2 + $0x71] sm:$0xf] %vm140_vm1, %v84_v36 }
  0x2f   :  { %v1320_v48 = vadd.f32 %v1256_v12, %v1060_v34  ;;  %v2031_v49 = vadd.f32 %v1967_v37, %v1643_v35  ;;  %v2745_v54 = vrot.slane %v2097_v14, 2  ;;  %v279_v57 = vsel %vm207_vm2, %v213_v40, 0.0  ;;  %v114_v14 = vld [vmem:[#allocation3 + $0x9c] sm:$0xf]  ;;  %v85_v37 = vld [vmem:[#allocation3 + $0x28] sm:$0xf]  ;;  %p4160_p8 = por %p4159_p7, %p4158_p6 }
  0x30   :  { %v2488_v55 = vrot.slane %v2360_v45, 1  ;;  %v2489_v56 = vrot.slane %v2361_v46, 1  ;;  %v280_v58 = vsel %vm207_vm2, %v214_v41, 0.0  ;;  %v2872_v1 = vsel %vm208_vm3, %v2744_v52, 0.0  ;;  %180 = vst.msk [vmem:[#allocation2 + $0x1d1] sm:$0xf] %vm140_vm1, %v114_v14 }
  0x31   :  { %v1644_v63 = vadd.f32 %v1516_v29, %v1320_v48  ;;  %v2292_v0 = vadd.f32 %v2228_v32, %v2031_v49  ;;  %v2873_v3 = vsel %vm208_vm3, %v2745_v54, 0.0  ;;  %v2940_v6 = vmul.f32 %v4298_v23, %v2872_v1  ;;  %149 = vst.msk [vmem:[#allocation2 + $0x69] sm:$0xf] %vm140_vm1, %v83_v30  ;;  %v2098_v45 = vld [vmem:[#allocation2 + $0x20] sm:$0x3f]  ;;  %p4161_p9 = pnand %p4160_p8, %p4154_p5 }
  0x32   :  { %v2941_v7 = vmul.f32 %v4298_v23, %v2873_v3  ;;  %v347_v8 = vmul.f32 %v4289_v20, %v279_v57  ;;  %v348_v9 = vmul.f32 %v4289_v20, %v280_v58  ;;  %v415_v12 = vmul.f32 %v4291_v21, %v213_v40  ;;  %151 = vst.msk [vmem:[#allocation2 + $0x79] sm:$0xf] %vm140_vm1, %v85_v37  ;;  %v86_v46 = vld [vmem:[#allocation3 + $0x2c] sm:$0xf]  ;;  %v117_v57 = vld [vmem:[#allocation3 + $0xa8] sm:$0xf] }
  0x33   :  { %v2032_v10 = vadd.f32 %v1968_v43, %v1644_v63  ;;  %v2616_v11 = vadd.f32 %v2488_v55, %v2292_v0  ;;  %v416_v13 = vmul.f32 %v4291_v21, %v214_v41  ;;  %v801_v16 = vrot.slane %v213_v40, 2  ;;  %152 = vst.msk [vmem:[#allocation2 + $0x81] sm:$0xf] %vm140_vm1, %v86_v46  ;;  %v115_v55 = vld [vmem:[#allocation3 + $0xa0] sm:$0xf] }
  0x34   :  { %v802_v17 = vrot.slane %v214_v41, 2  ;;  %v1189_v18 = vsel %vm207_vm2, %v4396_v62, 0.0  ;;  %v1190_v19 = vsel %vm207_vm2, %v1126_v4, 0.0  ;;  %v543_v28 = vrot.slane %v415_v12, 1  ;;  %181 = vst.msk [vmem:[#allocation2 + $0x1e9] sm:$0xf] %vm140_vm1, %v115_v55 }
  0x35   :  { %v2293_v24 = vadd.f32 %v2229_v44, %v2032_v10  ;;  %v3004_v25 = vadd.f32 %v2940_v6, %v2616_v11  ;;  %v544_v29 = vrot.slane %v416_v13, 1  ;;  %vm3314_vm4 = vcmask 523264   ;;  %183 = vst.msk [vmem:[#allocation2 + $0x1f9] sm:$0xf] %vm140_vm1, %v117_v57  ;;  %v1127_v36 = vld [vmem:[#allocation2 + $0x38] sm:$0x3f] }
  0x36   :  { %v929_v31 = vsel %vm208_vm3, %v801_v16, 0.0  ;;  %v930_v32 = vsel %vm208_vm3, %v802_v17, 0.0  ;;  %v1257_v34 = vmul.f32 %v4302_v26, %v1189_v18  ;;  %v1258_v35 = vmul.f32 %v4302_v26, %v1190_v19  ;;  %v118_v16 = vld [vmem:[#allocation3 + $0xac] sm:$0xf] }
  0x37   :  { %v2617_v40 = vadd.f32 %v2489_v56, %v2293_v24  ;;  %v3075_v41 = vadd.f32 %v4412_v15, %v3004_v25  ;;  %v671_v43 = vadd.f32 %v543_v28, %v347_v8  ;;  %v672_v44 = vadd.f32 %v544_v29, %v348_v9  ;;  %v116_v56 = vld [vmem:[#allocation3 + $0xa4] sm:$0xf]  ;;  %184 = vst.msk [vmem:[#allocation2 + $0x201] sm:$0xf] %vm140_vm1, %v118_v16 }
  0x38   :  { %v997_v48 = vmul.f32 %v4293_v22, %v929_v31  ;;  %v998_v49 = vmul.f32 %v4293_v22, %v930_v32  ;;  %v1389_v52 = vmul.f32 %v4304_v27, %v4396_v62  ;;  %v1390_v54 = vmul.f32 %v4304_v27, %v1126_v4  ;;  %182 = vst.msk [vmem:[#allocation2 + $0x1f1] sm:$0xf] %vm140_vm1, %v116_v56 }
  0x39   :  { %v3005_v58 = vadd.f32 %v2941_v7, %v2617_v40  ;;  %v3139_v63 = vmax.f32 %v3075_v41, 0.0  ;;  %v1773_v0 = vrot.slane %v4396_v62, 2  ;;  %v1774_v1 = vrot.slane %v1126_v4, 2  ;;  %v216_v4 = vld [vmem:[#allocation2 + $0x38] sm:$0x3f] }
  0x3a   :  { %v1061_v3 = vadd.f32 %v997_v48, %v671_v43  ;;  %v1062_v5 = vadd.f32 %v998_v49, %v672_v44  ;;  %v1517_v6 = vrot.slane %v1389_v52, 1  ;;  %v1518_v8 = vrot.slane %v1390_v54, 1  ;;  %v1128_v43 = vld [vmem:[#allocation2 + $0x40] sm:$0x3f] }
  0x3b   :  { %v3076_v9 = vadd.f32 %v4412_v15, %v3005_v58  ;;  %v1901_v10 = vsel %vm208_vm3, %v1773_v0, 0.0  ;;  %v1902_v7 = vsel %vm208_vm3, %v1774_v1, 0.0  ;;  %v2162_v62 = vsel %vm207_vm2, %v2098_v45, 0.0 }
  0x3c   :  { %v1321_v11 = vadd.f32 %v1257_v34, %v1061_v3  ;;  %v1322_v12 = vadd.f32 %v1258_v35, %v1062_v5  ;;  %v1969_v13 = vmul.f32 %v4311_v33, %v1901_v10  ;;  %v1970_v14 = vmul.f32 %v4311_v33, %v1902_v7  ;;  %v2101_v10 = vld [vmem:[#allocation2 + $0x48] sm:$0x3f] }
  0x3d   :  { %v3140_v17 = vmax.f32 %v3076_v9, 0.0  ;;  %v2230_v18 = vmul.f32 %v4318_v38, %v2162_v62  ;;  %v2362_v19 = vmul.f32 %v4320_v39, %v2098_v45  ;;  %v2491_v24 = vrot.slane %v4345_v51, 1  ;;  %v2100_v9 = vld [vmem:[#allocation2 + $0x40] sm:$0x3f] }
  0x3e   :  { %v1645_v25 = vadd.f32 %v1517_v6, %v1321_v11  ;;  %v1646_v28 = vadd.f32 %v1518_v8, %v1322_v12  ;;  %v2746_v29 = vrot.slane %v2098_v45, 2  ;;  %v282_v30 = vsel %vm207_vm2, %v216_v4, 0.0  ;;  %v87_v12 = vld [vmem:[#allocation3 + $0x30] sm:$0xf] }
  0x3f   :  { %v3282_v31 = vcombine.low %v3139_v63, %v3140_v17  ;;  %v2490_v32 = vrot.slane %v2362_v19, 1  ;;  %v350_v34 = vmul.f32 %v4289_v20, %v282_v30  ;;  %v418_v35 = vmul.f32 %v4291_v21, %v216_v4  ;;  %v89_v19 = vld [vmem:[#allocation3 + $0x38] sm:$0xf]  ;;  %153 = vst.msk [vmem:[#allocation2 + $0x99] sm:$0xf] %vm140_vm1, %v87_v12 }
  0x40   :  { %v2033_v37 = vadd.f32 %v1969_v13, %v1645_v25  ;;  %v2034_v40 = vadd.f32 %v1970_v14, %v1646_v28  ;;  %v2874_v51 = vsel %vm208_vm3, %v2746_v29, 0.0  ;;  %v673_v41 = vadd.f32 %v545_v60, %v4350_v53  ;;  %155 = vst.msk [vmem:[#allocation2 + $0xa9] sm:$0xf] %vm140_vm1, %v89_v19  ;;  %v90_v30 = vld [vmem:[#allocation3 + $0x3c] sm:$0xf] }
  0x41   :  { %4043 = vmatprep.mubr.msk.f32.mxu0 %vm3314_vm4, %v3282_v31  ;;  %v2942_v44 = vmul.f32 %v4298_v23, %v2874_v51  ;;  %v546_v45 = vrot.slane %v418_v35, 1  ;;  %v804_v46 = vrot.slane %v216_v4, 2  ;;  %v931_v48 = vsel %vm208_vm3, %v803_v61, 0.0  ;;  %156 = vst.msk [vmem:[#allocation2 + $0xb1] sm:$0xf] %vm140_vm1, %v90_v30 }
  0x42   :  { %v2294_v49 = vadd.f32 %v2230_v18, %v2033_v37  ;;  %v2295_v52 = vadd.f32 %v4342_v50, %v2034_v40  ;;  %v999_v54 = vmul.f32 %v4293_v22, %v931_v48  ;;  %v1191_v47 = vsel %vm207_vm2, %v1127_v36, 0.0  ;;  %v217_v18 = vld [vmem:[#allocation2 + $0x40] sm:$0x3f]  ;;  %v120_v37 = vld [vmem:[#allocation3 + $0xb4] sm:$0xf] }
  0x43   :  { %v674_v53 = vadd.f32 %v546_v45, %v350_v34  ;;  %v932_v60 = vsel %vm208_vm3, %v804_v46, 0.0  ;;  %v1192_v55 = vsel %vm207_vm2, %v1128_v43, 0.0  ;;  %v1259_v42 = vmul.f32 %v4302_v26, %v1191_v47  ;;  %v121_v45 = vld [vmem:[#allocation3 + $0xb8] sm:$0xf]  ;;  %186 = vst.msk [vmem:[#allocation2 + $0x221] sm:$0xf] %vm140_vm1, %v120_v37 }
  0x44   :  { %v2618_v56 = vadd.f32 %v2490_v32, %v2294_v49  ;;  %v2619_v57 = vadd.f32 %v2491_v24, %v2295_v52  ;;  %v1000_v61 = vmul.f32 %v4293_v22, %v932_v60  ;;  %v1063_v58 = vadd.f32 %v999_v54, %v673_v41  ;;  %187 = vst.msk [vmem:[#allocation2 + $0x229] sm:$0xf] %vm140_vm1, %v121_v45 }
  0x45   :  { %v1260_v50 = vmul.f32 %v4302_v26, %v1192_v55  ;;  %v1391_v63 = vmul.f32 %v4304_v27, %v1127_v36  ;;  %v1392_v0 = vmul.f32 %v4304_v27, %v1128_v43  ;;  %v1775_v1 = vrot.slane %v1127_v36, 2  ;;  %v119_v36 = vld [vmem:[#allocation3 + $0xb0] sm:$0xf] }
  0x46   :  { %v3006_v3 = vadd.f32 %v2942_v44, %v2618_v56  ;;  %v3007_v5 = vadd.f32 %v4354_v59, %v2619_v57  ;;  %v1064_v6 = vadd.f32 %v1000_v61, %v674_v53  ;;  %v1323_v8 = vadd.f32 %v1259_v42, %v1063_v58  ;;  %v88_v59 = vld [vmem:[#allocation3 + $0x34] sm:$0xf]  ;;  %v218_v44 = vld [vmem:[#allocation2 + $0x48] sm:$0x3f]  ;;  %185 = vst.msk [vmem:[#allocation2 + $0x219] sm:$0xf] %vm140_vm1, %v119_v36 }
  0x47   :  { %v1519_v7 = vrot.slane %v1391_v63, 1  ;;  %v1520_v62 = vrot.slane %v1392_v0, 1  ;;  %v1776_v4 = vrot.slane %v1128_v43, 2  ;;  %v1903_v11 = vsel %vm208_vm3, %v1775_v1, 0.0  ;;  %154 = vst.msk [vmem:[#allocation2 + $0xa1] sm:$0xf] %vm140_vm1, %v88_v59 }
  0x48   :  { %v3077_v13 = vadd.f32 %v4412_v15, %v3006_v3  ;;  %v3078_v14 = vadd.f32 %v4412_v15, %v3007_v5  ;;  %v1324_v16 = vadd.f32 %v1260_v50, %v1064_v6  ;;  %v1971_v17 = vmul.f32 %v4311_v33, %v1903_v11  ;;  %v1129_v0 = vld [vmem:[#allocation2 + $0x48] sm:$0x3f]  ;;  %v1130_v1 = vld [vmem:[#allocation2 + $0x50] sm:$0x3f] }
  0x49   :  { %v1647_v24 = vadd.f32 %v1519_v7, %v1323_v8  ;;  %v1904_v25 = vsel %vm208_vm3, %v1776_v4, 0.0  ;;  %v2164_v28 = vsel %vm207_vm2, %v2100_v9, 0.0  ;;  %v2165_v29 = vsel %vm207_vm2, %v2101_v10, 0.0 }
  0x4a   :  { %v3141_v31 = vmax.f32 %v3077_v13, 0.0  ;;  %v3142_v32 = vmax.f32 %v3078_v14, 0.0  ;;  %v1648_v34 = vadd.f32 %v1520_v62, %v1324_v16  ;;  %v1972_v35 = vmul.f32 %v4311_v33, %v1904_v25 }
  0x4b   :  { %v2035_v40 = vadd.f32 %v1971_v17, %v1647_v24  ;;  %v2232_v51 = vmul.f32 %v4318_v38, %v2164_v28  ;;  %v2233_v41 = vmul.f32 %v4318_v38, %v2165_v29  ;;  %v2364_v43 = vmul.f32 %v4320_v39, %v2100_v9  ;;  %v2102_v28 = vld [vmem:[#allocation2 + $0x50] sm:$0x3f] }
  0x4c   :  { %v3283_v46 = vcombine.low %v3141_v31, %v3142_v32  ;;  %v2036_v48 = vadd.f32 %v1972_v35, %v1648_v34  ;;  %v2365_v49 = vmul.f32 %v4320_v39, %v2101_v10  ;;  %v2748_v52 = vrot.slane %v2100_v9, 2 }
  0x4d   :  { %v2296_v54 = vadd.f32 %v2232_v51, %v2035_v40  ;;  %v2492_v47 = vrot.slane %v2364_v43, 1  ;;  %v2749_v53 = vrot.slane %v2101_v10, 2  ;;  %v283_v60 = vsel %vm207_vm2, %v217_v18, 0.0  ;;  %v2103_v40 = vld [vmem:[#allocation2 + $0x58] sm:$0x3f] }
  0x4e   :  { %4044 = vmatmul.mubr.msk.f32.vlgmr.msra.gmra.mxu0 %vm3314_vm4, %v3283_v46  ;;  %v2297_v55 = vadd.f32 %v2233_v41, %v2036_v48  ;;  %v2493_v42 = vrot.slane %v2365_v49, 1  ;;  %v2876_v56 = vsel %vm208_vm3, %v2748_v52, 0.0  ;;  %v284_v57 = vsel %vm207_vm2, %v218_v44, 0.0 }
  0x4f   :  { %v2620_v61 = vadd.f32 %v2492_v47, %v2296_v54  ;;  %v2877_v58 = vsel %vm208_vm3, %v2749_v53, 0.0  ;;  %v2944_v50 = vmul.f32 %v4298_v23, %v2876_v56  ;;  %v351_v63 = vmul.f32 %v4289_v20, %v283_v60  ;;  %v247_v60 = vld [vmem:[#allocation2 + $0x1b0] sm:$0x3f] }
  0x50   :  { %v2621_v3 = vadd.f32 %v2493_v42, %v2297_v55  ;;  %v2945_v5 = vmul.f32 %v4298_v23, %v2877_v58  ;;  %v352_v6 = vmul.f32 %v4289_v20, %v284_v57  ;;  %v419_v8 = vmul.f32 %v4291_v21, %v217_v18 }
  0x51   :  { %v3008_v9 = vadd.f32 %v2944_v50, %v2620_v61  ;;  %v420_v10 = vmul.f32 %v4291_v21, %v218_v44  ;;  %v805_v7 = vrot.slane %v217_v18, 2  ;;  %v806_v62 = vrot.slane %v218_v44, 2  ;;  %v248_v61 = vld [vmem:[#allocation2 + $0x1b8] sm:$0x3f] }
  0x52   :  { %v3009_v4 = vadd.f32 %v2945_v5, %v2621_v3  ;;  %v547_v11 = vrot.slane %v419_v8, 1  ;;  %v1193_v12 = vsel %vm207_vm2, %v1129_v0, 0.0  ;;  %v1194_v13 = vsel %vm207_vm2, %v1130_v1, 0.0 }
  0x53   :  { %v3079_v14 = vadd.f32 %v4412_v15, %v3008_v9  ;;  %v548_v16 = vrot.slane %v420_v10, 1  ;;  %v933_v17 = vsel %vm208_vm3, %v805_v7, 0.0  ;;  %v934_v59 = vsel %vm208_vm3, %v806_v62, 0.0 }
  0x54   :  { %v3080_v18 = vadd.f32 %v4412_v15, %v3009_v4  ;;  %v675_v19 = vadd.f32 %v547_v11, %v351_v63  ;;  %v1001_v24 = vmul.f32 %v4293_v22, %v933_v17  ;;  %v1002_v25 = vmul.f32 %v4293_v22, %v934_v59 }
  0x55   :  { %v3143_v29 = vmax.f32 %v3079_v14, 0.0  ;;  %v676_v30 = vadd.f32 %v548_v16, %v352_v6  ;;  %v1261_v31 = vmul.f32 %v4302_v26, %v1193_v12  ;;  %v1262_v32 = vmul.f32 %v4302_v26, %v1194_v13  ;;  %v1159_v14 = vld [vmem:[#allocation2 + $0x1b8] sm:$0x3f]  ;;  %v1160_v16 = vld [vmem:[#allocation2 + $0x1c0] sm:$0x3f] }
  0x56   :  { %v3144_v34 = vmax.f32 %v3080_v18, 0.0  ;;  %v1065_v35 = vadd.f32 %v1001_v24, %v675_v19  ;;  %v1393_v36 = vmul.f32 %v4304_v27, %v1129_v0  ;;  %v1394_v37 = vmul.f32 %v4304_v27, %v1130_v1 }
  0x57   :  { %v1066_v51 = vadd.f32 %v1002_v25, %v676_v30  ;;  %v1777_v41 = vrot.slane %v1129_v0, 2  ;;  %v1778_v43 = vrot.slane %v1130_v1, 2  ;;  %v2166_v44 = vsel %vm207_vm2, %v2102_v28, 0.0  ;;  %v122_v1 = vld [vmem:[#allocation3 + $0xbc] sm:$0xf] }
  0x58   :  { %v3284_v45 = vcombine.low %v3143_v29, %v3144_v34  ;;  %v1325_v46 = vadd.f32 %v1261_v31, %v1065_v35  ;;  %v1521_v48 = vrot.slane %v1393_v36, 1  ;;  %v1522_v49 = vrot.slane %v1394_v37, 1  ;;  %188 = vst.msk [vmem:[#allocation2 + $0x231] sm:$0xf] %vm140_vm1, %v122_v1 }
  0x59   :  { %v1326_v52 = vadd.f32 %v1262_v32, %v1066_v51  ;;  %v1905_v54 = vsel %vm208_vm3, %v1777_v41, 0.0  ;;  %v1906_v47 = vsel %vm208_vm3, %v1778_v43, 0.0  ;;  %v2167_v53 = vsel %vm207_vm2, %v2103_v40, 0.0 }
  0x5a   :  { %4046 = vmatprep.mubr.msk.f32.mxu0 %vm3314_vm4, %v3284_v45  ;;  %v1649_v55 = vadd.f32 %v1521_v48, %v1325_v46  ;;  %v1973_v42 = vmul.f32 %v4311_v33, %v1905_v54  ;;  %v1974_v56 = vmul.f32 %v4311_v33, %v1906_v47  ;;  %v2234_v57 = vmul.f32 %v4318_v38, %v2166_v44 }
  0x5b   :  { %v1650_v58 = vadd.f32 %v1522_v49, %v1326_v52  ;;  %v2235_v50 = vmul.f32 %v4318_v38, %v2167_v53  ;;  %v2366_v63 = vmul.f32 %v4320_v39, %v2102_v28  ;;  %v2367_v0 = vmul.f32 %v4320_v39, %v2103_v40 }
  0x5c   :  { %v2037_v3 = vadd.f32 %v1973_v42, %v1649_v55  ;;  %v2750_v5 = vrot.slane %v2102_v28, 2  ;;  %v2751_v6 = vrot.slane %v2103_v40, 2  ;;  %v313_v8 = vsel %vm207_vm2, %v247_v60, 0.0 }
  0x5d   :  { %v2038_v9 = vadd.f32 %v1974_v56, %v1650_v58  ;;  %v2494_v10 = vrot.slane %v2366_v63, 1  ;;  %v2495_v7 = vrot.slane %v2367_v0, 1  ;;  %v314_v62 = vsel %vm207_vm2, %v248_v61, 0.0  ;;  %v91_v58 = vld [vmem:[#allocation3 + $0x40] sm:$0xf] }
  0x5e   :  { %v2298_v4 = vadd.f32 %v2234_v57, %v2037_v3  ;;  %v2878_v11 = vsel %vm208_vm3, %v2750_v5, 0.0  ;;  %v2879_v12 = vsel %vm208_vm3, %v2751_v6, 0.0  ;;  %v381_v13 = vmul.f32 %v4289_v20, %v313_v8  ;;  %v92_v3 = vld [vmem:[#allocation3 + $0x44] sm:$0xf]  ;;  %157 = vst.msk [vmem:[#allocation2 + $0xc9] sm:$0xf] %vm140_vm1, %v91_v58 }
  0x5f   :  { %v2299_v17 = vadd.f32 %v2235_v50, %v2038_v9  ;;  %v2946_v59 = vmul.f32 %v4298_v23, %v2878_v11  ;;  %v2947_v18 = vmul.f32 %v4298_v23, %v2879_v12  ;;  %v382_v19 = vmul.f32 %v4289_v20, %v314_v62  ;;  %158 = vst.msk [vmem:[#allocation2 + $0xd1] sm:$0xf] %vm140_vm1, %v92_v3  ;;  %v249_v11 = vld [vmem:[#allocation2 + $0x1c0] sm:$0x3f]  ;;  %v93_v12 = vld [vmem:[#allocation3 + $0x48] sm:$0xf] }
  0x60   :  { %v2622_v24 = vadd.f32 %v2494_v10, %v2298_v4  ;;  %v449_v25 = vmul.f32 %v4291_v21, %v247_v60  ;;  %v450_v28 = vmul.f32 %v4291_v21, %v248_v61  ;;  %v835_v29 = vrot.slane %v247_v60, 2  ;;  %v2132_v60 = vld [vmem:[#allocation2 + $0x1c0] sm:$0x3f]  ;;  %159 = vst.msk [vmem:[#allocation2 + $0xd9] sm:$0xf] %vm140_vm1, %v93_v12 }
  0x61   :  { %v2623_v30 = vadd.f32 %v2495_v7, %v2299_v17  ;;  %v836_v31 = vrot.slane %v248_v61, 2  ;;  %v1223_v32 = vsel %vm207_vm2, %v1159_v14, 0.0  ;;  %v1224_v34 = vsel %vm207_vm2, %v1160_v16, 0.0  ;;  %v2133_v61 = vld [vmem:[#allocation2 + $0x1c8] sm:$0x3f] }
  0x62   :  { %v3010_v35 = vadd.f32 %v2946_v59, %v2622_v24  ;;  %v577_v36 = vrot.slane %v449_v25, 1  ;;  %v578_v37 = vrot.slane %v450_v28, 1  ;;  %v963_v40 = vsel %vm208_vm3, %v835_v29, 0.0  ;;  %v250_v59 = vld [vmem:[#allocation2 + $0x1c8] sm:$0x3f] }
  0x63   :  { %v3011_v51 = vadd.f32 %v2947_v18, %v2623_v30  ;;  %v964_v41 = vsel %vm208_vm3, %v836_v31, 0.0  ;;  %v1031_v43 = vmul.f32 %v4293_v22, %v963_v40  ;;  %v1291_v44 = vmul.f32 %v4302_v26, %v1223_v32 }
  0x64   :  { %v3081_v45 = vadd.f32 %v4412_v15, %v3010_v35  ;;  %v705_v46 = vadd.f32 %v577_v36, %v381_v13  ;;  %v706_v48 = vadd.f32 %v578_v37, %v382_v19  ;;  %v1032_v49 = vmul.f32 %v4293_v22, %v964_v41 }
  0x65   :  { %v3082_v52 = vadd.f32 %v4412_v15, %v3011_v51  ;;  %v1292_v54 = vmul.f32 %v4302_v26, %v1224_v34  ;;  %v1423_v47 = vmul.f32 %v4304_v27, %v1159_v14  ;;  %v1424_v53 = vmul.f32 %v4304_v27, %v1160_v16 }
  0x66   :  { %v3145_v55 = vmax.f32 %v3081_v45, 0.0  ;;  %v1095_v42 = vadd.f32 %v1031_v43, %v705_v46  ;;  %v1096_v56 = vadd.f32 %v1032_v49, %v706_v48  ;;  %v1807_v57 = vrot.slane %v1159_v14, 2  ;;  %v1161_v43 = vld [vmem:[#allocation2 + $0x1c8] sm:$0x3f] }
  0x67   :  { %v3146_v50 = vmax.f32 %v3082_v52, 0.0  ;;  %v1551_v63 = vrot.slane %v1423_v47, 1  ;;  %v1552_v0 = vrot.slane %v1424_v53, 1  ;;  %v1808_v1 = vrot.slane %v1160_v16, 2 }
  0x68   :  { %v1355_v5 = vadd.f32 %v1291_v44, %v1095_v42  ;;  %v1356_v6 = vadd.f32 %v1292_v54, %v1096_v56  ;;  %v1935_v8 = vsel %vm208_vm3, %v1807_v57, 0.0  ;;  %v2196_v9 = vsel %vm207_vm2, %v2132_v60, 0.0  ;;  %v1162_v44 = vld [vmem:[#allocation2 + $0x1d0] sm:$0x3f] }
  0x69   :  { %v3285_v10 = vcombine.low %v3145_v55, %v3146_v50  ;;  %v1936_v7 = vsel %vm208_vm3, %v1808_v1, 0.0  ;;  %v2003_v62 = vmul.f32 %v4311_v33, %v1935_v8  ;;  %v2197_v4 = vsel %vm207_vm2, %v2133_v61, 0.0 }
  0x6a   :  { %v1679_v13 = vadd.f32 %v1551_v63, %v1355_v5  ;;  %v1680_v14 = vadd.f32 %v1552_v0, %v1356_v6  ;;  %v2004_v16 = vmul.f32 %v4311_v33, %v1936_v7  ;;  %v2264_v17 = vmul.f32 %v4318_v38, %v2196_v9 }
  0x6b   :  { %4047 = vmatmul.mubr.msk.f32.gmra.mxu0 %vm3314_vm4, %v3285_v10  ;;  %v2265_v18 = vmul.f32 %v4318_v38, %v2197_v4  ;;  %v2396_v19 = vmul.f32 %v4320_v39, %v2132_v60  ;;  %v2397_v24 = vmul.f32 %v4320_v39, %v2133_v61  ;;  %v2780_v25 = vrot.slane %v2132_v60, 2 }
  0x6c   :  { %v2067_v28 = vadd.f32 %v2003_v62, %v1679_v13  ;;  %v2068_v29 = vadd.f32 %v2004_v16, %v1680_v14  ;;  %v2781_v30 = vrot.slane %v2133_v61, 2  ;;  %v315_v31 = vsel %vm207_vm2, %v249_v11, 0.0 }
  0x6d   :  { %v2524_v32 = vrot.slane %v2396_v19, 1  ;;  %v2525_v34 = vrot.slane %v2397_v24, 1  ;;  %v2908_v35 = vsel %vm208_vm3, %v2780_v25, 0.0  ;;  %v316_v36 = vsel %vm207_vm2, %v250_v59, 0.0 }
  0x6e   :  { %v2328_v37 = vadd.f32 %v2264_v17, %v2067_v28  ;;  %v2329_v40 = vadd.f32 %v2265_v18, %v2068_v29  ;;  %v2909_v51 = vsel %vm208_vm3, %v2781_v30, 0.0  ;;  %v2976_v41 = vmul.f32 %v4298_v23, %v2908_v35  ;;  %v2135_v17 = vld [vmem:[#allocation2 + $0x1d8] sm:$0x3f] }
  0x6f   :  { %v2977_v45 = vmul.f32 %v4298_v23, %v2909_v51  ;;  %v383_v46 = vmul.f32 %v4289_v20, %v315_v31  ;;  %v384_v48 = vmul.f32 %v4289_v20, %v316_v36  ;;  %v451_v49 = vmul.f32 %v4291_v21, %v249_v11  ;;  %v219_v36 = vld [vmem:[#allocation2 + $0x60] sm:$0x3f] }
  0x70   :  { %v2652_v52 = vadd.f32 %v2524_v32, %v2328_v37  ;;  %v2653_v54 = vadd.f32 %v2525_v34, %v2329_v40  ;;  %v452_v47 = vmul.f32 %v4291_v21, %v250_v59  ;;  %v837_v53 = vrot.slane %v249_v11, 2  ;;  %v2134_v11 = vld [vmem:[#allocation2 + $0x1d0] sm:$0x3f]  ;;  %v220_v37 = vld [vmem:[#allocation2 + $0x68] sm:$0x3f] }
  0x71   :  { %v579_v60 = vrot.slane %v451_v49, 1  ;;  %v838_v55 = vrot.slane %v250_v59, 2  ;;  %v1225_v42 = vsel %vm207_vm2, %v1161_v43, 0.0  ;;  %v1226_v56 = vsel %vm207_vm2, %v1162_v44, 0.0  ;;  %v94_v49 = vld [vmem:[#allocation3 + $0x4c] sm:$0xf] }
  0x72   :  { %v3040_v57 = vadd.f32 %v2976_v41, %v2652_v52  ;;  %v3041_v61 = vadd.f32 %v2977_v45, %v2653_v54  ;;  %v580_v58 = vrot.slane %v452_v47, 1  ;;  %v965_v50 = vsel %vm208_vm3, %v837_v53, 0.0  ;;  %160 = vst.msk [vmem:[#allocation2 + $0xe1] sm:$0xf] %vm140_vm1, %v94_v49  ;;  %v124_v49 = vld [vmem:[#allocation3 + $0xc4] sm:$0xf] }
  0x73   :  { %v707_v63 = vadd.f32 %v579_v60, %v383_v46  ;;  %v966_v0 = vsel %vm208_vm3, %v838_v55, 0.0  ;;  %v1033_v1 = vmul.f32 %v4293_v22, %v965_v50  ;;  %v1293_v3 = vmul.f32 %v4302_v26, %v1225_v42  ;;  %190 = vst.msk [vmem:[#allocation2 + $0x251] sm:$0xf] %vm140_vm1, %v124_v49 }
  0x74   :  { %v3111_v5 = vadd.f32 %v4412_v15, %v3040_v57  ;;  %v3112_v6 = vadd.f32 %v4412_v15, %v3041_v61  ;;  %v708_v8 = vadd.f32 %v580_v58, %v384_v48  ;;  %v1034_v9 = vmul.f32 %v4293_v22, %v966_v0  ;;  %v1132_v0 = vld [vmem:[#allocation2 + $0x70] sm:$0x3f] }
  0x75   :  { %v1097_v10 = vadd.f32 %v1033_v1, %v707_v63  ;;  %v1294_v7 = vmul.f32 %v4302_v26, %v1226_v56  ;;  %v1425_v62 = vmul.f32 %v4304_v27, %v1161_v43  ;;  %v1426_v4 = vmul.f32 %v4304_v27, %v1162_v44  ;;  %v1131_v63 = vld [vmem:[#allocation2 + $0x68] sm:$0x3f] }
  0x76   :  { %v3175_v12 = vmax.f32 %v3111_v5, 0.0  ;;  %v3176_v13 = vmax.f32 %v3112_v6, 0.0  ;;  %v1098_v14 = vadd.f32 %v1034_v9, %v708_v8  ;;  %v1809_v16 = vrot.slane %v1161_v43, 2 }
  0x77   :  { %v1357_v59 = vadd.f32 %v1293_v3, %v1097_v10  ;;  %v1553_v18 = vrot.slane %v1425_v62, 1  ;;  %v1554_v19 = vrot.slane %v1426_v4, 1  ;;  %v1810_v24 = vrot.slane %v1162_v44, 2 }
  0x78   :  { %v3300_v25 = vcombine.low %v3175_v12, %v3176_v13  ;;  %v1358_v28 = vadd.f32 %v1294_v7, %v1098_v14  ;;  %v1937_v29 = vsel %vm208_vm3, %v1809_v16, 0.0  ;;  %v2198_v30 = vsel %vm207_vm2, %v2134_v11, 0.0 }
  0x79   :  { %v1681_v31 = vadd.f32 %v1553_v18, %v1357_v59  ;;  %v1938_v32 = vsel %vm208_vm3, %v1810_v24, 0.0  ;;  %v2005_v34 = vmul.f32 %v4311_v33, %v1937_v29  ;;  %v2199_v35 = vsel %vm207_vm2, %v2135_v17, 0.0 }
  0x7a   :  { %4070 = vmatprep.mubr.msk.f32.mxu1 %vm3314_vm4, %v3300_v25  ;;  %v1682_v40 = vadd.f32 %v1554_v19, %v1358_v28  ;;  %v2006_v51 = vmul.f32 %v4311_v33, %v1938_v32  ;;  %v2266_v41 = vmul.f32 %v4318_v38, %v2198_v30  ;;  %v2267_v43 = vmul.f32 %v4318_v38, %v2199_v35  ;;  %v2104_v30 = vld [vmem:[#allocation2 + $0x70] sm:$0x3f] }
  0x7b   :  { %v2069_v44 = vadd.f32 %v2005_v34, %v1681_v31  ;;  %v2398_v45 = vmul.f32 %v4320_v39, %v2134_v11  ;;  %v2399_v46 = vmul.f32 %v4320_v39, %v2135_v17  ;;  %v2782_v48 = vrot.slane %v2134_v11, 2 }
  0x7c   :  { %v2070_v52 = vadd.f32 %v2006_v51, %v1682_v40  ;;  %v2783_v54 = vrot.slane %v2135_v17, 2  ;;  %v285_v47 = vsel %vm207_vm2, %v219_v36, 0.0  ;;  %v286_v53 = vsel %vm207_vm2, %v220_v37, 0.0 }
  0x7d   :  { %v2330_v60 = vadd.f32 %v2266_v41, %v2069_v44  ;;  %v2526_v55 = vrot.slane %v2398_v45, 1  ;;  %v2527_v42 = vrot.slane %v2399_v46, 1  ;;  %v2910_v56 = vsel %vm208_vm3, %v2782_v48, 0.0 }
  0x7e   :  { %v2331_v57 = vadd.f32 %v2267_v43, %v2070_v52  ;;  %v2911_v61 = vsel %vm208_vm3, %v2783_v54, 0.0  ;;  %v2978_v58 = vmul.f32 %v4298_v23, %v2910_v56  ;;  %v353_v50 = vmul.f32 %v4289_v20, %v285_v47  ;;  %v123_v43 = vld [vmem:[#allocation3 + $0xc0] sm:$0xf] }
  0x7f   :  { %v2654_v1 = vadd.f32 %v2526_v55, %v2330_v60  ;;  %v2979_v3 = vmul.f32 %v4298_v23, %v2911_v61  ;;  %v354_v5 = vmul.f32 %v4289_v20, %v286_v53  ;;  %v421_v6 = vmul.f32 %v4291_v21, %v219_v36  ;;  %189 = vst.msk [vmem:[#allocation2 + $0x249] sm:$0xf] %vm140_vm1, %v123_v43  ;;  %v221_v60 = vld [vmem:[#allocation2 + $0x70] sm:$0x3f]  ;;  %v222_v61 = vld [vmem:[#allocation2 + $0x78] sm:$0x3f] }
  0x80   :  { %v2655_v8 = vadd.f32 %v2527_v42, %v2331_v57  ;;  %v422_v9 = vmul.f32 %v4291_v21, %v220_v37  ;;  %v807_v10 = vrot.slane %v219_v36, 2  ;;  %v808_v7 = vrot.slane %v220_v37, 2  ;;  %v2105_v36 = vld [vmem:[#allocation2 + $0x78] sm:$0x3f] }
  0x81   :  { %v3042_v62 = vadd.f32 %v2978_v58, %v2654_v1  ;;  %v549_v4 = vrot.slane %v421_v6, 1  ;;  %v1195_v11 = vsel %vm207_vm2, %v1131_v63, 0.0  ;;  %v1196_v12 = vsel %vm207_vm2, %v1132_v0, 0.0  ;;  %v125_v58 = vld [vmem:[#allocation3 + $0xc8] sm:$0xf] }
  0x82   :  { %v3043_v13 = vadd.f32 %v2979_v3, %v2655_v8  ;;  %v550_v14 = vrot.slane %v422_v9, 1  ;;  %v935_v23 = vsel %vm208_vm3, %v807_v10, 0.0  ;;  %v936_v16 = vsel %vm208_vm3, %v808_v7, 0.0  ;;  %191 = vst.msk [vmem:[#allocation2 + $0x259] sm:$0xf] %vm140_vm1, %v125_v58 }
  0x83   :  { %v3113_v17 = vadd.f32 %v4412_v15, %v3042_v62  ;;  %v677_v59 = vadd.f32 %v549_v4, %v353_v50  ;;  %v1003_v18 = vmul.f32 %v4293_v22, %v935_v23  ;;  %v1004_v19 = vmul.f32 %v4293_v22, %v936_v16  ;;  %v4705_v16 = vld [vmem:[%s6010_s1 + $0x8] ss:$0 sm:$0xff] }
  0x84   :  { %v3114_v24 = vadd.f32 %v4412_v15, %v3043_v13  ;;  %v678_v25 = vadd.f32 %v550_v14, %v354_v5  ;;  %v1263_v28 = vmul.f32 %v4302_v26, %v1195_v11  ;;  %v1264_v29 = vmul.f32 %v4302_v26, %v1196_v12  ;;  %v1133_v14 = vld [vmem:[#allocation2 + $0x78] sm:$0x3f] }
  0x85   :  { %v3177_v31 = vmax.f32 %v3113_v17, 0.0  ;;  %v1067_v32 = vadd.f32 %v1003_v18, %v677_v59  ;;  %v1395_v34 = vmul.f32 %v4304_v27, %v1131_v63  ;;  %v1396_v35 = vmul.f32 %v4304_v27, %v1132_v0 }
  0x86   :  { %v3178_v37 = vmax.f32 %v3114_v24, 0.0  ;;  %v1068_v40 = vadd.f32 %v1004_v19, %v678_v25  ;;  %v1779_v51 = vrot.slane %v1131_v63, 2  ;;  %v1780_v41 = vrot.slane %v1132_v0, 2  ;;  %v1134_v19 = vld [vmem:[#allocation2 + $0x80] sm:$0x3f] }
  0x87   :  { %v1327_v44 = vadd.f32 %v1263_v28, %v1067_v32  ;;  %v1523_v45 = vrot.slane %v1395_v34, 1  ;;  %v1524_v46 = vrot.slane %v1396_v35, 1  ;;  %v2168_v48 = vsel %vm207_vm2, %v2104_v30, 0.0 }
  0x88   :  { %v3301_v52 = vcombine.low %v3177_v31, %v3178_v37  ;;  %v1328_v54 = vadd.f32 %v1264_v29, %v1068_v40  ;;  %v1907_v47 = vsel %vm208_vm3, %v1779_v51, 0.0  ;;  %v1908_v53 = vsel %vm208_vm3, %v1780_v41, 0.0 }
  0x89   :  { %v1651_v55 = vadd.f32 %v1523_v45, %v1327_v44  ;;  %v1975_v42 = vmul.f32 %v4311_v33, %v1907_v47  ;;  %v1976_v56 = vmul.f32 %v4311_v33, %v1908_v53  ;;  %v2169_v57 = vsel %vm207_vm2, %v2105_v36, 0.0 }
  0x8a   :  { %4071 = vmatmul.mubr.msk.f32.vlgmr.msra.gmra.mxu1 %vm3314_vm4, %v3301_v52  ;;  %v1652_v50 = vadd.f32 %v1524_v46, %v1328_v54  ;;  %v2236_v63 = vmul.f32 %v4318_v38, %v2168_v48  ;;  %v2237_v0 = vmul.f32 %v4318_v38, %v2169_v57  ;;  %v2368_v1 = vmul.f32 %v4320_v39, %v2104_v30 }
  0x8b   :  { %v2039_v3 = vadd.f32 %v1975_v42, %v1651_v55  ;;  %v2369_v5 = vmul.f32 %v4320_v39, %v2105_v36  ;;  %v2752_v6 = vrot.slane %v2104_v30, 2  ;;  %v2753_v8 = vrot.slane %v2105_v36, 2 }
  0x8c   :  { %v2040_v9 = vadd.f32 %v1976_v56, %v1652_v50  ;;  %v2496_v10 = vrot.slane %v2368_v1, 1  ;;  %v287_v7 = vsel %vm207_vm2, %v221_v60, 0.0  ;;  %v288_v62 = vsel %vm207_vm2, %v222_v61, 0.0 }
  0x8d   :  { %v2300_v4 = vadd.f32 %v2236_v63, %v2039_v3  ;;  %v2497_v11 = vrot.slane %v2369_v5, 1  ;;  %v2880_v12 = vsel %vm208_vm3, %v2752_v6, 0.0  ;;  %v2881_v13 = vsel %vm208_vm3, %v2753_v8, 0.0 }
  0x8e   :  { %v2301_v23 = vadd.f32 %v2237_v0, %v2040_v9  ;;  %v2948_v17 = vmul.f32 %v4705_v16, %v2880_v12  ;;  %v2949_v59 = vmul.f32 %v4705_v16, %v2881_v13  ;;  %v355_v18 = vmul.f32 %v4289_v20, %v287_v7  ;;  %v2107_v0 = vld [vmem:[#allocation2 + $0x88] sm:$0x3f]  ;;  %v251_v7 = vld [vmem:[#allocation2 + $0x1e0] sm:$0x3f] }
  0x8f   :  { %v2624_v24 = vadd.f32 %v2496_v10, %v2300_v4  ;;  %v356_v25 = vmul.f32 %v4289_v20, %v288_v62  ;;  %v423_v28 = vmul.f32 %v4291_v21, %v221_v60  ;;  %v424_v29 = vmul.f32 %v4291_v21, %v222_v61  ;;  %v252_v13 = vld [vmem:[#allocation2 + $0x1e8] sm:$0x3f] }
  0x90   :  { %v2625_v30 = vadd.f32 %v2497_v11, %v2301_v23  ;;  %v809_v31 = vrot.slane %v221_v60, 2  ;;  %v810_v32 = vrot.slane %v222_v61, 2  ;;  %v1197_v34 = vsel %vm207_vm2, %v1133_v14, 0.0  ;;  %v2106_v60 = vld [vmem:[#allocation2 + $0x80] sm:$0x3f] }
  0x91   :  { %v3012_v35 = vadd.f32 %v2948_v17, %v2624_v24  ;;  %v551_v36 = vrot.slane %v423_v28, 1  ;;  %v552_v37 = vrot.slane %v424_v29, 1  ;;  %v1198_v40 = vsel %vm207_vm2, %v1134_v19, 0.0 }
  0x92   :  { %v3013_v51 = vadd.f32 %v2949_v59, %v2625_v30  ;;  %v937_v41 = vsel %vm208_vm3, %v809_v31, 0.0  ;;  %v938_v43 = vsel %vm208_vm3, %v810_v32, 0.0  ;;  %v1265_v44 = vmul.f32 %v4302_v26, %v1197_v34 }
  0x93   :  { %v3083_v45 = vadd.f32 %v4412_v15, %v3012_v35  ;;  %v679_v46 = vadd.f32 %v551_v36, %v355_v18  ;;  %v680_v48 = vadd.f32 %v552_v37, %v356_v25  ;;  %v1005_v49 = vmul.f32 %v4293_v22, %v937_v41  ;;  %v126_v18 = vld [vmem:[#allocation3 + $0xcc] sm:$0xf] }
  0x94   :  { %v3084_v52 = vadd.f32 %v4412_v15, %v3013_v51  ;;  %v1006_v54 = vmul.f32 %v4293_v22, %v938_v43  ;;  %v1266_v47 = vmul.f32 %v4302_v26, %v1198_v40  ;;  %v1397_v53 = vmul.f32 %v4304_v27, %v1133_v14  ;;  %192 = vst.msk [vmem:[#allocation2 + $0x261] sm:$0xf] %vm140_vm1, %v126_v18  ;;  %v1163_v40 = vld [vmem:[#allocation2 + $0x1e8] sm:$0x3f]  ;;  %v1164_v51 = vld [vmem:[#allocation2 + $0x1f0] sm:$0x3f] }
  0x95   :  { %v3147_v55 = vmax.f32 %v3083_v45, 0.0  ;;  %v1069_v42 = vadd.f32 %v1005_v49, %v679_v46  ;;  %v1398_v56 = vmul.f32 %v4304_v27, %v1134_v19  ;;  %v1781_v57 = vrot.slane %v1133_v14, 2 }
  0x96   :  { %v3148_v61 = vmax.f32 %v3084_v52, 0.0  ;;  %v1070_v58 = vadd.f32 %v1006_v54, %v680_v48  ;;  %v1525_v50 = vrot.slane %v1397_v53, 1  ;;  %v1782_v63 = vrot.slane %v1134_v19, 2 }
  0x97   :  { %v1329_v1 = vadd.f32 %v1265_v44, %v1069_v42  ;;  %v1526_v3 = vrot.slane %v1398_v56, 1  ;;  %v1909_v15 = vsel %vm208_vm3, %v1781_v57, 0.0  ;;  %v2170_v5 = vsel %vm207_vm2, %v2106_v60, 0.0 }
  0x98   :  { %v3286_v6 = vcombine.low %v3147_v55, %v3148_v61  ;;  %v1330_v8 = vadd.f32 %v1266_v47, %v1070_v58  ;;  %v1910_v9 = vsel %vm208_vm3, %v1782_v63, 0.0  ;;  %v1977_v10 = vmul.f32 %v4311_v33, %v1909_v15 }
  0x99   :  { %v1653_v62 = vadd.f32 %v1525_v50, %v1329_v1  ;;  %v1978_v4 = vmul.f32 %v4311_v33, %v1910_v9  ;;  %v2171_v11 = vsel %vm207_vm2, %v2107_v0, 0.0  ;;  %v2238_v12 = vmul.f32 %v4318_v38, %v2170_v5 }
  0x9a   :  { %4049 = vmatprep.mubr.msk.f32.mxu0 %vm3314_vm4, %v3286_v6  ;;  %v1654_v14 = vadd.f32 %v1526_v3, %v1330_v8  ;;  %v2239_v23 = vmul.f32 %v4318_v38, %v2171_v11  ;;  %v2370_v17 = vmul.f32 %v4320_v39, %v2106_v60  ;;  %v2371_v59 = vmul.f32 %v4320_v39, %v2107_v0 }
  0x9b   :  { %v2041_v19 = vadd.f32 %v1977_v10, %v1653_v62  ;;  %v2754_v24 = vrot.slane %v2106_v60, 2  ;;  %v2755_v25 = vrot.slane %v2107_v0, 2  ;;  %v317_v28 = vsel %vm207_vm2, %v251_v7, 0.0  ;;  %v4772_v0 = vld [vmem:[%s6011_s2] ss:$0 sm:$0xff] }
  0x9c   :  { %v2042_v29 = vadd.f32 %v1978_v4, %v1654_v14  ;;  %v2498_v30 = vrot.slane %v2370_v17, 1  ;;  %v2499_v31 = vrot.slane %v2371_v59, 1  ;;  %v318_v32 = vsel %vm207_vm2, %v252_v13, 0.0  ;;  %v95_v14 = vld [vmem:[#allocation3 + $0x50] sm:$0xf] }
  0x9d   :  { %v2302_v34 = vadd.f32 %v2238_v12, %v2041_v19  ;;  %v2882_v35 = vsel %vm208_vm3, %v2754_v24, 0.0  ;;  %v2883_v36 = vsel %vm208_vm3, %v2755_v25, 0.0  ;;  %v385_v37 = vmul.f32 %v4289_v20, %v317_v28  ;;  %v96_v19 = vld [vmem:[#allocation3 + $0x54] sm:$0xf]  ;;  %161 = vst.msk [vmem:[#allocation2 + $0xf9] sm:$0xf] %vm140_vm1, %v95_v14 }
  0x9e   :  { %v2303_v41 = vadd.f32 %v2239_v23, %v2042_v29  ;;  %v2950_v43 = vmul.f32 %v4705_v16, %v2882_v35  ;;  %v2951_v44 = vmul.f32 %v4705_v16, %v2883_v36  ;;  %v386_v45 = vmul.f32 %v4289_v20, %v318_v32  ;;  %162 = vst.msk [vmem:[#allocation2 + $0x101] sm:$0xf] %vm140_vm1, %v96_v19  ;;  %v253_v35 = vld [vmem:[#allocation2 + $0x1f0] sm:$0x3f]  ;;  %v97_v36 = vld [vmem:[#allocation3 + $0x58] sm:$0xf] }
  0x9f   :  { %v2626_v46 = vadd.f32 %v2498_v30, %v2302_v34  ;;  %v453_v48 = vmul.f32 %v4291_v21, %v251_v7  ;;  %v454_v49 = vmul.f32 %v4291_v21, %v252_v13  ;;  %v839_v52 = vrot.slane %v251_v7, 2  ;;  %v2136_v7 = vld [vmem:[#allocation2 + $0x1f0] sm:$0x3f]  ;;  %163 = vst.msk [vmem:[#allocation2 + $0x109] sm:$0xf] %vm140_vm1, %v97_v36 }
  0xa0   :  { %v2627_v54 = vadd.f32 %v2499_v31, %v2303_v41  ;;  %v840_v47 = vrot.slane %v252_v13, 2  ;;  %v1227_v53 = vsel %vm207_vm2, %v1163_v40, 0.0  ;;  %v1228_v60 = vsel %vm207_vm2, %v1164_v51, 0.0  ;;  %v2137_v13 = vld [vmem:[#allocation2 + $0x1f8] sm:$0x3f] }
  0xa1   :  { %v3014_v55 = vadd.f32 %v2950_v43, %v2626_v46  ;;  %v581_v42 = vrot.slane %v453_v48, 1  ;;  %v582_v56 = vrot.slane %v454_v49, 1  ;;  %v967_v57 = vsel %vm208_vm3, %v839_v52, 0.0  ;;  %v254_v43 = vld [vmem:[#allocation2 + $0x1f8] sm:$0x3f] }
  0xa2   :  { %v3015_v61 = vadd.f32 %v2951_v44, %v2627_v54  ;;  %v968_v58 = vsel %vm208_vm3, %v840_v47, 0.0  ;;  %v1035_v50 = vmul.f32 %v4293_v22, %v967_v57  ;;  %v1295_v63 = vmul.f32 %v4302_v26, %v1227_v53 }
  0xa3   :  { %v3085_v1 = vadd.f32 %v4772_v0, %v3014_v55  ;;  %v709_v3 = vadd.f32 %v581_v42, %v385_v37  ;;  %v710_v15 = vadd.f32 %v582_v56, %v386_v45  ;;  %v1036_v5 = vmul.f32 %v4293_v22, %v968_v58 }
  0xa4   :  { %v3086_v6 = vadd.f32 %v4772_v0, %v3015_v61  ;;  %v1296_v8 = vmul.f32 %v4302_v26, %v1228_v60  ;;  %v1427_v9 = vmul.f32 %v4304_v27, %v1163_v40  ;;  %v1428_v10 = vmul.f32 %v4304_v27, %v1164_v51 }
  0xa5   :  { %v3149_v62 = vmax.f32 %v3085_v1, 0.0  ;;  %v1099_v4 = vadd.f32 %v1035_v50, %v709_v3  ;;  %v1100_v11 = vadd.f32 %v1036_v5, %v710_v15  ;;  %v1811_v12 = vrot.slane %v1163_v40, 2  ;;  %v1165_v50 = vld [vmem:[#allocation2 + $0x1f8] sm:$0x3f] }
  0xa6   :  { %v3150_v23 = vmax.f32 %v3086_v6, 0.0  ;;  %v1555_v17 = vrot.slane %v1427_v9, 1  ;;  %v1556_v59 = vrot.slane %v1428_v10, 1  ;;  %v1812_v18 = vrot.slane %v1164_v51, 2 }
  0xa7   :  { %v1359_v24 = vadd.f32 %v1295_v63, %v1099_v4  ;;  %v1360_v25 = vadd.f32 %v1296_v8, %v1100_v11  ;;  %v1939_v28 = vsel %vm208_vm3, %v1811_v12, 0.0  ;;  %v2200_v29 = vsel %vm207_vm2, %v2136_v7, 0.0  ;;  %v1166_v63 = vld [vmem:[#allocation2 + $0x200] sm:$0x3f] }
  0xa8   :  { %v3287_v30 = vcombine.low %v3149_v62, %v3150_v23  ;;  %v1940_v31 = vsel %vm208_vm3, %v1812_v18, 0.0  ;;  %v2007_v32 = vmul.f32 %v4311_v33, %v1939_v28  ;;  %v2201_v34 = vsel %vm207_vm2, %v2137_v13, 0.0 }
  0xa9   :  { %v1683_v37 = vadd.f32 %v1555_v17, %v1359_v24  ;;  %v1684_v40 = vadd.f32 %v1556_v59, %v1360_v25  ;;  %v2008_v51 = vmul.f32 %v4311_v33, %v1940_v31  ;;  %v2268_v41 = vmul.f32 %v4318_v38, %v2200_v29 }
  0xaa   :  { %4050 = vmatmul.mubr.msk.f32.gmra.mxu0 %vm3314_vm4, %v3287_v30  ;;  %v2269_v44 = vmul.f32 %v4318_v38, %v2201_v34  ;;  %v2400_v45 = vmul.f32 %v4320_v39, %v2136_v7  ;;  %v2401_v46 = vmul.f32 %v4320_v39, %v2137_v13  ;;  %v2784_v48 = vrot.slane %v2136_v7, 2 }
  0xab   :  { %v2071_v49 = vadd.f32 %v2007_v32, %v1683_v37  ;;  %v2072_v52 = vadd.f32 %v2008_v51, %v1684_v40  ;;  %v2785_v54 = vrot.slane %v2137_v13, 2  ;;  %v319_v47 = vsel %vm207_vm2, %v253_v35, 0.0 }
  0xac   :  { %v2528_v53 = vrot.slane %v2400_v45, 1  ;;  %v2529_v60 = vrot.slane %v2401_v46, 1  ;;  %v2912_v55 = vsel %vm208_vm3, %v2784_v48, 0.0  ;;  %v320_v42 = vsel %vm207_vm2, %v254_v43, 0.0 }
  0xad   :  { %v2332_v56 = vadd.f32 %v2268_v41, %v2071_v49  ;;  %v2333_v57 = vadd.f32 %v2269_v44, %v2072_v52  ;;  %v2913_v61 = vsel %vm208_vm3, %v2785_v54, 0.0  ;;  %v2980_v58 = vmul.f32 %v4705_v16, %v2912_v55  ;;  %v2139_v41 = vld [vmem:[#allocation2 + $0x208] sm:$0x3f] }
  0xae   :  { %v2981_v1 = vmul.f32 %v4705_v16, %v2913_v61  ;;  %v387_v3 = vmul.f32 %v4289_v20, %v319_v47  ;;  %v388_v15 = vmul.f32 %v4289_v20, %v320_v42  ;;  %v455_v5 = vmul.f32 %v4291_v21, %v253_v35  ;;  %v223_v42 = vld [vmem:[#allocation2 + $0x90] sm:$0x3f] }
  0xaf   :  { %v2656_v6 = vadd.f32 %v2528_v53, %v2332_v56  ;;  %v2657_v8 = vadd.f32 %v2529_v60, %v2333_v57  ;;  %v456_v9 = vmul.f32 %v4291_v21, %v254_v43  ;;  %v841_v10 = vrot.slane %v253_v35, 2  ;;  %v2138_v35 = vld [vmem:[#allocation2 + $0x200] sm:$0x3f]  ;;  %v224_v56 = vld [vmem:[#allocation2 + $0x98] sm:$0x3f] }
  0xb0   :  { %v583_v7 = vrot.slane %v455_v5, 1  ;;  %v842_v62 = vrot.slane %v254_v43, 2  ;;  %v1229_v4 = vsel %vm207_vm2, %v1165_v50, 0.0  ;;  %v1230_v11 = vsel %vm207_vm2, %v1166_v63, 0.0  ;;  %v98_v5 = vld [vmem:[#allocation3 + $0x5c] sm:$0xf] }
  0xb1   :  { %v3044_v12 = vadd.f32 %v2980_v58, %v2656_v6  ;;  %v3045_v13 = vadd.f32 %v2981_v1, %v2657_v8  ;;  %v584_v14 = vrot.slane %v456_v9, 1  ;;  %v969_v23 = vsel %vm208_vm3, %v841_v10, 0.0  ;;  %164 = vst.msk [vmem:[#allocation2 + $0x111] sm:$0xf] %vm140_vm1, %v98_v5 }
  0xb2   :  { %v711_v17 = vadd.f32 %v583_v7, %v387_v3  ;;  %v970_v59 = vsel %vm208_vm3, %v842_v62, 0.0  ;;  %v1037_v18 = vmul.f32 %v4293_v22, %v969_v23  ;;  %v1297_v19 = vmul.f32 %v4302_v26, %v1229_v4 }
  0xb3   :  { %v3115_v24 = vadd.f32 %v4772_v0, %v3044_v12  ;;  %v3116_v25 = vadd.f32 %v4772_v0, %v3045_v13  ;;  %v712_v28 = vadd.f32 %v584_v14, %v388_v15  ;;  %v1038_v29 = vmul.f32 %v4293_v22, %v970_v59  ;;  %v1136_v59 = vld [vmem:[#allocation2 + $0xa0] sm:$0x3f] }
  0xb4   :  { %v1101_v30 = vadd.f32 %v1037_v18, %v711_v17  ;;  %v1298_v31 = vmul.f32 %v4302_v26, %v1230_v11  ;;  %v1429_v32 = vmul.f32 %v4304_v27, %v1165_v50  ;;  %v1430_v34 = vmul.f32 %v4304_v27, %v1166_v63  ;;  %v1135_v17 = vld [vmem:[#allocation2 + $0x98] sm:$0x3f] }
  0xb5   :  { %v3179_v36 = vmax.f32 %v3115_v24, 0.0  ;;  %v3180_v37 = vmax.f32 %v3116_v25, 0.0  ;;  %v1102_v40 = vadd.f32 %v1038_v29, %v712_v28  ;;  %v1813_v51 = vrot.slane %v1165_v50, 2 }
  0xb6   :  { %v1361_v43 = vadd.f32 %v1297_v19, %v1101_v30  ;;  %v1557_v44 = vrot.slane %v1429_v32, 1  ;;  %v1558_v45 = vrot.slane %v1430_v34, 1  ;;  %v1814_v46 = vrot.slane %v1166_v63, 2 }
  0xb7   :  { %v3302_v48 = vcombine.low %v3179_v36, %v3180_v37  ;;  %v1362_v49 = vadd.f32 %v1298_v31, %v1102_v40  ;;  %v1941_v52 = vsel %vm208_vm3, %v1813_v51, 0.0  ;;  %v2202_v54 = vsel %vm207_vm2, %v2138_v35, 0.0 }
  0xb8   :  { %v1685_v47 = vadd.f32 %v1557_v44, %v1361_v43  ;;  %v1942_v53 = vsel %vm208_vm3, %v1814_v46, 0.0  ;;  %v2009_v60 = vmul.f32 %v4311_v33, %v1941_v52  ;;  %v2203_v55 = vsel %vm207_vm2, %v2139_v41, 0.0 }
  0xb9   :  { %4073 = vmatprep.mubr.msk.f32.mxu1 %vm3314_vm4, %v3302_v48  ;;  %v1686_v57 = vadd.f32 %v1558_v45, %v1362_v49  ;;  %v2010_v61 = vmul.f32 %v4311_v33, %v1942_v53  ;;  %v2270_v58 = vmul.f32 %v4318_v38, %v2202_v54  ;;  %v2271_v50 = vmul.f32 %v4318_v38, %v2203_v55 }
  0xba   :  { %v2073_v63 = vadd.f32 %v2009_v60, %v1685_v47  ;;  %v2402_v1 = vmul.f32 %v4320_v39, %v2138_v35  ;;  %v2403_v3 = vmul.f32 %v4320_v39, %v2139_v41  ;;  %v2786_v15 = vrot.slane %v2138_v35, 2  ;;  %v2108_v47 = vld [vmem:[#allocation2 + $0xa0] sm:$0x3f] }
  0xbb   :  { %v2074_v6 = vadd.f32 %v2010_v61, %v1686_v57  ;;  %v2787_v8 = vrot.slane %v2139_v41, 2  ;;  %v289_v9 = vsel %vm207_vm2, %v223_v42, 0.0  ;;  %v290_v10 = vsel %vm207_vm2, %v224_v56, 0.0 }
  0xbc   :  { %v2334_v7 = vadd.f32 %v2270_v58, %v2073_v63  ;;  %v2530_v62 = vrot.slane %v2402_v1, 1  ;;  %v2531_v4 = vrot.slane %v2403_v3, 1  ;;  %v2914_v11 = vsel %vm208_vm3, %v2786_v15, 0.0  ;;  %v127_v63 = vld [vmem:[#allocation3 + $0xd0] sm:$0xf] }
  0xbd   :  { %v2335_v12 = vadd.f32 %v2271_v50, %v2074_v6  ;;  %v2915_v13 = vsel %vm208_vm3, %v2787_v8, 0.0  ;;  %v2982_v14 = vmul.f32 %v4705_v16, %v2914_v11  ;;  %v357_v23 = vmul.f32 %v4289_v20, %v289_v9  ;;  %v128_v6 = vld [vmem:[#allocation3 + $0xd4] sm:$0xf]  ;;  %193 = vst.msk [vmem:[#allocation2 + $0x279] sm:$0xf] %vm140_vm1, %v127_v63 }
  0xbe   :  { %v2658_v18 = vadd.f32 %v2530_v62, %v2334_v7  ;;  %v2983_v19 = vmul.f32 %v4705_v16, %v2915_v13  ;;  %v358_v24 = vmul.f32 %v4289_v20, %v290_v10  ;;  %v425_v25 = vmul.f32 %v4291_v21, %v223_v42  ;;  %v225_v62 = vld [vmem:[#allocation2 + $0xa0] sm:$0x3f]  ;;  %194 = vst.msk [vmem:[#allocation2 + $0x281] sm:$0xf] %vm140_vm1, %v128_v6 }
  0xbf   :  { %v2659_v28 = vadd.f32 %v2531_v4, %v2335_v12  ;;  %v426_v29 = vmul.f32 %v4291_v21, %v224_v56  ;;  %v811_v30 = vrot.slane %v223_v42, 2  ;;  %v812_v31 = vrot.slane %v224_v56, 2  ;;  %v2109_v56 = vld [vmem:[#allocation2 + $0xa8] sm:$0x3f] }
  0xc0   :  { %v3046_v32 = vadd.f32 %v2982_v14, %v2658_v18  ;;  %v553_v34 = vrot.slane %v425_v25, 1  ;;  %v1199_v35 = vsel %vm207_vm2, %v1135_v17, 0.0  ;;  %v1200_v36 = vsel %vm207_vm2, %v1136_v59, 0.0  ;;  %v226_v14 = vld [vmem:[#allocation2 + $0xa8] sm:$0x3f] }
  0xc1   :  { %v3047_v37 = vadd.f32 %v2983_v19, %v2659_v28  ;;  %v554_v40 = vrot.slane %v426_v29, 1  ;;  %v939_v51 = vsel %vm208_vm3, %v811_v30, 0.0  ;;  %v940_v41 = vsel %vm208_vm3, %v812_v31, 0.0 }
  0xc2   :  { %v3117_v43 = vadd.f32 %v4772_v0, %v3046_v32  ;;  %v681_v44 = vadd.f32 %v553_v34, %v357_v23  ;;  %v1007_v45 = vmul.f32 %v4293_v22, %v939_v51  ;;  %v1008_v46 = vmul.f32 %v4293_v22, %v940_v41  ;;  %v129_v23 = vld [vmem:[#allocation3 + $0xd8] sm:$0xf]  ;;  %v1137_v51 = vld [vmem:[#allocation2 + $0xa8] sm:$0x3f] }
  0xc3   :  { %v3118_v48 = vadd.f32 %v4772_v0, %v3047_v37  ;;  %v682_v49 = vadd.f32 %v554_v40, %v358_v24  ;;  %v1267_v52 = vmul.f32 %v4302_v26, %v1199_v35  ;;  %v1268_v54 = vmul.f32 %v4302_v26, %v1200_v36  ;;  %195 = vst.msk [vmem:[#allocation2 + $0x289] sm:$0xf] %vm140_vm1, %v129_v23 }
  0xc4   :  { %v3181_v53 = vmax.f32 %v3117_v43, 0.0  ;;  %v1071_v60 = vadd.f32 %v1007_v45, %v681_v44  ;;  %v1399_v55 = vmul.f32 %v4304_v27, %v1135_v17  ;;  %v1400_v42 = vmul.f32 %v4304_v27, %v1136_v59 }
  0xc5   :  { %v3182_v57 = vmax.f32 %v3118_v48, 0.0  ;;  %v1072_v61 = vadd.f32 %v1008_v46, %v682_v49  ;;  %v1783_v58 = vrot.slane %v1135_v17, 2  ;;  %v1784_v50 = vrot.slane %v1136_v59, 2  ;;  %v1138_v46 = vld [vmem:[#allocation2 + $0xb0] sm:$0x3f] }
  0xc6   :  { %v1331_v1 = vadd.f32 %v1267_v52, %v1071_v60  ;;  %v1527_v3 = vrot.slane %v1399_v55, 1  ;;  %v1528_v15 = vrot.slane %v1400_v42, 1  ;;  %v2172_v5 = vsel %vm207_vm2, %v2108_v47, 0.0 }
  0xc7   :  { %v3303_v8 = vcombine.low %v3181_v53, %v3182_v57  ;;  %v1332_v9 = vadd.f32 %v1268_v54, %v1072_v61  ;;  %v1911_v10 = vsel %vm208_vm3, %v1783_v58, 0.0  ;;  %v1912_v7 = vsel %vm208_vm3, %v1784_v50, 0.0 }
  0xc8   :  { %v1655_v4 = vadd.f32 %v1527_v3, %v1331_v1  ;;  %v1979_v11 = vmul.f32 %v4311_v33, %v1911_v10  ;;  %v1980_v12 = vmul.f32 %v4311_v33, %v1912_v7  ;;  %v2173_v13 = vsel %vm207_vm2, %v2109_v56, 0.0 }
  0xc9   :  { %4074 = vmatmul.mubr.msk.f32.gmra.mxu1 %vm3314_vm4, %v3303_v8  ;;  %v1656_v17 = vadd.f32 %v1528_v15, %v1332_v9  ;;  %v2240_v59 = vmul.f32 %v4318_v38, %v2172_v5  ;;  %v2241_v18 = vmul.f32 %v4318_v38, %v2173_v13  ;;  %v2372_v19 = vmul.f32 %v4320_v39, %v2108_v47 }
  0xca   :  { %v2043_v24 = vadd.f32 %v1979_v11, %v1655_v4  ;;  %v2373_v25 = vmul.f32 %v4320_v39, %v2109_v56  ;;  %v2756_v28 = vrot.slane %v2108_v47, 2  ;;  %v2757_v29 = vrot.slane %v2109_v56, 2 }
  0xcb   :  { %v2044_v30 = vadd.f32 %v1980_v12, %v1656_v17  ;;  %v2500_v31 = vrot.slane %v2372_v19, 1  ;;  %v291_v32 = vsel %vm207_vm2, %v225_v62, 0.0  ;;  %v292_v34 = vsel %vm207_vm2, %v226_v14, 0.0 }
  0xcc   :  { %v2304_v35 = vadd.f32 %v2240_v59, %v2043_v24  ;;  %v2501_v36 = vrot.slane %v2373_v25, 1  ;;  %v2884_v37 = vsel %vm208_vm3, %v2756_v28, 0.0  ;;  %v2885_v40 = vsel %vm208_vm3, %v2757_v29, 0.0 }
  0xcd   :  { %v2305_v41 = vadd.f32 %v2241_v18, %v2044_v30  ;;  %v2952_v43 = vmul.f32 %v4705_v16, %v2884_v37  ;;  %v2953_v44 = vmul.f32 %v4705_v16, %v2885_v40  ;;  %v359_v45 = vmul.f32 %v4289_v20, %v291_v32  ;;  %v2111_v18 = vld [vmem:[#allocation2 + $0xb8] sm:$0x3f] }
  0xce   :  { %v2628_v48 = vadd.f32 %v2500_v31, %v2304_v35  ;;  %v360_v49 = vmul.f32 %v4289_v20, %v292_v34  ;;  %v427_v52 = vmul.f32 %v4291_v21, %v225_v62  ;;  %v428_v54 = vmul.f32 %v4291_v21, %v226_v14  ;;  %v255_v34 = vld [vmem:[#allocation2 + $0x210] sm:$0x3f] }
  0xcf   :  { %v2629_v47 = vadd.f32 %v2501_v36, %v2305_v41  ;;  %v813_v53 = vrot.slane %v225_v62, 2  ;;  %v814_v60 = vrot.slane %v226_v14, 2  ;;  %v1201_v55 = vsel %vm207_vm2, %v1137_v51, 0.0  ;;  %v2110_v62 = vld [vmem:[#allocation2 + $0xb0] sm:$0x3f] }
  0xd0   :  { %v3016_v42 = vadd.f32 %v2952_v43, %v2628_v48  ;;  %v555_v56 = vrot.slane %v427_v52, 1  ;;  %v556_v57 = vrot.slane %v428_v54, 1  ;;  %v1202_v61 = vsel %vm207_vm2, %v1138_v46, 0.0 }
  0xd1   :  { %v3017_v58 = vadd.f32 %v2953_v44, %v2629_v47  ;;  %v941_v50 = vsel %vm208_vm3, %v813_v53, 0.0  ;;  %v942_v63 = vsel %vm208_vm3, %v814_v60, 0.0  ;;  %v1269_v1 = vmul.f32 %v4302_v26, %v1201_v55 }
  0xd2   :  { %v3087_v3 = vadd.f32 %v4772_v0, %v3016_v42  ;;  %v683_v15 = vadd.f32 %v555_v56, %v359_v45  ;;  %v684_v5 = vadd.f32 %v556_v57, %v360_v49  ;;  %v1009_v6 = vmul.f32 %v4293_v22, %v941_v50  ;;  %v1168_v50 = vld [vmem:[#allocation2 + $0x220] sm:$0x3f] }
  0xd3   :  { %v3088_v8 = vadd.f32 %v4772_v0, %v3017_v58  ;;  %v1010_v9 = vmul.f32 %v4293_v22, %v942_v63  ;;  %v1270_v10 = vmul.f32 %v4302_v26, %v1202_v61  ;;  %v1401_v7 = vmul.f32 %v4304_v27, %v1137_v51  ;;  %v1167_v58 = vld [vmem:[#allocation2 + $0x218] sm:$0x3f] }
  0xd4   :  { %v3151_v4 = vmax.f32 %v3087_v3, 0.0  ;;  %v1073_v11 = vadd.f32 %v1009_v6, %v683_v15  ;;  %v1402_v12 = vmul.f32 %v4304_v27, %v1138_v46  ;;  %v1785_v13 = vrot.slane %v1137_v51, 2  ;;  %v256_v51 = vld [vmem:[#allocation2 + $0x218] sm:$0x3f] }
  0xd5   :  { %v3152_v14 = vmax.f32 %v3088_v8, 0.0  ;;  %v1074_v23 = vadd.f32 %v1010_v9, %v684_v5  ;;  %v1529_v17 = vrot.slane %v1401_v7, 1  ;;  %v1786_v59 = vrot.slane %v1138_v46, 2  ;;  %v130_v46 = vld [vmem:[#allocation3 + $0xdc] sm:$0xf] }
  0xd6   :  { %v1333_v19 = vadd.f32 %v1269_v1, %v1073_v11  ;;  %v1530_v24 = vrot.slane %v1402_v12, 1  ;;  %v1913_v25 = vsel %vm208_vm3, %v1785_v13, 0.0  ;;  %v2174_v28 = vsel %vm207_vm2, %v2110_v62, 0.0  ;;  %196 = vst.msk [vmem:[#allocation2 + $0x291] sm:$0xf] %vm140_vm1, %v130_v46 }
  0xd7   :  { %v3288_v29 = vcombine.low %v3151_v4, %v3152_v14  ;;  %v1334_v30 = vadd.f32 %v1270_v10, %v1074_v23  ;;  %v1914_v31 = vsel %vm208_vm3, %v1786_v59, 0.0  ;;  %v1981_v32 = vmul.f32 %v4311_v33, %v1913_v25 }
  0xd8   :  { %v1657_v35 = vadd.f32 %v1529_v17, %v1333_v19  ;;  %v1982_v36 = vmul.f32 %v4311_v33, %v1914_v31  ;;  %v2175_v37 = vsel %vm207_vm2, %v2111_v18, 0.0  ;;  %v2242_v40 = vmul.f32 %v4318_v38, %v2174_v28 }
  0xd9   :  { %4052 = vmatprep.mubr.msk.f32.mxu0 %vm3314_vm4, %v3288_v29  ;;  %v1658_v41 = vadd.f32 %v1530_v24, %v1334_v30  ;;  %v2243_v43 = vmul.f32 %v4318_v38, %v2175_v37  ;;  %v2374_v44 = vmul.f32 %v4320_v39, %v2110_v62  ;;  %v2375_v45 = vmul.f32 %v4320_v39, %v2111_v18 }
  0xda   :  { %v2045_v48 = vadd.f32 %v1981_v32, %v1657_v35  ;;  %v2758_v49 = vrot.slane %v2110_v62, 2  ;;  %v2759_v52 = vrot.slane %v2111_v18, 2  ;;  %v321_v54 = vsel %vm207_vm2, %v255_v34, 0.0 }
  0xdb   :  { %v2046_v47 = vadd.f32 %v1982_v36, %v1658_v41  ;;  %v2502_v53 = vrot.slane %v2374_v44, 1  ;;  %v2503_v60 = vrot.slane %v2375_v45, 1  ;;  %v322_v55 = vsel %vm207_vm2, %v256_v51, 0.0  ;;  %v99_v41 = vld [vmem:[#allocation3 + $0x60] sm:$0xf] }
  0xdc   :  { %v2306_v42 = vadd.f32 %v2242_v40, %v2045_v48  ;;  %v2886_v56 = vsel %vm208_vm3, %v2758_v49, 0.0  ;;  %v2887_v57 = vsel %vm208_vm3, %v2759_v52, 0.0  ;;  %v389_v61 = vmul.f32 %v4289_v20, %v321_v54  ;;  %v100_v48 = vld [vmem:[#allocation3 + $0x64] sm:$0xf]  ;;  %165 = vst.msk [vmem:[#allocation2 + $0x129] sm:$0xf] %vm140_vm1, %v99_v41 }
  0xdd   :  { %v2307_v63 = vadd.f32 %v2243_v43, %v2046_v47  ;;  %v2954_v1 = vmul.f32 %v4705_v16, %v2886_v56  ;;  %v2955_v3 = vmul.f32 %v4705_v16, %v2887_v57  ;;  %v390_v15 = vmul.f32 %v4289_v20, %v322_v55  ;;  %166 = vst.msk [vmem:[#allocation2 + $0x131] sm:$0xf] %vm140_vm1, %v100_v48  ;;  %v257_v56 = vld [vmem:[#allocation2 + $0x220] sm:$0x3f]  ;;  %v101_v57 = vld [vmem:[#allocation3 + $0x68] sm:$0xf] }
  0xde   :  { %v2630_v5 = vadd.f32 %v2502_v53, %v2306_v42  ;;  %v457_v6 = vmul.f32 %v4291_v21, %v255_v34  ;;  %v458_v8 = vmul.f32 %v4291_v21, %v256_v51  ;;  %v843_v9 = vrot.slane %v255_v34, 2  ;;  %v2140_v34 = vld [vmem:[#allocation2 + $0x220] sm:$0x3f]  ;;  %167 = vst.msk [vmem:[#allocation2 + $0x139] sm:$0xf] %vm140_vm1, %v101_v57 }
  0xdf   :  { %v2631_v10 = vadd.f32 %v2503_v60, %v2307_v63  ;;  %v844_v7 = vrot.slane %v256_v51, 2  ;;  %v1231_v62 = vsel %vm207_vm2, %v1167_v58, 0.0  ;;  %v1232_v4 = vsel %vm207_vm2, %v1168_v50, 0.0  ;;  %v2141_v51 = vld [vmem:[#allocation2 + $0x228] sm:$0x3f] }
  0xe0   :  { %v3018_v11 = vadd.f32 %v2954_v1, %v2630_v5  ;;  %v585_v12 = vrot.slane %v457_v6, 1  ;;  %v586_v13 = vrot.slane %v458_v8, 1  ;;  %v971_v14 = vsel %vm208_vm3, %v843_v9, 0.0  ;;  %v258_v1 = vld [vmem:[#allocation2 + $0x228] sm:$0x3f] }
  0xe1   :  { %v3019_v23 = vadd.f32 %v2955_v3, %v2631_v10  ;;  %v972_v17 = vsel %vm208_vm3, %v844_v7, 0.0  ;;  %v1039_v59 = vmul.f32 %v4293_v22, %v971_v14  ;;  %v1299_v18 = vmul.f32 %v4302_v26, %v1231_v62 }
  0xe2   :  { %v3089_v19 = vadd.f32 %v4772_v0, %v3018_v11  ;;  %v713_v24 = vadd.f32 %v585_v12, %v389_v61  ;;  %v714_v25 = vadd.f32 %v586_v13, %v390_v15  ;;  %v1040_v28 = vmul.f32 %v4293_v22, %v972_v17 }
  0xe3   :  { %v3090_v29 = vadd.f32 %v4772_v0, %v3019_v23  ;;  %v1300_v30 = vmul.f32 %v4302_v26, %v1232_v4  ;;  %v1431_v31 = vmul.f32 %v4304_v27, %v1167_v58  ;;  %v1432_v32 = vmul.f32 %v4304_v27, %v1168_v50 }
  0xe4   :  { %v3153_v35 = vmax.f32 %v3089_v19, 0.0  ;;  %v1103_v36 = vadd.f32 %v1039_v59, %v713_v24  ;;  %v1104_v37 = vadd.f32 %v1040_v28, %v714_v25  ;;  %v1815_v40 = vrot.slane %v1167_v58, 2  ;;  %v1169_v59 = vld [vmem:[#allocation2 + $0x228] sm:$0x3f] }
  0xe5   :  { %v3154_v43 = vmax.f32 %v3090_v29, 0.0  ;;  %v1559_v44 = vrot.slane %v1431_v31, 1  ;;  %v1560_v45 = vrot.slane %v1432_v32, 1  ;;  %v1816_v46 = vrot.slane %v1168_v50, 2 }
  0xe6   :  { %v1363_v49 = vadd.f32 %v1299_v18, %v1103_v36  ;;  %v1364_v52 = vadd.f32 %v1300_v30, %v1104_v37  ;;  %v1943_v54 = vsel %vm208_vm3, %v1815_v40, 0.0  ;;  %v2204_v47 = vsel %vm207_vm2, %v2140_v34, 0.0  ;;  %v1170_v18 = vld [vmem:[#allocation2 + $0x230] sm:$0x3f] }
  0xe7   :  { %v3289_v53 = vcombine.low %v3153_v35, %v3154_v43  ;;  %v1944_v60 = vsel %vm208_vm3, %v1816_v46, 0.0  ;;  %v2011_v55 = vmul.f32 %v4311_v33, %v1943_v54  ;;  %v2205_v42 = vsel %vm207_vm2, %v2141_v51, 0.0 }
  0xe8   :  { %v1687_v61 = vadd.f32 %v1559_v44, %v1363_v49  ;;  %v1688_v58 = vadd.f32 %v1560_v45, %v1364_v52  ;;  %v2012_v50 = vmul.f32 %v4311_v33, %v1944_v60  ;;  %v2272_v63 = vmul.f32 %v4318_v38, %v2204_v47 }
  0xe9   :  { %4053 = vmatmul.mubr.msk.f32.gmra.mxu0 %vm3314_vm4, %v3289_v53  ;;  %v2273_v3 = vmul.f32 %v4318_v38, %v2205_v42  ;;  %v2404_v15 = vmul.f32 %v4320_v39, %v2140_v34  ;;  %v2405_v5 = vmul.f32 %v4320_v39, %v2141_v51  ;;  %v2788_v6 = vrot.slane %v2140_v34, 2  ;;  %v2142_v42 = vld [vmem:[#allocation2 + $0x230] sm:$0x3f] }
  0xea   :  { %v2075_v8 = vadd.f32 %v2011_v55, %v1687_v61  ;;  %v2076_v9 = vadd.f32 %v2012_v50, %v1688_v58  ;;  %v2789_v10 = vrot.slane %v2141_v51, 2  ;;  %v323_v7 = vsel %vm207_vm2, %v257_v56, 0.0  ;;  %v2143_v50 = vld [vmem:[#allocation2 + $0x238] sm:$0x3f] }
  0xeb   :  { %v2532_v62 = vrot.slane %v2404_v15, 1  ;;  %v2533_v4 = vrot.slane %v2405_v5, 1  ;;  %v2916_v11 = vsel %vm208_vm3, %v2788_v6, 0.0  ;;  %v324_v12 = vsel %vm207_vm2, %v258_v1, 0.0 }
  0xec   :  { %v2336_v13 = vadd.f32 %v2272_v63, %v2075_v8  ;;  %v2337_v14 = vadd.f32 %v2273_v3, %v2076_v9  ;;  %v2917_v23 = vsel %vm208_vm3, %v2789_v10, 0.0  ;;  %v2984_v17 = vmul.f32 %v4705_v16, %v2916_v11  ;;  %v227_v11 = vld [vmem:[#allocation2 + $0xc0] sm:$0x3f] }
  0xed   :  { %v2985_v19 = vmul.f32 %v4705_v16, %v2917_v23  ;;  %v391_v24 = vmul.f32 %v4289_v20, %v323_v7  ;;  %v392_v25 = vmul.f32 %v4289_v20, %v324_v12  ;;  %v459_v28 = vmul.f32 %v4291_v21, %v257_v56  ;;  %v228_v12 = vld [vmem:[#allocation2 + $0xc8] sm:$0x3f] }
  0xee   :  { %v2660_v29 = vadd.f32 %v2532_v62, %v2336_v13  ;;  %v2661_v30 = vadd.f32 %v2533_v4, %v2337_v14  ;;  %v460_v31 = vmul.f32 %v4291_v21, %v258_v1  ;;  %v845_v32 = vrot.slane %v257_v56, 2 }
  0xef   :  { %v587_v34 = vrot.slane %v459_v28, 1  ;;  %v846_v35 = vrot.slane %v258_v1, 2  ;;  %v1233_v36 = vsel %vm207_vm2, %v1169_v59, 0.0  ;;  %v1234_v37 = vsel %vm207_vm2, %v1170_v18, 0.0 }
  0xf0   :  { %v3048_v16 = vadd.f32 %v2984_v17, %v2660_v29  ;;  %v3049_v40 = vadd.f32 %v2985_v19, %v2661_v30  ;;  %v588_v51 = vrot.slane %v460_v31, 1  ;;  %v973_v41 = vsel %vm208_vm3, %v845_v32, 0.0 }
  0xf1   :  { %v715_v43 = vadd.f32 %v587_v34, %v391_v24  ;;  %v974_v44 = vsel %vm208_vm3, %v846_v35, 0.0  ;;  %v1041_v45 = vmul.f32 %v4293_v22, %v973_v41  ;;  %v1301_v46 = vmul.f32 %v4302_v26, %v1233_v36 }
  0xf2   :  { %v3119_v48 = vadd.f32 %v4772_v0, %v3048_v16  ;;  %v3120_v49 = vadd.f32 %v4772_v0, %v3049_v40  ;;  %v716_v52 = vadd.f32 %v588_v51, %v392_v25  ;;  %v1042_v54 = vmul.f32 %v4293_v22, %v974_v44  ;;  %v102_v25 = vld [vmem:[#allocation3 + $0x6c] sm:$0xf]  ;;  %v5043_v40 = vld [vmem:[%s6010_s1 + $0x8] ss:$0 sm:$0xff]  ;;  %v1140_v44 = vld [vmem:[#allocation2 + $0xd0] sm:$0x3f] }
  0xf3   :  { %v1105_v47 = vadd.f32 %v1041_v45, %v715_v43  ;;  %v1302_v53 = vmul.f32 %v4302_v26, %v1234_v37  ;;  %v1433_v60 = vmul.f32 %v4304_v27, %v1169_v59  ;;  %v1434_v55 = vmul.f32 %v4304_v27, %v1170_v18  ;;  %168 = vst.msk [vmem:[#allocation2 + $0x141] sm:$0xf] %vm140_vm1, %v102_v25  ;;  %v1139_v43 = vld [vmem:[#allocation2 + $0xc8] sm:$0x3f]  ;;  %v132_v25 = vld [vmem:[#allocation3 + $0xe4] sm:$0xf] }
  0xf4   :  { %v3183_v56 = vmax.f32 %v3119_v48, 0.0  ;;  %v3184_v57 = vmax.f32 %v3120_v49, 0.0  ;;  %v1106_v61 = vadd.f32 %v1042_v54, %v716_v52  ;;  %v1817_v58 = vrot.slane %v1169_v59, 2  ;;  %198 = vst.msk [vmem:[#allocation2 + $0x2b1] sm:$0xf] %vm140_vm1, %v132_v25 }
  0xf5   :  { %v1365_v63 = vadd.f32 %v1301_v46, %v1105_v47  ;;  %v1561_v1 = vrot.slane %v1433_v60, 1  ;;  %v1562_v3 = vrot.slane %v1434_v55, 1  ;;  %v1818_v15 = vrot.slane %v1170_v18, 2 }
  0xf6   :  { %v3304_v5 = vcombine.low %v3183_v56, %v3184_v57  ;;  %v1366_v6 = vadd.f32 %v1302_v53, %v1106_v61  ;;  %v1945_v8 = vsel %vm208_vm3, %v1817_v58, 0.0  ;;  %v2206_v9 = vsel %vm207_vm2, %v2142_v42, 0.0 }
  0xf7   :  { %v1689_v10 = vadd.f32 %v1561_v1, %v1365_v63  ;;  %v1946_v7 = vsel %vm208_vm3, %v1818_v15, 0.0  ;;  %v2013_v62 = vmul.f32 %v4311_v33, %v1945_v8  ;;  %v2207_v4 = vsel %vm207_vm2, %v2143_v50, 0.0 }
  0xf8   :  { %4076 = vmatprep.mubr.msk.f32.mxu1 %vm3314_vm4, %v3304_v5  ;;  %v1690_v13 = vadd.f32 %v1562_v3, %v1366_v6  ;;  %v2014_v14 = vmul.f32 %v4311_v33, %v1946_v7  ;;  %v2274_v23 = vmul.f32 %v4318_v38, %v2206_v9  ;;  %v2275_v17 = vmul.f32 %v4318_v38, %v2207_v4 }
  0xf9   :  { %v2077_v59 = vadd.f32 %v2013_v62, %v1689_v10  ;;  %v2406_v18 = vmul.f32 %v4320_v39, %v2142_v42  ;;  %v2407_v19 = vmul.f32 %v4320_v39, %v2143_v50  ;;  %v2790_v24 = vrot.slane %v2142_v42, 2  ;;  %v2112_v10 = vld [vmem:[#allocation2 + $0xd0] sm:$0x3f] }
  0xfa   :  { %v2078_v28 = vadd.f32 %v2014_v14, %v1690_v13  ;;  %v2791_v29 = vrot.slane %v2143_v50, 2  ;;  %v293_v30 = vsel %vm207_vm2, %v227_v11, 0.0  ;;  %v294_v31 = vsel %vm207_vm2, %v228_v12, 0.0 }
  0xfb   :  { %v2338_v32 = vadd.f32 %v2274_v23, %v2077_v59  ;;  %v2534_v34 = vrot.slane %v2406_v18, 1  ;;  %v2535_v35 = vrot.slane %v2407_v19, 1  ;;  %v2918_v36 = vsel %vm208_vm3, %v2790_v24, 0.0  ;;  %v131_v59 = vld [vmem:[#allocation3 + $0xe0] sm:$0xf] }
  0xfc   :  { %v2339_v37 = vadd.f32 %v2275_v17, %v2078_v28  ;;  %v2919_v16 = vsel %vm208_vm3, %v2791_v29, 0.0  ;;  %v2986_v51 = vmul.f32 %v5043_v40, %v2918_v36  ;;  %v361_v41 = vmul.f32 %v4289_v20, %v293_v30  ;;  %197 = vst.msk [vmem:[#allocation2 + $0x2a9] sm:$0xf] %vm140_vm1, %v131_v59 }
  0xfd   :  { %v2662_v45 = vadd.f32 %v2534_v34, %v2338_v32  ;;  %v2987_v46 = vmul.f32 %v5043_v40, %v2919_v16  ;;  %v362_v48 = vmul.f32 %v4289_v20, %v294_v31  ;;  %v429_v49 = vmul.f32 %v4291_v21, %v227_v11  ;;  %v229_v32 = vld [vmem:[#allocation2 + $0xd0] sm:$0x3f]  ;;  %v230_v16 = vld [vmem:[#allocation2 + $0xd8] sm:$0x3f] }
  0xfe   :  { %v2663_v52 = vadd.f32 %v2535_v35, %v2339_v37  ;;  %v430_v54 = vmul.f32 %v4291_v21, %v228_v12  ;;  %v815_v47 = vrot.slane %v227_v11, 2  ;;  %v816_v53 = vrot.slane %v228_v12, 2  ;;  %v2113_v12 = vld [vmem:[#allocation2 + $0xd8] sm:$0x3f] }
  0xff   :  { %v3050_v60 = vadd.f32 %v2986_v51, %v2662_v45  ;;  %v557_v55 = vrot.slane %v429_v49, 1  ;;  %v1203_v42 = vsel %vm207_vm2, %v1139_v43, 0.0  ;;  %v1204_v56 = vsel %vm207_vm2, %v1140_v44, 0.0  ;;  %v133_v51 = vld [vmem:[#allocation3 + $0xe8] sm:$0xf] }
 0x100   :  { %v3051_v57 = vadd.f32 %v2987_v46, %v2663_v52  ;;  %v558_v61 = vrot.slane %v430_v54, 1  ;;  %v943_v58 = vsel %vm208_vm3, %v815_v47, 0.0  ;;  %v944_v50 = vsel %vm208_vm3, %v816_v53, 0.0  ;;  %199 = vst.msk [vmem:[#allocation2 + $0x2b9] sm:$0xf] %vm140_vm1, %v133_v51 }
 0x101   :  { %v3121_v63 = vadd.f32 %v4772_v0, %v3050_v60  ;;  %v685_v1 = vadd.f32 %v557_v55, %v361_v41  ;;  %v1011_v3 = vmul.f32 %v4293_v22, %v943_v58  ;;  %v1012_v15 = vmul.f32 %v4293_v22, %v944_v50 }
 0x102   :  { %v3122_v5 = vadd.f32 %v4772_v0, %v3051_v57  ;;  %v686_v6 = vadd.f32 %v558_v61, %v362_v48  ;;  %v1271_v8 = vmul.f32 %v4302_v26, %v1203_v42  ;;  %v1272_v9 = vmul.f32 %v4302_v26, %v1204_v56  ;;  %v1141_v61 = vld [vmem:[#allocation2 + $0xd8] sm:$0x3f] }
 0x103   :  { %v3185_v7 = vmax.f32 %v3121_v63, 0.0  ;;  %v1075_v62 = vadd.f32 %v1011_v3, %v685_v1  ;;  %v1403_v4 = vmul.f32 %v4304_v27, %v1139_v43  ;;  %v1404_v11 = vmul.f32 %v4304_v27, %v1140_v44  ;;  %v1142_v3 = vld [vmem:[#allocation2 + $0xe0] sm:$0x3f] }
 0x104   :  { %v3186_v13 = vmax.f32 %v3122_v5, 0.0  ;;  %v1076_v14 = vadd.f32 %v1012_v15, %v686_v6  ;;  %v1787_v23 = vrot.slane %v1139_v43, 2  ;;  %v1788_v17 = vrot.slane %v1140_v44, 2 }
 0x105   :  { %v1335_v18 = vadd.f32 %v1271_v8, %v1075_v62  ;;  %v1531_v0 = vrot.slane %v1403_v4, 1  ;;  %v1532_v19 = vrot.slane %v1404_v11, 1  ;;  %v2176_v24 = vsel %vm207_vm2, %v2112_v10, 0.0 }
 0x106   :  { %v3305_v28 = vcombine.low %v3185_v7, %v3186_v13  ;;  %v1336_v29 = vadd.f32 %v1272_v9, %v1076_v14  ;;  %v1915_v30 = vsel %vm208_vm3, %v1787_v23, 0.0  ;;  %v1916_v31 = vsel %vm208_vm3, %v1788_v17, 0.0 }
 0x107   :  { %v1659_v34 = vadd.f32 %v1531_v0, %v1335_v18  ;;  %v1983_v35 = vmul.f32 %v4311_v33, %v1915_v30  ;;  %v1984_v36 = vmul.f32 %v4311_v33, %v1916_v31  ;;  %v2177_v37 = vsel %vm207_vm2, %v2113_v12, 0.0  ;;  %v5111_v18 = vld [vmem:[%s6011_s2] ss:$0 sm:$0xff] }
 0x108   :  { %4077 = vmatmul.mubr.msk.f32.gmra.mxu1 %vm3314_vm4, %v3305_v28  ;;  %v1660_v41 = vadd.f32 %v1532_v19, %v1336_v29  ;;  %v2244_v43 = vmul.f32 %v4318_v38, %v2176_v24  ;;  %v2245_v44 = vmul.f32 %v4318_v38, %v2177_v37  ;;  %v2376_v45 = vmul.f32 %v4320_v39, %v2112_v10 }
 0x109   :  { %v2047_v46 = vadd.f32 %v1983_v35, %v1659_v34  ;;  %v2377_v48 = vmul.f32 %v4320_v39, %v2113_v12  ;;  %v2760_v49 = vrot.slane %v2112_v10, 2  ;;  %v2761_v52 = vrot.slane %v2113_v12, 2 }
 0x10a   :  { %v2048_v54 = vadd.f32 %v1984_v36, %v1660_v41  ;;  %v2504_v47 = vrot.slane %v2376_v45, 1  ;;  %v295_v53 = vsel %vm207_vm2, %v229_v32, 0.0  ;;  %v296_v60 = vsel %vm207_vm2, %v230_v16, 0.0 }
 0x10b   :  { %v2308_v55 = vadd.f32 %v2244_v43, %v2047_v46  ;;  %v2505_v42 = vrot.slane %v2377_v48, 1  ;;  %v2888_v56 = vsel %vm208_vm3, %v2760_v49, 0.0  ;;  %v2889_v57 = vsel %vm208_vm3, %v2761_v52, 0.0 }
 0x10c   :  { %v2309_v58 = vadd.f32 %v2245_v44, %v2048_v54  ;;  %v2956_v50 = vmul.f32 %v5043_v40, %v2888_v56  ;;  %v2957_v63 = vmul.f32 %v5043_v40, %v2889_v57  ;;  %v363_v1 = vmul.f32 %v4289_v20, %v295_v53  ;;  %v2115_v44 = vld [vmem:[#allocation2 + $0xe8] sm:$0x3f] }
 0x10d   :  { %v2632_v15 = vadd.f32 %v2504_v47, %v2308_v55  ;;  %v364_v5 = vmul.f32 %v4289_v20, %v296_v60  ;;  %v431_v6 = vmul.f32 %v4291_v21, %v229_v32  ;;  %v432_v8 = vmul.f32 %v4291_v21, %v230_v16  ;;  %v259_v60 = vld [vmem:[#allocation2 + $0x240] sm:$0x3f] }
 0x10e   :  { %v2633_v9 = vadd.f32 %v2505_v42, %v2309_v58  ;;  %v817_v10 = vrot.slane %v229_v32, 2  ;;  %v818_v7 = vrot.slane %v230_v16, 2  ;;  %v1205_v62 = vsel %vm207_vm2, %v1141_v61, 0.0  ;;  %v2114_v32 = vld [vmem:[#allocation2 + $0xe0] sm:$0x3f]  ;;  %v4045_v2 = vpop.f32.mrf.mxu0 }
 0x10f   :  { %v3020_v4 = vadd.f32 %v2956_v50, %v2632_v15  ;;  %v559_v11 = vrot.slane %v431_v6, 1  ;;  %v560_v12 = vrot.slane %v432_v8, 1  ;;  %v1206_v13 = vsel %vm207_vm2, %v1142_v3, 0.0 }
 0x110   :  { %v3021_v14 = vadd.f32 %v2957_v63, %v2633_v9  ;;  %v945_v23 = vsel %vm208_vm3, %v817_v10, 0.0  ;;  %v946_v17 = vsel %vm208_vm3, %v818_v7, 0.0  ;;  %v1273_v59 = vmul.f32 %v4302_v26, %v1205_v62 }
 0x111   :  { %v3091_v0 = vadd.f32 %v5111_v18, %v3020_v4  ;;  %v687_v19 = vadd.f32 %v559_v11, %v363_v1  ;;  %v688_v24 = vadd.f32 %v560_v12, %v364_v5  ;;  %v1013_v25 = vmul.f32 %v4293_v22, %v945_v23  ;;  %v1172_v23 = vld [vmem:[#allocation2 + $0x250] sm:$0x3f] }
 0x112   :  { %v3092_v28 = vadd.f32 %v5111_v18, %v3021_v14  ;;  %v1014_v29 = vmul.f32 %v4293_v22, %v946_v17  ;;  %v1274_v30 = vmul.f32 %v4302_v26, %v1206_v13  ;;  %v1405_v31 = vmul.f32 %v4304_v27, %v1141_v61  ;;  %v1171_v14 = vld [vmem:[#allocation2 + $0x248] sm:$0x3f] }
 0x113   :  { %v3155_v34 = vmax.f32 %v3091_v0, 0.0  ;;  %v1077_v35 = vadd.f32 %v1013_v25, %v687_v19  ;;  %v1406_v36 = vmul.f32 %v4304_v27, %v1142_v3  ;;  %v1789_v37 = vrot.slane %v1141_v61, 2  ;;  %v260_v61 = vld [vmem:[#allocation2 + $0x248] sm:$0x3f] }
 0x114   :  { %v3156_v16 = vmax.f32 %v3092_v28, 0.0  ;;  %v1078_v51 = vadd.f32 %v1014_v29, %v688_v24  ;;  %v1533_v41 = vrot.slane %v1405_v31, 1  ;;  %v1790_v43 = vrot.slane %v1142_v3, 2  ;;  %v134_v3 = vld [vmem:[#allocation3 + $0xec] sm:$0xf] }
 0x115   :  { %v1337_v45 = vadd.f32 %v1273_v59, %v1077_v35  ;;  %v1534_v46 = vrot.slane %v1406_v36, 1  ;;  %v1917_v48 = vsel %vm208_vm3, %v1789_v37, 0.0  ;;  %v2178_v49 = vsel %vm207_vm2, %v2114_v32, 0.0  ;;  %200 = vst.msk [vmem:[#allocation2 + $0x2c1] sm:$0xf] %vm140_vm1, %v134_v3 }
 0x116   :  { %v3290_v52 = vcombine.low %v3155_v34, %v3156_v16  ;;  %v1338_v54 = vadd.f32 %v1274_v30, %v1078_v51  ;;  %v1918_v47 = vsel %vm208_vm3, %v1790_v43, 0.0  ;;  %v1985_v53 = vmul.f32 %v4311_v33, %v1917_v48 }
 0x117   :  { %v1661_v55 = vadd.f32 %v1533_v41, %v1337_v45  ;;  %v1986_v42 = vmul.f32 %v4311_v33, %v1918_v47  ;;  %v2179_v56 = vsel %vm207_vm2, %v2115_v44, 0.0  ;;  %v2246_v57 = vmul.f32 %v4318_v38, %v2178_v49 }
 0x118   :  { %4055 = vmatprep.mubr.msk.f32.mxu0 %vm3314_vm4, %v3290_v52  ;;  %v1662_v58 = vadd.f32 %v1534_v46, %v1338_v54  ;;  %v2247_v50 = vmul.f32 %v4318_v38, %v2179_v56  ;;  %v2378_v63 = vmul.f32 %v4320_v39, %v2114_v32  ;;  %v2379_v1 = vmul.f32 %v4320_v39, %v2115_v44 }
 0x119   :  { %v2049_v15 = vadd.f32 %v1985_v53, %v1661_v55  ;;  %v2762_v5 = vrot.slane %v2114_v32, 2  ;;  %v2763_v6 = vrot.slane %v2115_v44, 2  ;;  %v325_v8 = vsel %vm207_vm2, %v259_v60, 0.0 }
 0x11a   :  { %v2050_v9 = vadd.f32 %v1986_v42, %v1662_v58  ;;  %v2506_v10 = vrot.slane %v2378_v63, 1  ;;  %v2507_v7 = vrot.slane %v2379_v1, 1  ;;  %v326_v62 = vsel %vm207_vm2, %v260_v61, 0.0  ;;  %v103_v58 = vld [vmem:[#allocation3 + $0x70] sm:$0xf] }
 0x11b   :  { %v2310_v4 = vadd.f32 %v2246_v57, %v2049_v15  ;;  %v2890_v11 = vsel %vm208_vm3, %v2762_v5, 0.0  ;;  %v2891_v12 = vsel %vm208_vm3, %v2763_v6, 0.0  ;;  %v393_v13 = vmul.f32 %v4289_v20, %v325_v8  ;;  %v104_v15 = vld [vmem:[#allocation3 + $0x74] sm:$0xf]  ;;  %169 = vst.msk [vmem:[#allocation2 + $0x159] sm:$0xf] %vm140_vm1, %v103_v58 }
 0x11c   :  { %v2311_v17 = vadd.f32 %v2247_v50, %v2050_v9  ;;  %v2958_v59 = vmul.f32 %v5043_v40, %v2890_v11  ;;  %v2959_v0 = vmul.f32 %v5043_v40, %v2891_v12  ;;  %v394_v19 = vmul.f32 %v4289_v20, %v326_v62  ;;  %170 = vst.msk [vmem:[#allocation2 + $0x161] sm:$0xf] %vm140_vm1, %v104_v15  ;;  %v261_v11 = vld [vmem:[#allocation2 + $0x250] sm:$0x3f]  ;;  %v105_v12 = vld [vmem:[#allocation3 + $0x78] sm:$0xf] }
 0x11d   :  { %v2634_v24 = vadd.f32 %v2506_v10, %v2310_v4  ;;  %v461_v25 = vmul.f32 %v4291_v21, %v259_v60  ;;  %v462_v28 = vmul.f32 %v4291_v21, %v260_v61  ;;  %v847_v29 = vrot.slane %v259_v60, 2  ;;  %v2144_v60 = vld [vmem:[#allocation2 + $0x250] sm:$0x3f]  ;;  %171 = vst.msk [vmem:[#allocation2 + $0x169] sm:$0xf] %vm140_vm1, %v105_v12 }
 0x11e   :  { %v2635_v30 = vadd.f32 %v2507_v7, %v2311_v17  ;;  %v848_v31 = vrot.slane %v260_v61, 2  ;;  %v1235_v32 = vsel %vm207_vm2, %v1171_v14, 0.0  ;;  %v1236_v34 = vsel %vm207_vm2, %v1172_v23, 0.0  ;;  %v2145_v61 = vld [vmem:[#allocation2 + $0x258] sm:$0x3f] }
 0x11f   :  { %v3022_v35 = vadd.f32 %v2958_v59, %v2634_v24  ;;  %v589_v36 = vrot.slane %v461_v25, 1  ;;  %v590_v37 = vrot.slane %v462_v28, 1  ;;  %v975_v16 = vsel %vm208_vm3, %v847_v29, 0.0  ;;  %v262_v59 = vld [vmem:[#allocation2 + $0x258] sm:$0x3f] }
 0x120   :  { %v3023_v51 = vadd.f32 %v2959_v0, %v2635_v30  ;;  %v976_v41 = vsel %vm208_vm3, %v848_v31, 0.0  ;;  %v1043_v43 = vmul.f32 %v4293_v22, %v975_v16  ;;  %v1303_v44 = vmul.f32 %v4302_v26, %v1235_v32 }
 0x121   :  { %v3093_v45 = vadd.f32 %v5111_v18, %v3022_v35  ;;  %v717_v46 = vadd.f32 %v589_v36, %v393_v13  ;;  %v718_v48 = vadd.f32 %v590_v37, %v394_v19  ;;  %v1044_v49 = vmul.f32 %v4293_v22, %v976_v41 }
 0x122   :  { %v3094_v52 = vadd.f32 %v5111_v18, %v3023_v51  ;;  %v1304_v54 = vmul.f32 %v4302_v26, %v1236_v34  ;;  %v1435_v47 = vmul.f32 %v4304_v27, %v1171_v14  ;;  %v1436_v53 = vmul.f32 %v4304_v27, %v1172_v23 }
 0x123   :  { %v3157_v55 = vmax.f32 %v3093_v45, 0.0  ;;  %v1107_v42 = vadd.f32 %v1043_v43, %v717_v46  ;;  %v1108_v56 = vadd.f32 %v1044_v49, %v718_v48  ;;  %v1819_v57 = vrot.slane %v1171_v14, 2  ;;  %v1173_v43 = vld [vmem:[#allocation2 + $0x258] sm:$0x3f] }
 0x124   :  { %v3158_v50 = vmax.f32 %v3094_v52, 0.0  ;;  %v1563_v63 = vrot.slane %v1435_v47, 1  ;;  %v1564_v1 = vrot.slane %v1436_v53, 1  ;;  %v1820_v3 = vrot.slane %v1172_v23, 2 }
 0x125   :  { %v1367_v5 = vadd.f32 %v1303_v44, %v1107_v42  ;;  %v1368_v6 = vadd.f32 %v1304_v54, %v1108_v56  ;;  %v1947_v8 = vsel %vm208_vm3, %v1819_v57, 0.0  ;;  %v2208_v9 = vsel %vm207_vm2, %v2144_v60, 0.0  ;;  %v1174_v44 = vld [vmem:[#allocation2 + $0x260] sm:$0x3f] }
 0x126   :  { %v3291_v10 = vcombine.low %v3157_v55, %v3158_v50  ;;  %v1948_v7 = vsel %vm208_vm3, %v1820_v3, 0.0  ;;  %v2015_v62 = vmul.f32 %v4311_v33, %v1947_v8  ;;  %v2209_v4 = vsel %vm207_vm2, %v2145_v61, 0.0 }
 0x127   :  { %v1691_v13 = vadd.f32 %v1563_v63, %v1367_v5  ;;  %v1692_v14 = vadd.f32 %v1564_v1, %v1368_v6  ;;  %v2016_v23 = vmul.f32 %v4311_v33, %v1948_v7  ;;  %v2276_v17 = vmul.f32 %v4318_v38, %v2208_v9 }
 0x128   :  { %4056 = vmatmul.mubr.msk.f32.gmra.mxu0 %vm3314_vm4, %v3291_v10  ;;  %v2277_v0 = vmul.f32 %v4318_v38, %v2209_v4  ;;  %v2408_v19 = vmul.f32 %v4320_v39, %v2144_v60  ;;  %v2409_v24 = vmul.f32 %v4320_v39, %v2145_v61  ;;  %v2792_v25 = vrot.slane %v2144_v60, 2 }
 0x129   :  { %v2079_v28 = vadd.f32 %v2015_v62, %v1691_v13  ;;  %v2080_v29 = vadd.f32 %v2016_v23, %v1692_v14  ;;  %v2793_v30 = vrot.slane %v2145_v61, 2  ;;  %v327_v31 = vsel %vm207_vm2, %v261_v11, 0.0 }
 0x12a   :  { %v2536_v32 = vrot.slane %v2408_v19, 1  ;;  %v2537_v34 = vrot.slane %v2409_v24, 1  ;;  %v2920_v35 = vsel %vm208_vm3, %v2792_v25, 0.0  ;;  %v328_v36 = vsel %vm207_vm2, %v262_v59, 0.0 }
 0x12b   :  { %v2340_v37 = vadd.f32 %v2276_v17, %v2079_v28  ;;  %v2341_v16 = vadd.f32 %v2277_v0, %v2080_v29  ;;  %v2921_v51 = vsel %vm208_vm3, %v2793_v30, 0.0  ;;  %v2988_v41 = vmul.f32 %v5043_v40, %v2920_v35  ;;  %v2147_v17 = vld [vmem:[#allocation2 + $0x268] sm:$0x3f] }
 0x12c   :  { %v2989_v45 = vmul.f32 %v5043_v40, %v2921_v51  ;;  %v395_v46 = vmul.f32 %v4289_v20, %v327_v31  ;;  %v396_v48 = vmul.f32 %v4289_v20, %v328_v36  ;;  %v463_v49 = vmul.f32 %v4291_v21, %v261_v11  ;;  %v231_v36 = vld [vmem:[#allocation2 + $0xf0] sm:$0x3f] }
 0x12d   :  { %v2664_v52 = vadd.f32 %v2536_v32, %v2340_v37  ;;  %v2665_v54 = vadd.f32 %v2537_v34, %v2341_v16  ;;  %v464_v47 = vmul.f32 %v4291_v21, %v262_v59  ;;  %v849_v53 = vrot.slane %v261_v11, 2  ;;  %v2146_v11 = vld [vmem:[#allocation2 + $0x260] sm:$0x3f]  ;;  %v232_v37 = vld [vmem:[#allocation2 + $0xf8] sm:$0x3f] }
 0x12e   :  { %v591_v60 = vrot.slane %v463_v49, 1  ;;  %v850_v55 = vrot.slane %v262_v59, 2  ;;  %v1237_v42 = vsel %vm207_vm2, %v1173_v43, 0.0  ;;  %v1238_v56 = vsel %vm207_vm2, %v1174_v44, 0.0  ;;  %v106_v49 = vld [vmem:[#allocation3 + $0x7c] sm:$0xf] }
 0x12f   :  { %v3052_v57 = vadd.f32 %v2988_v41, %v2664_v52  ;;  %v3053_v61 = vadd.f32 %v2989_v45, %v2665_v54  ;;  %v592_v58 = vrot.slane %v464_v47, 1  ;;  %v977_v50 = vsel %vm208_vm3, %v849_v53, 0.0  ;;  %172 = vst.msk [vmem:[#allocation2 + $0x171] sm:$0xf] %vm140_vm1, %v106_v49 }
 0x130   :  { %v719_v63 = vadd.f32 %v591_v60, %v395_v46  ;;  %v978_v1 = vsel %vm208_vm3, %v850_v55, 0.0  ;;  %v1045_v3 = vmul.f32 %v4293_v22, %v977_v50  ;;  %v1305_v15 = vmul.f32 %v4302_v26, %v1237_v42 }
 0x131   :  { %v3123_v5 = vadd.f32 %v5111_v18, %v3052_v57  ;;  %v3124_v6 = vadd.f32 %v5111_v18, %v3053_v61  ;;  %v720_v8 = vadd.f32 %v592_v58, %v396_v48  ;;  %v1046_v9 = vmul.f32 %v4293_v22, %v978_v1  ;;  %v1144_v1 = vld [vmem:[#allocation2 + $0x100] sm:$0x3f] }
 0x132   :  { %v1109_v10 = vadd.f32 %v1045_v3, %v719_v63  ;;  %v1306_v7 = vmul.f32 %v4302_v26, %v1238_v56  ;;  %v1437_v62 = vmul.f32 %v4304_v27, %v1173_v43  ;;  %v1438_v4 = vmul.f32 %v4304_v27, %v1174_v44  ;;  %v1143_v63 = vld [vmem:[#allocation2 + $0xf8] sm:$0x3f] }
 0x133   :  { %v3187_v12 = vmax.f32 %v3123_v5, 0.0  ;;  %v3188_v13 = vmax.f32 %v3124_v6, 0.0  ;;  %v1110_v14 = vadd.f32 %v1046_v9, %v720_v8  ;;  %v1821_v23 = vrot.slane %v1173_v43, 2 }
 0x134   :  { %v1369_v59 = vadd.f32 %v1305_v15, %v1109_v10  ;;  %v1565_v0 = vrot.slane %v1437_v62, 1  ;;  %v1566_v19 = vrot.slane %v1438_v4, 1  ;;  %v1822_v24 = vrot.slane %v1174_v44, 2 }
 0x135   :  { %v3306_v25 = vcombine.low %v3187_v12, %v3188_v13  ;;  %v1370_v28 = vadd.f32 %v1306_v7, %v1110_v14  ;;  %v1949_v29 = vsel %vm208_vm3, %v1821_v23, 0.0  ;;  %v2210_v30 = vsel %vm207_vm2, %v2146_v11, 0.0 }
 0x136   :  { %v1693_v31 = vadd.f32 %v1565_v0, %v1369_v59  ;;  %v1950_v32 = vsel %vm208_vm3, %v1822_v24, 0.0  ;;  %v2017_v34 = vmul.f32 %v4311_v33, %v1949_v29  ;;  %v2211_v35 = vsel %vm207_vm2, %v2147_v17, 0.0 }
 0x137   :  { %4079 = vmatprep.mubr.msk.f32.mxu1 %vm3314_vm4, %v3306_v25  ;;  %v1694_v16 = vadd.f32 %v1566_v19, %v1370_v28  ;;  %v2018_v51 = vmul.f32 %v4311_v33, %v1950_v32  ;;  %v2278_v41 = vmul.f32 %v4318_v38, %v2210_v30  ;;  %v2279_v43 = vmul.f32 %v4318_v38, %v2211_v35 }
 0x138   :  { %v2081_v44 = vadd.f32 %v2017_v34, %v1693_v31  ;;  %v2410_v45 = vmul.f32 %v4320_v39, %v2146_v11  ;;  %v2411_v46 = vmul.f32 %v4320_v39, %v2147_v17  ;;  %v2794_v48 = vrot.slane %v2146_v11, 2  ;;  %v2116_v31 = vld [vmem:[#allocation2 + $0x100] sm:$0x3f] }
 0x139   :  { %v2082_v52 = vadd.f32 %v2018_v51, %v1694_v16  ;;  %v2795_v54 = vrot.slane %v2147_v17, 2  ;;  %v297_v47 = vsel %vm207_vm2, %v231_v36, 0.0  ;;  %v298_v53 = vsel %vm207_vm2, %v232_v37, 0.0 }
 0x13a   :  { %v2342_v60 = vadd.f32 %v2278_v41, %v2081_v44  ;;  %v2538_v55 = vrot.slane %v2410_v45, 1  ;;  %v2539_v42 = vrot.slane %v2411_v46, 1  ;;  %v2922_v56 = vsel %vm208_vm3, %v2794_v48, 0.0  ;;  %v135_v44 = vld [vmem:[#allocation3 + $0xf0] sm:$0xf] }
 0x13b   :  { %v2343_v57 = vadd.f32 %v2279_v43, %v2082_v52  ;;  %v2923_v61 = vsel %vm208_vm3, %v2795_v54, 0.0  ;;  %v2990_v58 = vmul.f32 %v5043_v40, %v2922_v56  ;;  %v365_v50 = vmul.f32 %v4289_v20, %v297_v47  ;;  %v136_v52 = vld [vmem:[#allocation3 + $0xf4] sm:$0xf]  ;;  %201 = vst.msk [vmem:[#allocation2 + $0x2d9] sm:$0xf] %vm140_vm1, %v135_v44 }
 0x13c   :  { %v2666_v3 = vadd.f32 %v2538_v55, %v2342_v60  ;;  %v2991_v15 = vmul.f32 %v5043_v40, %v2923_v61  ;;  %v366_v5 = vmul.f32 %v4289_v20, %v298_v53  ;;  %v433_v6 = vmul.f32 %v4291_v21, %v231_v36  ;;  %v233_v55 = vld [vmem:[#allocation2 + $0x100] sm:$0x3f]  ;;  %202 = vst.msk [vmem:[#allocation2 + $0x2e1] sm:$0xf] %vm140_vm1, %v136_v52 }
 0x13d   :  { %v2667_v8 = vadd.f32 %v2539_v42, %v2343_v57  ;;  %v434_v9 = vmul.f32 %v4291_v21, %v232_v37  ;;  %v819_v10 = vrot.slane %v231_v36, 2  ;;  %v820_v7 = vrot.slane %v232_v37, 2  ;;  %v2117_v37 = vld [vmem:[#allocation2 + $0x108] sm:$0x3f] }
 0x13e   :  { %v3054_v62 = vadd.f32 %v2990_v58, %v2666_v3  ;;  %v561_v4 = vrot.slane %v433_v6, 1  ;;  %v1207_v11 = vsel %vm207_vm2, %v1143_v63, 0.0  ;;  %v1208_v12 = vsel %vm207_vm2, %v1144_v1, 0.0  ;;  %v234_v58 = vld [vmem:[#allocation2 + $0x108] sm:$0x3f] }
 0x13f   :  { %v3055_v13 = vadd.f32 %v2991_v15, %v2667_v8  ;;  %v562_v14 = vrot.slane %v434_v9, 1  ;;  %v947_v23 = vsel %vm208_vm3, %v819_v10, 0.0  ;;  %v948_v17 = vsel %vm208_vm3, %v820_v7, 0.0 }
 0x140   :  { %v3125_v59 = vadd.f32 %v5111_v18, %v3054_v62  ;;  %v689_v0 = vadd.f32 %v561_v4, %v365_v50  ;;  %v1015_v19 = vmul.f32 %v4293_v22, %v947_v23  ;;  %v1016_v24 = vmul.f32 %v4293_v22, %v948_v17  ;;  %v137_v50 = vld [vmem:[#allocation3 + $0xf8] sm:$0xf]  ;;  %v1145_v23 = vld [vmem:[#allocation2 + $0x108] sm:$0x3f] }
 0x141   :  { %v3126_v25 = vadd.f32 %v5111_v18, %v3055_v13  ;;  %v690_v28 = vadd.f32 %v562_v14, %v366_v5  ;;  %v1275_v29 = vmul.f32 %v4302_v26, %v1207_v11  ;;  %v1276_v30 = vmul.f32 %v4302_v26, %v1208_v12  ;;  %203 = vst.msk [vmem:[#allocation2 + $0x2e9] sm:$0xf] %vm140_vm1, %v137_v50 }
 0x142   :  { %v3189_v32 = vmax.f32 %v3125_v59, 0.0  ;;  %v1079_v34 = vadd.f32 %v1015_v19, %v689_v0  ;;  %v1407_v35 = vmul.f32 %v4304_v27, %v1143_v63  ;;  %v1408_v36 = vmul.f32 %v4304_v27, %v1144_v1 }
 0x143   :  { %v3190_v16 = vmax.f32 %v3126_v25, 0.0  ;;  %v1080_v51 = vadd.f32 %v1016_v24, %v690_v28  ;;  %v1791_v41 = vrot.slane %v1143_v63, 2  ;;  %v1792_v43 = vrot.slane %v1144_v1, 2  ;;  %v1146_v24 = vld [vmem:[#allocation2 + $0x110] sm:$0x3f] }
 0x144   :  { %v1339_v45 = vadd.f32 %v1275_v29, %v1079_v34  ;;  %v1535_v46 = vrot.slane %v1407_v35, 1  ;;  %v1536_v48 = vrot.slane %v1408_v36, 1  ;;  %v2180_v49 = vsel %vm207_vm2, %v2116_v31, 0.0 }
 0x145   :  { %v3307_v54 = vcombine.low %v3189_v32, %v3190_v16  ;;  %v1340_v47 = vadd.f32 %v1276_v30, %v1080_v51  ;;  %v1919_v53 = vsel %vm208_vm3, %v1791_v41, 0.0  ;;  %v1920_v60 = vsel %vm208_vm3, %v1792_v43, 0.0 }
 0x146   :  { %v1663_v42 = vadd.f32 %v1535_v46, %v1339_v45  ;;  %v1987_v56 = vmul.f32 %v4311_v33, %v1919_v53  ;;  %v1988_v57 = vmul.f32 %v4311_v33, %v1920_v60  ;;  %v2181_v61 = vsel %vm207_vm2, %v2117_v37, 0.0 }
 0x147   :  { %4080 = vmatmul.mubr.msk.f32.gmra.mxu1 %vm3314_vm4, %v3307_v54  ;;  %v1664_v63 = vadd.f32 %v1536_v48, %v1340_v47  ;;  %v2248_v1 = vmul.f32 %v4318_v38, %v2180_v49  ;;  %v2249_v3 = vmul.f32 %v4318_v38, %v2181_v61  ;;  %v2380_v15 = vmul.f32 %v4320_v39, %v2116_v31 }
 0x148   :  { %v2051_v5 = vadd.f32 %v1987_v56, %v1663_v42  ;;  %v2381_v6 = vmul.f32 %v4320_v39, %v2117_v37  ;;  %v2764_v8 = vrot.slane %v2116_v31, 2  ;;  %v2765_v9 = vrot.slane %v2117_v37, 2 }
 0x149   :  { %v2052_v10 = vadd.f32 %v1988_v57, %v1664_v63  ;;  %v2508_v7 = vrot.slane %v2380_v15, 1  ;;  %v299_v62 = vsel %vm207_vm2, %v233_v55, 0.0  ;;  %v300_v4 = vsel %vm207_vm2, %v234_v58, 0.0 }
 0x14a   :  { %v2312_v11 = vadd.f32 %v2248_v1, %v2051_v5  ;;  %v2509_v12 = vrot.slane %v2381_v6, 1  ;;  %v2892_v13 = vsel %vm208_vm3, %v2764_v8, 0.0  ;;  %v2893_v14 = vsel %vm208_vm3, %v2765_v9, 0.0 }
 0x14b   :  { %v2313_v17 = vadd.f32 %v2249_v3, %v2052_v10  ;;  %v2960_v59 = vmul.f32 %v5043_v40, %v2892_v13  ;;  %v2961_v0 = vmul.f32 %v5043_v40, %v2893_v14  ;;  %v367_v19 = vmul.f32 %v4289_v20, %v299_v62  ;;  %v2119_v3 = vld [vmem:[#allocation2 + $0x118] sm:$0x3f] }
 0x14c   :  { %v2636_v25 = vadd.f32 %v2508_v7, %v2312_v11  ;;  %v368_v28 = vmul.f32 %v4289_v20, %v300_v4  ;;  %v435_v29 = vmul.f32 %v4291_v21, %v233_v55  ;;  %v436_v30 = vmul.f32 %v4291_v21, %v234_v58  ;;  %v263_v4 = vld [vmem:[#allocation2 + $0x270] sm:$0x3f] }
 0x14d   :  { %v2637_v31 = vadd.f32 %v2509_v12, %v2313_v17  ;;  %v821_v32 = vrot.slane %v233_v55, 2  ;;  %v822_v34 = vrot.slane %v234_v58, 2  ;;  %v1209_v35 = vsel %vm207_vm2, %v1145_v23, 0.0  ;;  %v2118_v55 = vld [vmem:[#allocation2 + $0x110] sm:$0x3f] }
 0x14e   :  { %v3024_v36 = vadd.f32 %v2960_v59, %v2636_v25  ;;  %v563_v37 = vrot.slane %v435_v29, 1  ;;  %v564_v16 = vrot.slane %v436_v30, 1  ;;  %v1210_v51 = vsel %vm207_vm2, %v1146_v24, 0.0 }
 0x14f   :  { %v3025_v41 = vadd.f32 %v2961_v0, %v2637_v31  ;;  %v949_v43 = vsel %vm208_vm3, %v821_v32, 0.0  ;;  %v950_v44 = vsel %vm208_vm3, %v822_v34, 0.0  ;;  %v1277_v45 = vmul.f32 %v4302_v26, %v1209_v35 }
 0x150   :  { %v3095_v46 = vadd.f32 %v5111_v18, %v3024_v36  ;;  %v691_v48 = vadd.f32 %v563_v37, %v367_v19  ;;  %v692_v49 = vadd.f32 %v564_v16, %v368_v28  ;;  %v1017_v52 = vmul.f32 %v4293_v22, %v949_v43  ;;  %v1176_v43 = vld [vmem:[#allocation2 + $0x280] sm:$0x3f] }
 0x151   :  { %v3096_v54 = vadd.f32 %v5111_v18, %v3025_v41  ;;  %v1018_v47 = vmul.f32 %v4293_v22, %v950_v44  ;;  %v1278_v53 = vmul.f32 %v4302_v26, %v1210_v51  ;;  %v1409_v60 = vmul.f32 %v4304_v27, %v1145_v23  ;;  %v1175_v41 = vld [vmem:[#allocation2 + $0x278] sm:$0x3f] }
 0x152   :  { %v3159_v42 = vmax.f32 %v3095_v46, 0.0  ;;  %v1081_v56 = vadd.f32 %v1017_v52, %v691_v48  ;;  %v1410_v57 = vmul.f32 %v4304_v27, %v1146_v24  ;;  %v1793_v61 = vrot.slane %v1145_v23, 2  ;;  %v264_v23 = vld [vmem:[#allocation2 + $0x278] sm:$0x3f] }
 0x153   :  { %v3160_v58 = vmax.f32 %v3096_v54, 0.0  ;;  %v1082_v50 = vadd.f32 %v1018_v47, %v692_v49  ;;  %v1537_v63 = vrot.slane %v1409_v60, 1  ;;  %v1794_v1 = vrot.slane %v1146_v24, 2  ;;  %v138_v24 = vld [vmem:[#allocation3 + $0xfc] sm:$0xf] }
 0x154   :  { %v1341_v15 = vadd.f32 %v1277_v45, %v1081_v56  ;;  %v1538_v5 = vrot.slane %v1410_v57, 1  ;;  %v1921_v6 = vsel %vm208_vm3, %v1793_v61, 0.0  ;;  %v2182_v8 = vsel %vm207_vm2, %v2118_v55, 0.0  ;;  %204 = vst.msk [vmem:[#allocation2 + $0x2f1] sm:$0xf] %vm140_vm1, %v138_v24 }
 0x155   :  { %v3292_v9 = vcombine.low %v3159_v42, %v3160_v58  ;;  %v1342_v10 = vadd.f32 %v1278_v53, %v1082_v50  ;;  %v1922_v7 = vsel %vm208_vm3, %v1794_v1, 0.0  ;;  %v1989_v62 = vmul.f32 %v4311_v33, %v1921_v6  ;;  %v108_v24 = vld [vmem:[#allocation3 + $0x84] sm:$0xf] }
 0x156   :  { %v1665_v11 = vadd.f32 %v1537_v63, %v1341_v15  ;;  %v1990_v12 = vmul.f32 %v4311_v33, %v1922_v7  ;;  %v2183_v13 = vsel %vm207_vm2, %v2119_v3, 0.0  ;;  %v2250_v14 = vmul.f32 %v4318_v38, %v2182_v8  ;;  %174 = vst.msk [vmem:[#allocation2 + $0x191] sm:$0xf] %vm140_vm1, %v108_v24 }
 0x157   :  { %4058 = vmatprep.mubr.msk.f32.mxu0 %vm3314_vm4, %v3292_v9  ;;  %v1666_v17 = vadd.f32 %v1538_v5, %v1342_v10  ;;  %v2251_v59 = vmul.f32 %v4318_v38, %v2183_v13  ;;  %v2382_v0 = vmul.f32 %v4320_v39, %v2118_v55  ;;  %v2383_v19 = vmul.f32 %v4320_v39, %v2119_v3 }
 0x158   :  { %v2053_v25 = vadd.f32 %v1989_v62, %v1665_v11  ;;  %v2766_v28 = vrot.slane %v2118_v55, 2  ;;  %v2767_v29 = vrot.slane %v2119_v3, 2  ;;  %v329_v30 = vsel %vm207_vm2, %v263_v4, 0.0  ;;  %v2148_v62 = vld [vmem:[#allocation2 + $0x280] sm:$0x3f] }
 0x159   :  { %v2054_v31 = vadd.f32 %v1990_v12, %v1666_v17  ;;  %v2510_v32 = vrot.slane %v2382_v0, 1  ;;  %v2511_v34 = vrot.slane %v2383_v19, 1  ;;  %v330_v35 = vsel %vm207_vm2, %v264_v23, 0.0 }
 0x15a   :  { %v2314_v36 = vadd.f32 %v2250_v14, %v2053_v25  ;;  %v2894_v37 = vsel %vm208_vm3, %v2766_v28, 0.0  ;;  %v2895_v16 = vsel %vm208_vm3, %v2767_v29, 0.0  ;;  %v397_v51 = vmul.f32 %v4289_v20, %v329_v30  ;;  %v2149_v14 = vld [vmem:[#allocation2 + $0x288] sm:$0x3f] }
 0x15b   :  { %v2315_v44 = vadd.f32 %v2251_v59, %v2054_v31  ;;  %v2962_v45 = vmul.f32 %v5043_v40, %v2894_v37  ;;  %v2963_v46 = vmul.f32 %v5043_v40, %v2895_v16  ;;  %v398_v48 = vmul.f32 %v4289_v20, %v330_v35  ;;  %v109_v37 = vld [vmem:[#allocation3 + $0x88] sm:$0xf] }
 0x15c   :  { %v2638_v49 = vadd.f32 %v2510_v32, %v2314_v36  ;;  %v465_v52 = vmul.f32 %v4291_v21, %v263_v4  ;;  %v466_v54 = vmul.f32 %v4291_v21, %v264_v23  ;;  %v851_v47 = vrot.slane %v263_v4, 2  ;;  %v265_v36 = vld [vmem:[#allocation2 + $0x280] sm:$0x3f]  ;;  %175 = vst.msk [vmem:[#allocation2 + $0x199] sm:$0xf] %vm140_vm1, %v109_v37 }
 0x15d   :  { %v2639_v53 = vadd.f32 %v2511_v34, %v2315_v44  ;;  %v852_v60 = vrot.slane %v264_v23, 2  ;;  %v1239_v55 = vsel %vm207_vm2, %v1175_v41, 0.0  ;;  %v1240_v42 = vsel %vm207_vm2, %v1176_v43, 0.0  ;;  %v107_v23 = vld [vmem:[#allocation3 + $0x80] sm:$0xf] }
 0x15e   :  { %v3026_v56 = vadd.f32 %v2962_v45, %v2638_v49  ;;  %v593_v57 = vrot.slane %v465_v52, 1  ;;  %v594_v61 = vrot.slane %v466_v54, 1  ;;  %v979_v40 = vsel %vm208_vm3, %v851_v47, 0.0  ;;  %173 = vst.msk [vmem:[#allocation2 + $0x189] sm:$0xf] %vm140_vm1, %v107_v23 }
 0x15f   :  { %v3027_v58 = vadd.f32 %v2963_v46, %v2639_v53  ;;  %v980_v50 = vsel %vm208_vm3, %v852_v60, 0.0  ;;  %v1047_v63 = vmul.f32 %v4293_v22, %v979_v40  ;;  %v1307_v1 = vmul.f32 %v4302_v26, %v1239_v55  ;;  %v266_v44 = vld [vmem:[#allocation2 + $0x288] sm:$0x3f] }
 0x160   :  { %v3097_v3 = vadd.f32 %v5111_v18, %v3026_v56  ;;  %v721_v15 = vadd.f32 %v593_v57, %v397_v51  ;;  %v722_v5 = vadd.f32 %v594_v61, %v398_v48  ;;  %v1048_v6 = vmul.f32 %v4293_v22, %v980_v50 }
 0x161   :  { %v3098_v8 = vadd.f32 %v5111_v18, %v3027_v58  ;;  %v1308_v9 = vmul.f32 %v4302_v26, %v1240_v42  ;;  %v1439_v10 = vmul.f32 %v4304_v27, %v1175_v41  ;;  %v1440_v7 = vmul.f32 %v4304_v27, %v1176_v43  ;;  %v5383_v58 = vld [vmem:[%s6010_s1 + $0x8] ss:$0 sm:$0xff] }
 0x162   :  { %v3161_v4 = vmax.f32 %v3097_v3, 0.0  ;;  %v1111_v11 = vadd.f32 %v1047_v63, %v721_v15  ;;  %v1112_v12 = vadd.f32 %v1048_v6, %v722_v5  ;;  %v1823_v13 = vrot.slane %v1175_v41, 2  ;;  %v1177_v63 = vld [vmem:[#allocation2 + $0x288] sm:$0x3f] }
 0x163   :  { %v3162_v17 = vmax.f32 %v3098_v8, 0.0  ;;  %v1567_v59 = vrot.slane %v1439_v10, 1  ;;  %v1568_v0 = vrot.slane %v1440_v7, 1  ;;  %v1824_v19 = vrot.slane %v1176_v43, 2 }
 0x164   :  { %v1371_v25 = vadd.f32 %v1307_v1, %v1111_v11  ;;  %v1372_v28 = vadd.f32 %v1308_v9, %v1112_v12  ;;  %v1951_v29 = vsel %vm208_vm3, %v1823_v13, 0.0  ;;  %v2212_v30 = vsel %vm207_vm2, %v2148_v62, 0.0  ;;  %v1178_v1 = vld [vmem:[#allocation2 + $0x290] sm:$0x3f] }
 0x165   :  { %v3293_v31 = vcombine.low %v3161_v4, %v3162_v17  ;;  %v1952_v32 = vsel %vm208_vm3, %v1824_v19, 0.0  ;;  %v2019_v34 = vmul.f32 %v4311_v33, %v1951_v29  ;;  %v2213_v35 = vsel %vm207_vm2, %v2149_v14, 0.0 }
 0x166   :  { %v1695_v16 = vadd.f32 %v1567_v59, %v1371_v25  ;;  %v1696_v51 = vadd.f32 %v1568_v0, %v1372_v28  ;;  %v2020_v41 = vmul.f32 %v4311_v33, %v1952_v32  ;;  %v2280_v43 = vmul.f32 %v4318_v38, %v2212_v30 }
 0x167   :  { %4059 = vmatmul.mubr.msk.f32.gmra.mxu0 %vm3314_vm4, %v3293_v31  ;;  %v2281_v45 = vmul.f32 %v4318_v38, %v2213_v35  ;;  %v2412_v46 = vmul.f32 %v4320_v39, %v2148_v62  ;;  %v2413_v48 = vmul.f32 %v4320_v39, %v2149_v14  ;;  %v2796_v49 = vrot.slane %v2148_v62, 2 }
 0x168   :  { %v2083_v52 = vadd.f32 %v2019_v34, %v1695_v16  ;;  %v2084_v54 = vadd.f32 %v2020_v41, %v1696_v51  ;;  %v2797_v47 = vrot.slane %v2149_v14, 2  ;;  %v331_v53 = vsel %vm207_vm2, %v265_v36, 0.0 }
 0x169   :  { %v2540_v60 = vrot.slane %v2412_v46, 1  ;;  %v2541_v55 = vrot.slane %v2413_v48, 1  ;;  %v2924_v42 = vsel %vm208_vm3, %v2796_v49, 0.0  ;;  %v332_v56 = vsel %vm207_vm2, %v266_v44, 0.0 }
 0x16a   :  { %v2344_v57 = vadd.f32 %v2280_v43, %v2083_v52  ;;  %v2345_v61 = vadd.f32 %v2281_v45, %v2084_v54  ;;  %v2925_v40 = vsel %vm208_vm3, %v2797_v47, 0.0  ;;  %v2992_v50 = vmul.f32 %v5383_v58, %v2924_v42  ;;  %v2151_v43 = vld [vmem:[#allocation2 + $0x298] sm:$0x3f]  ;;  %v235_v42 = vld [vmem:[#allocation2 + $0x120] sm:$0x3f] }
 0x16b   :  { %v2993_v3 = vmul.f32 %v5383_v58, %v2925_v40  ;;  %v399_v15 = vmul.f32 %v4289_v20, %v331_v53  ;;  %v400_v5 = vmul.f32 %v4289_v20, %v332_v56  ;;  %v467_v6 = vmul.f32 %v4291_v21, %v265_v36  ;;  %v236_v56 = vld [vmem:[#allocation2 + $0x128] sm:$0x3f] }
 0x16c   :  { %v2668_v8 = vadd.f32 %v2540_v60, %v2344_v57  ;;  %v2669_v9 = vadd.f32 %v2541_v55, %v2345_v61  ;;  %v468_v10 = vmul.f32 %v4291_v21, %v266_v44  ;;  %v853_v7 = vrot.slane %v265_v36, 2  ;;  %v2150_v36 = vld [vmem:[#allocation2 + $0x290] sm:$0x3f] }
 0x16d   :  { %v595_v62 = vrot.slane %v467_v6, 1  ;;  %v854_v4 = vrot.slane %v266_v44, 2  ;;  %v1241_v11 = vsel %vm207_vm2, %v1177_v63, 0.0  ;;  %v1242_v12 = vsel %vm207_vm2, %v1178_v1, 0.0 }
 0x16e   :  { %v3056_v13 = vadd.f32 %v2992_v50, %v2668_v8  ;;  %v3057_v14 = vadd.f32 %v2993_v3, %v2669_v9  ;;  %v596_v23 = vrot.slane %v468_v10, 1  ;;  %v981_v17 = vsel %vm208_vm3, %v853_v7, 0.0 }
 0x16f   :  { %v723_v59 = vadd.f32 %v595_v62, %v399_v15  ;;  %v982_v0 = vsel %vm208_vm3, %v854_v4, 0.0  ;;  %v1049_v19 = vmul.f32 %v4293_v22, %v981_v17  ;;  %v1309_v24 = vmul.f32 %v4302_v26, %v1241_v11  ;;  %v1147_v17 = vld [vmem:[#allocation2 + $0x128] sm:$0x3f] }
 0x170   :  { %v3127_v25 = vadd.f32 %v5111_v18, %v3056_v13  ;;  %v3128_v28 = vadd.f32 %v5111_v18, %v3057_v14  ;;  %v724_v29 = vadd.f32 %v596_v23, %v400_v5  ;;  %v1050_v30 = vmul.f32 %v4293_v22, %v982_v0  ;;  %v110_v5 = vld [vmem:[#allocation3 + $0x8c] sm:$0xf] }
 0x171   :  { %v1113_v31 = vadd.f32 %v1049_v19, %v723_v59  ;;  %v1310_v32 = vmul.f32 %v4302_v26, %v1242_v12  ;;  %v1441_v34 = vmul.f32 %v4304_v27, %v1177_v63  ;;  %v1442_v35 = vmul.f32 %v4304_v27, %v1178_v1  ;;  %176 = vst.msk [vmem:[#allocation2 + $0x1a1] sm:$0xf] %vm140_vm1, %v110_v5  ;;  %v1148_v59 = vld [vmem:[#allocation2 + $0x130] sm:$0x3f] }
 0x172   :  { %v3191_v37 = vmax.f32 %v3127_v25, 0.0  ;;  %v3192_v16 = vmax.f32 %v3128_v28, 0.0  ;;  %v1114_v51 = vadd.f32 %v1050_v30, %v724_v29  ;;  %v1825_v41 = vrot.slane %v1177_v63, 2 }
 0x173   :  { %v1373_v44 = vadd.f32 %v1309_v24, %v1113_v31  ;;  %v1569_v45 = vrot.slane %v1441_v34, 1  ;;  %v1570_v46 = vrot.slane %v1442_v35, 1  ;;  %v1826_v18 = vrot.slane %v1178_v1, 2 }
 0x174   :  { %v3308_v48 = vcombine.low %v3191_v37, %v3192_v16  ;;  %v1374_v49 = vadd.f32 %v1310_v32, %v1114_v51  ;;  %v1953_v52 = vsel %vm208_vm3, %v1825_v41, 0.0  ;;  %v2214_v54 = vsel %vm207_vm2, %v2150_v36, 0.0 }
 0x175   :  { %v1697_v47 = vadd.f32 %v1569_v45, %v1373_v44  ;;  %v1954_v53 = vsel %vm208_vm3, %v1826_v18, 0.0  ;;  %v2021_v60 = vmul.f32 %v4311_v33, %v1953_v52  ;;  %v2215_v55 = vsel %vm207_vm2, %v2151_v43, 0.0 }
 0x176   :  { %4082 = vmatprep.mubr.msk.f32.mxu1 %vm3314_vm4, %v3308_v48  ;;  %v1698_v57 = vadd.f32 %v1570_v46, %v1374_v49  ;;  %v2022_v61 = vmul.f32 %v4311_v33, %v1954_v53  ;;  %v2282_v40 = vmul.f32 %v4318_v38, %v2214_v54  ;;  %v2283_v50 = vmul.f32 %v4318_v38, %v2215_v55 }
 0x177   :  { %v2085_v63 = vadd.f32 %v2021_v60, %v1697_v47  ;;  %v2414_v1 = vmul.f32 %v4320_v39, %v2150_v36  ;;  %v2415_v3 = vmul.f32 %v4320_v39, %v2151_v43  ;;  %v2798_v15 = vrot.slane %v2150_v36, 2  ;;  %v2120_v47 = vld [vmem:[#allocation2 + $0x130] sm:$0x3f] }
 0x178   :  { %v2086_v6 = vadd.f32 %v2022_v61, %v1698_v57  ;;  %v2799_v8 = vrot.slane %v2151_v43, 2  ;;  %v301_v9 = vsel %vm207_vm2, %v235_v42, 0.0  ;;  %v302_v10 = vsel %vm207_vm2, %v236_v56, 0.0  ;;  %v5448_v43 = vld [vmem:[%s6011_s2] ss:$0 sm:$0xff] }
 0x179   :  { %v2346_v7 = vadd.f32 %v2282_v40, %v2085_v63  ;;  %v2542_v62 = vrot.slane %v2414_v1, 1  ;;  %v2543_v4 = vrot.slane %v2415_v3, 1  ;;  %v2926_v11 = vsel %vm208_vm3, %v2798_v15, 0.0 }
 0x17a   :  { %v2347_v12 = vadd.f32 %v2283_v50, %v2086_v6  ;;  %v2927_v13 = vsel %vm208_vm3, %v2799_v8, 0.0  ;;  %v2994_v14 = vmul.f32 %v5383_v58, %v2926_v11  ;;  %v369_v23 = vmul.f32 %v4289_v20, %v301_v9  ;;  %v2121_v50 = vld [vmem:[#allocation2 + $0x138] sm:$0x3f]  ;;  %v237_v11 = vld [vmem:[#allocation2 + $0x130] sm:$0x3f] }
 0x17b   :  { %v2670_v0 = vadd.f32 %v2542_v62, %v2346_v7  ;;  %v2995_v19 = vmul.f32 %v5383_v58, %v2927_v13  ;;  %v370_v24 = vmul.f32 %v4289_v20, %v302_v10  ;;  %v437_v25 = vmul.f32 %v4291_v21, %v235_v42 }
 0x17c   :  { %v2671_v28 = vadd.f32 %v2543_v4, %v2347_v12  ;;  %v438_v29 = vmul.f32 %v4291_v21, %v236_v56  ;;  %v823_v30 = vrot.slane %v235_v42, 2  ;;  %v824_v31 = vrot.slane %v236_v56, 2  ;;  %v238_v12 = vld [vmem:[#allocation2 + $0x138] sm:$0x3f] }
 0x17d   :  { %v3058_v32 = vadd.f32 %v2994_v14, %v2670_v0  ;;  %v565_v34 = vrot.slane %v437_v25, 1  ;;  %v1211_v35 = vsel %vm207_vm2, %v1147_v17, 0.0  ;;  %v1212_v36 = vsel %vm207_vm2, %v1148_v59, 0.0 }
 0x17e   :  { %v3059_v37 = vadd.f32 %v2995_v19, %v2671_v28  ;;  %v566_v16 = vrot.slane %v438_v29, 1  ;;  %v951_v51 = vsel %vm208_vm3, %v823_v30, 0.0  ;;  %v952_v41 = vsel %vm208_vm3, %v824_v31, 0.0 }
 0x17f   :  { %v3129_v44 = vadd.f32 %v5448_v43, %v3058_v32  ;;  %v693_v45 = vadd.f32 %v565_v34, %v369_v23  ;;  %v1019_v46 = vmul.f32 %v4293_v22, %v951_v51  ;;  %v1020_v18 = vmul.f32 %v4293_v22, %v952_v41 }
 0x180   :  { %v3130_v48 = vadd.f32 %v5448_v43, %v3059_v37  ;;  %v694_v49 = vadd.f32 %v566_v16, %v370_v24  ;;  %v1279_v52 = vmul.f32 %v4302_v26, %v1211_v35  ;;  %v1280_v54 = vmul.f32 %v4302_v26, %v1212_v36  ;;  %v1149_v36 = vld [vmem:[#allocation2 + $0x138] sm:$0x3f] }
 0x181   :  { %v3193_v53 = vmax.f32 %v3129_v44, 0.0  ;;  %v1083_v60 = vadd.f32 %v1019_v46, %v693_v45  ;;  %v1411_v55 = vmul.f32 %v4304_v27, %v1147_v17  ;;  %v1412_v42 = vmul.f32 %v4304_v27, %v1148_v59  ;;  %v1150_v44 = vld [vmem:[#allocation2 + $0x140] sm:$0x3f] }
 0x182   :  { %v3194_v56 = vmax.f32 %v3130_v48, 0.0  ;;  %v1084_v57 = vadd.f32 %v1020_v18, %v694_v49  ;;  %v1795_v61 = vrot.slane %v1147_v17, 2  ;;  %v1796_v40 = vrot.slane %v1148_v59, 2 }
 0x183   :  { %v1343_v63 = vadd.f32 %v1279_v52, %v1083_v60  ;;  %v1539_v1 = vrot.slane %v1411_v55, 1  ;;  %v1540_v3 = vrot.slane %v1412_v42, 1  ;;  %v2184_v15 = vsel %vm207_vm2, %v2120_v47, 0.0 }
 0x184   :  { %v3309_v5 = vcombine.low %v3193_v53, %v3194_v56  ;;  %v1344_v6 = vadd.f32 %v1280_v54, %v1084_v57  ;;  %v1923_v8 = vsel %vm208_vm3, %v1795_v61, 0.0  ;;  %v1924_v9 = vsel %vm208_vm3, %v1796_v40, 0.0 }
 0x185   :  { %v1667_v10 = vadd.f32 %v1539_v1, %v1343_v63  ;;  %v1991_v7 = vmul.f32 %v4311_v33, %v1923_v8  ;;  %v1992_v62 = vmul.f32 %v4311_v33, %v1924_v9  ;;  %v2185_v4 = vsel %vm207_vm2, %v2121_v50, 0.0  ;;  %v2122_v9 = vld [vmem:[#allocation2 + $0x140] sm:$0x3f] }
 0x186   :  { %4083 = vmatmul.mubr.msk.f32.gmra.mxu1 %vm3314_vm4, %v3309_v5  ;;  %v1668_v13 = vadd.f32 %v1540_v3, %v1344_v6  ;;  %v2252_v14 = vmul.f32 %v4318_v38, %v2184_v15  ;;  %v2253_v23 = vmul.f32 %v4318_v38, %v2185_v4  ;;  %v2384_v17 = vmul.f32 %v4320_v39, %v2120_v47 }
 0x187   :  { %v2055_v59 = vadd.f32 %v1991_v7, %v1667_v10  ;;  %v2385_v0 = vmul.f32 %v4320_v39, %v2121_v50  ;;  %v2768_v19 = vrot.slane %v2120_v47, 2  ;;  %v2769_v24 = vrot.slane %v2121_v50, 2 }
 0x188   :  { %v2056_v25 = vadd.f32 %v1992_v62, %v1668_v13  ;;  %v2512_v28 = vrot.slane %v2384_v17, 1  ;;  %v303_v29 = vsel %vm207_vm2, %v237_v11, 0.0  ;;  %v304_v30 = vsel %vm207_vm2, %v238_v12, 0.0 }
 0x189   :  { %v2316_v31 = vadd.f32 %v2252_v14, %v2055_v59  ;;  %v2513_v32 = vrot.slane %v2385_v0, 1  ;;  %v2896_v34 = vsel %vm208_vm3, %v2768_v19, 0.0  ;;  %v2897_v35 = vsel %vm208_vm3, %v2769_v24, 0.0 }
 0x18a   :  { %v2317_v37 = vadd.f32 %v2253_v23, %v2056_v25  ;;  %v2964_v16 = vmul.f32 %v5383_v58, %v2896_v34  ;;  %v2965_v51 = vmul.f32 %v5383_v58, %v2897_v35  ;;  %v371_v41 = vmul.f32 %v4289_v20, %v303_v29  ;;  %v2123_v23 = vld [vmem:[#allocation2 + $0x148] sm:$0x3f] }
 0x18b   :  { %v2640_v45 = vadd.f32 %v2512_v28, %v2316_v31  ;;  %v372_v46 = vmul.f32 %v4289_v20, %v304_v30  ;;  %v439_v18 = vmul.f32 %v4291_v21, %v237_v11  ;;  %v440_v48 = vmul.f32 %v4291_v21, %v238_v12  ;;  %v267_v30 = vld [vmem:[#allocation2 + $0x2a0] sm:$0x3f] }
 0x18c   :  { %v2641_v49 = vadd.f32 %v2513_v32, %v2317_v37  ;;  %v825_v52 = vrot.slane %v237_v11, 2  ;;  %v826_v54 = vrot.slane %v238_v12, 2  ;;  %v1213_v47 = vsel %vm207_vm2, %v1149_v36, 0.0 }
 0x18d   :  { %v3028_v53 = vadd.f32 %v2964_v16, %v2640_v45  ;;  %v567_v60 = vrot.slane %v439_v18, 1  ;;  %v568_v55 = vrot.slane %v440_v48, 1  ;;  %v1214_v42 = vsel %vm207_vm2, %v1150_v44, 0.0 }
 0x18e   :  { %v3029_v56 = vadd.f32 %v2965_v51, %v2641_v49  ;;  %v953_v57 = vsel %vm208_vm3, %v825_v52, 0.0  ;;  %v954_v61 = vsel %vm208_vm3, %v826_v54, 0.0  ;;  %v1281_v40 = vmul.f32 %v4302_v26, %v1213_v47 }
 0x18f   :  { %v3099_v50 = vadd.f32 %v5448_v43, %v3028_v53  ;;  %v695_v63 = vadd.f32 %v567_v60, %v371_v41  ;;  %v696_v1 = vadd.f32 %v568_v55, %v372_v46  ;;  %v1021_v3 = vmul.f32 %v4293_v22, %v953_v57 }
 0x190   :  { %v3100_v15 = vadd.f32 %v5448_v43, %v3029_v56  ;;  %v1022_v5 = vmul.f32 %v4293_v22, %v954_v61  ;;  %v1282_v6 = vmul.f32 %v4302_v26, %v1214_v42  ;;  %v1413_v8 = vmul.f32 %v4304_v27, %v1149_v36  ;;  %v1179_v42 = vld [vmem:[#allocation2 + $0x2a8] sm:$0x3f]  ;;  %v1180_v56 = vld [vmem:[#allocation2 + $0x2b0] sm:$0x3f] }
 0x191   :  { %v3163_v10 = vmax.f32 %v3099_v50, 0.0  ;;  %v1085_v7 = vadd.f32 %v1021_v3, %v695_v63  ;;  %v1414_v62 = vmul.f32 %v4304_v27, %v1150_v44  ;;  %v1797_v4 = vrot.slane %v1149_v36, 2  ;;  %v268_v36 = vld [vmem:[#allocation2 + $0x2a8] sm:$0x3f] }
 0x192   :  { %v3164_v11 = vmax.f32 %v3100_v15, 0.0  ;;  %v1086_v12 = vadd.f32 %v1022_v5, %v696_v1  ;;  %v1541_v13 = vrot.slane %v1413_v8, 1  ;;  %v1798_v14 = vrot.slane %v1150_v44, 2 }
 0x193   :  { %v1345_v17 = vadd.f32 %v1281_v40, %v1085_v7  ;;  %v1542_v59 = vrot.slane %v1414_v62, 1  ;;  %v1925_v0 = vsel %vm208_vm3, %v1797_v4, 0.0  ;;  %v2186_v19 = vsel %vm207_vm2, %v2122_v9, 0.0 }
 0x194   :  { %v3294_v24 = vcombine.low %v3163_v10, %v3164_v11  ;;  %v1346_v25 = vadd.f32 %v1282_v6, %v1086_v12  ;;  %v1926_v28 = vsel %vm208_vm3, %v1798_v14, 0.0  ;;  %v1993_v29 = vmul.f32 %v4311_v33, %v1925_v0 }
 0x195   :  { %v1669_v31 = vadd.f32 %v1541_v13, %v1345_v17  ;;  %v1994_v32 = vmul.f32 %v4311_v33, %v1926_v28  ;;  %v2187_v34 = vsel %vm207_vm2, %v2123_v23, 0.0  ;;  %v2254_v35 = vmul.f32 %v4318_v38, %v2186_v19 }
 0x196   :  { %4061 = vmatprep.mubr.msk.f32.mxu0 %vm3314_vm4, %v3294_v24  ;;  %v1670_v37 = vadd.f32 %v1542_v59, %v1346_v25  ;;  %v2255_v16 = vmul.f32 %v4318_v38, %v2187_v34  ;;  %v2386_v51 = vmul.f32 %v4320_v39, %v2122_v9  ;;  %v2387_v41 = vmul.f32 %v4320_v39, %v2123_v23 }
 0x197   :  { %v2057_v44 = vadd.f32 %v1993_v29, %v1669_v31  ;;  %v2770_v45 = vrot.slane %v2122_v9, 2  ;;  %v2771_v46 = vrot.slane %v2123_v23, 2  ;;  %v333_v18 = vsel %vm207_vm2, %v267_v30, 0.0  ;;  %v2152_v29 = vld [vmem:[#allocation2 + $0x2b0] sm:$0x3f] }
 0x198   :  { %v2058_v48 = vadd.f32 %v1994_v32, %v1670_v37  ;;  %v2514_v49 = vrot.slane %v2386_v51, 1  ;;  %v2515_v52 = vrot.slane %v2387_v41, 1  ;;  %v334_v54 = vsel %vm207_vm2, %v268_v36, 0.0 }
 0x199   :  { %v2318_v47 = vadd.f32 %v2254_v35, %v2057_v44  ;;  %v2898_v53 = vsel %vm208_vm3, %v2770_v45, 0.0  ;;  %v2899_v60 = vsel %vm208_vm3, %v2771_v46, 0.0  ;;  %v401_v55 = vmul.f32 %v4289_v20, %v333_v18  ;;  %v2153_v35 = vld [vmem:[#allocation2 + $0x2b8] sm:$0x3f] }
 0x19a   :  { %v2319_v57 = vadd.f32 %v2255_v16, %v2058_v48  ;;  %v2966_v61 = vmul.f32 %v5383_v58, %v2898_v53  ;;  %v2967_v40 = vmul.f32 %v5383_v58, %v2899_v60  ;;  %v402_v50 = vmul.f32 %v4289_v20, %v334_v54  ;;  %v269_v54 = vld [vmem:[#allocation2 + $0x2b0] sm:$0x3f] }
 0x19b   :  { %v2642_v63 = vadd.f32 %v2514_v49, %v2318_v47  ;;  %v469_v1 = vmul.f32 %v4291_v21, %v267_v30  ;;  %v470_v3 = vmul.f32 %v4291_v21, %v268_v36  ;;  %v855_v15 = vrot.slane %v267_v30, 2 }
 0x19c   :  { %v2643_v5 = vadd.f32 %v2515_v52, %v2319_v57  ;;  %v856_v6 = vrot.slane %v268_v36, 2  ;;  %v1243_v8 = vsel %vm207_vm2, %v1179_v42, 0.0  ;;  %v1244_v9 = vsel %vm207_vm2, %v1180_v56, 0.0 }
 0x19d   :  { %v3030_v10 = vadd.f32 %v2966_v61, %v2642_v63  ;;  %v597_v7 = vrot.slane %v469_v1, 1  ;;  %v598_v62 = vrot.slane %v470_v3, 1  ;;  %v983_v4 = vsel %vm208_vm3, %v855_v15, 0.0 }
 0x19e   :  { %v3031_v11 = vadd.f32 %v2967_v40, %v2643_v5  ;;  %v984_v12 = vsel %vm208_vm3, %v856_v6, 0.0  ;;  %v1051_v13 = vmul.f32 %v4293_v22, %v983_v4  ;;  %v1311_v14 = vmul.f32 %v4302_v26, %v1243_v8  ;;  %v1181_v4 = vld [vmem:[#allocation2 + $0x2b8] sm:$0x3f] }
 0x19f   :  { %v3101_v23 = vadd.f32 %v5448_v43, %v3030_v10  ;;  %v725_v17 = vadd.f32 %v597_v7, %v401_v55  ;;  %v726_v59 = vadd.f32 %v598_v62, %v402_v50  ;;  %v1052_v0 = vmul.f32 %v4293_v22, %v984_v12 }
 0x1a0   :  { %v3102_v19 = vadd.f32 %v5448_v43, %v3031_v11  ;;  %v1312_v24 = vmul.f32 %v4302_v26, %v1244_v9  ;;  %v1443_v25 = vmul.f32 %v4304_v27, %v1179_v42  ;;  %v1444_v28 = vmul.f32 %v4304_v27, %v1180_v56  ;;  %v1182_v11 = vld [vmem:[#allocation2 + $0x2c0] sm:$0x3f] }
 0x1a1   :  { %v3165_v30 = vmax.f32 %v3101_v23, 0.0  ;;  %v1115_v31 = vadd.f32 %v1051_v13, %v725_v17  ;;  %v1116_v32 = vadd.f32 %v1052_v0, %v726_v59  ;;  %v1827_v34 = vrot.slane %v1179_v42, 2  ;;  %v270_v42 = vld [vmem:[#allocation2 + $0x2b8] sm:$0x3f] }
 0x1a2   :  { %v3166_v36 = vmax.f32 %v3102_v19, 0.0  ;;  %v1571_v37 = vrot.slane %v1443_v25, 1  ;;  %v1572_v16 = vrot.slane %v1444_v28, 1  ;;  %v1828_v51 = vrot.slane %v1180_v56, 2 }
 0x1a3   :  { %v1375_v41 = vadd.f32 %v1311_v14, %v1115_v31  ;;  %v1376_v44 = vadd.f32 %v1312_v24, %v1116_v32  ;;  %v1955_v45 = vsel %vm208_vm3, %v1827_v34, 0.0  ;;  %v2216_v46 = vsel %vm207_vm2, %v2152_v29, 0.0 }
 0x1a4   :  { %v3295_v18 = vcombine.low %v3165_v30, %v3166_v36  ;;  %v1956_v48 = vsel %vm208_vm3, %v1828_v51, 0.0  ;;  %v2023_v49 = vmul.f32 %v4311_v33, %v1955_v45  ;;  %v2217_v52 = vsel %vm207_vm2, %v2153_v35, 0.0 }
 0x1a5   :  { %v1699_v47 = vadd.f32 %v1571_v37, %v1375_v41  ;;  %v1700_v53 = vadd.f32 %v1572_v16, %v1376_v44  ;;  %v2024_v60 = vmul.f32 %v4311_v33, %v1956_v48  ;;  %v2284_v55 = vmul.f32 %v4318_v38, %v2216_v46 }
 0x1a6   :  { %4062 = vmatmul.mubr.msk.f32.gmra.mxu0 %vm3314_vm4, %v3295_v18  ;;  %v2285_v56 = vmul.f32 %v4318_v38, %v2217_v52  ;;  %v2416_v57 = vmul.f32 %v4320_v39, %v2152_v29  ;;  %v2417_v61 = vmul.f32 %v4320_v39, %v2153_v35  ;;  %v2800_v40 = vrot.slane %v2152_v29, 2  ;;  %v2154_v52 = vld [vmem:[#allocation2 + $0x2c0] sm:$0x3f] }
 0x1a7   :  { %v2087_v50 = vadd.f32 %v2023_v49, %v1699_v47  ;;  %v2088_v63 = vadd.f32 %v2024_v60, %v1700_v53  ;;  %v2801_v1 = vrot.slane %v2153_v35, 2  ;;  %v335_v3 = vsel %vm207_vm2, %v269_v54, 0.0 }
 0x1a8   :  { %v2544_v15 = vrot.slane %v2416_v57, 1  ;;  %v2545_v5 = vrot.slane %v2417_v61, 1  ;;  %v2928_v6 = vsel %vm208_vm3, %v2800_v40, 0.0  ;;  %v336_v8 = vsel %vm207_vm2, %v270_v42, 0.0 }
 0x1a9   :  { %v2348_v9 = vadd.f32 %v2284_v55, %v2087_v50  ;;  %v2349_v10 = vadd.f32 %v2285_v56, %v2088_v63  ;;  %v2929_v7 = vsel %vm208_vm3, %v2801_v1, 0.0  ;;  %v2996_v62 = vmul.f32 %v5383_v58, %v2928_v6  ;;  %v2155_v55 = vld [vmem:[#allocation2 + $0x2c8] sm:$0x3f] }
 0x1aa   :  { %v2997_v12 = vmul.f32 %v5383_v58, %v2929_v7  ;;  %v403_v13 = vmul.f32 %v4289_v20, %v335_v3  ;;  %v404_v14 = vmul.f32 %v4289_v20, %v336_v8  ;;  %v471_v23 = vmul.f32 %v4291_v21, %v269_v54  ;;  %v239_v8 = vld [vmem:[#allocation2 + $0x150] sm:$0x3f] }
 0x1ab   :  { %v2672_v17 = vadd.f32 %v2544_v15, %v2348_v9  ;;  %v2673_v59 = vadd.f32 %v2545_v5, %v2349_v10  ;;  %v472_v0 = vmul.f32 %v4291_v21, %v270_v42  ;;  %v857_v19 = vrot.slane %v269_v54, 2  ;;  %v240_v9 = vld [vmem:[#allocation2 + $0x158] sm:$0x3f] }
 0x1ac   :  { %v599_v24 = vrot.slane %v471_v23, 1  ;;  %v858_v25 = vrot.slane %v270_v42, 2  ;;  %v1245_v28 = vsel %vm207_vm2, %v1181_v4, 0.0  ;;  %v1246_v29 = vsel %vm207_vm2, %v1182_v11, 0.0 }
 0x1ad   :  { %v3060_v30 = vadd.f32 %v2996_v62, %v2672_v17  ;;  %v3061_v31 = vadd.f32 %v2997_v12, %v2673_v59  ;;  %v600_v32 = vrot.slane %v472_v0, 1  ;;  %v985_v34 = vsel %vm208_vm3, %v857_v19, 0.0 }
 0x1ae   :  { %v727_v35 = vadd.f32 %v599_v24, %v403_v13  ;;  %v986_v36 = vsel %vm208_vm3, %v858_v25, 0.0  ;;  %v1053_v37 = vmul.f32 %v4293_v22, %v985_v34  ;;  %v1313_v16 = vmul.f32 %v4302_v26, %v1245_v28  ;;  %v1151_v34 = vld [vmem:[#allocation2 + $0x158] sm:$0x3f] }
 0x1af   :  { %v3131_v51 = vadd.f32 %v5448_v43, %v3060_v30  ;;  %v3132_v41 = vadd.f32 %v5448_v43, %v3061_v31  ;;  %v728_v44 = vadd.f32 %v600_v32, %v404_v14  ;;  %v1054_v45 = vmul.f32 %v4293_v22, %v986_v36 }
 0x1b0   :  { %v1117_v46 = vadd.f32 %v1053_v37, %v727_v35  ;;  %v1314_v18 = vmul.f32 %v4302_v26, %v1246_v29  ;;  %v1445_v48 = vmul.f32 %v4304_v27, %v1181_v4  ;;  %v1446_v49 = vmul.f32 %v4304_v27, %v1182_v11  ;;  %v1152_v35 = vld [vmem:[#allocation2 + $0x160] sm:$0x3f] }
 0x1b1   :  { %v3195_v54 = vmax.f32 %v3131_v51, 0.0  ;;  %v3196_v47 = vmax.f32 %v3132_v41, 0.0  ;;  %v1118_v53 = vadd.f32 %v1054_v45, %v728_v44  ;;  %v1829_v60 = vrot.slane %v1181_v4, 2 }
 0x1b2   :  { %v1377_v42 = vadd.f32 %v1313_v16, %v1117_v46  ;;  %v1573_v56 = vrot.slane %v1445_v48, 1  ;;  %v1574_v57 = vrot.slane %v1446_v49, 1  ;;  %v1830_v61 = vrot.slane %v1182_v11, 2 }
 0x1b3   :  { %v3310_v40 = vcombine.low %v3195_v54, %v3196_v47  ;;  %v1378_v50 = vadd.f32 %v1314_v18, %v1118_v53  ;;  %v1957_v63 = vsel %vm208_vm3, %v1829_v60, 0.0  ;;  %v2218_v1 = vsel %vm207_vm2, %v2154_v52, 0.0 }
 0x1b4   :  { %v1701_v3 = vadd.f32 %v1573_v56, %v1377_v42  ;;  %v1958_v15 = vsel %vm208_vm3, %v1830_v61, 0.0  ;;  %v2025_v5 = vmul.f32 %v4311_v33, %v1957_v63  ;;  %v2219_v6 = vsel %vm207_vm2, %v2155_v55, 0.0 }
 0x1b5   :  { %4085 = vmatprep.mubr.msk.f32.mxu1 %vm3314_vm4, %v3310_v40  ;;  %v1702_v10 = vadd.f32 %v1574_v57, %v1378_v50  ;;  %v2026_v7 = vmul.f32 %v4311_v33, %v1958_v15  ;;  %v2286_v62 = vmul.f32 %v4318_v38, %v2218_v1  ;;  %v2287_v4 = vmul.f32 %v4318_v38, %v2219_v6  ;;  %v2124_v1 = vld [vmem:[#allocation2 + $0x160] sm:$0x3f] }
 0x1b6   :  { %v2089_v11 = vadd.f32 %v2025_v5, %v1701_v3  ;;  %v2418_v12 = vmul.f32 %v4320_v39, %v2154_v52  ;;  %v2419_v13 = vmul.f32 %v4320_v39, %v2155_v55  ;;  %v2802_v14 = vrot.slane %v2154_v52, 2 }
 0x1b7   :  { %v2090_v23 = vadd.f32 %v2026_v7, %v1702_v10  ;;  %v2803_v17 = vrot.slane %v2155_v55, 2  ;;  %v305_v59 = vsel %vm207_vm2, %v239_v8, 0.0  ;;  %v306_v0 = vsel %vm207_vm2, %v240_v9, 0.0 }
 0x1b8   :  { %v2350_v19 = vadd.f32 %v2286_v62, %v2089_v11  ;;  %v2546_v24 = vrot.slane %v2418_v12, 1  ;;  %v2547_v25 = vrot.slane %v2419_v13, 1  ;;  %v2930_v28 = vsel %vm208_vm3, %v2802_v14, 0.0  ;;  %v2125_v62 = vld [vmem:[#allocation2 + $0x168] sm:$0x3f] }
 0x1b9   :  { %v2351_v29 = vadd.f32 %v2287_v4, %v2090_v23  ;;  %v2931_v30 = vsel %vm208_vm3, %v2803_v17, 0.0  ;;  %v2998_v31 = vmul.f32 %v5383_v58, %v2930_v28  ;;  %v373_v32 = vmul.f32 %v4289_v20, %v305_v59  ;;  %v241_v28 = vld [vmem:[#allocation2 + $0x160] sm:$0x3f] }
 0x1ba   :  { %v2674_v36 = vadd.f32 %v2546_v24, %v2350_v19  ;;  %v2999_v37 = vmul.f32 %v5383_v58, %v2931_v30  ;;  %v374_v16 = vmul.f32 %v4289_v20, %v306_v0  ;;  %v441_v51 = vmul.f32 %v4291_v21, %v239_v8 }
 0x1bb   :  { %v2675_v41 = vadd.f32 %v2547_v25, %v2351_v29  ;;  %v442_v44 = vmul.f32 %v4291_v21, %v240_v9  ;;  %v827_v45 = vrot.slane %v239_v8, 2  ;;  %v828_v46 = vrot.slane %v240_v9, 2  ;;  %v242_v29 = vld [vmem:[#allocation2 + $0x168] sm:$0x3f] }
 0x1bc   :  { %v3062_v18 = vadd.f32 %v2998_v31, %v2674_v36  ;;  %v569_v48 = vrot.slane %v441_v51, 1  ;;  %v1215_v49 = vsel %vm207_vm2, %v1151_v34, 0.0  ;;  %v1216_v52 = vsel %vm207_vm2, %v1152_v35, 0.0 }
 0x1bd   :  { %v3063_v54 = vadd.f32 %v2999_v37, %v2675_v41  ;;  %v570_v47 = vrot.slane %v442_v44, 1  ;;  %v955_v53 = vsel %vm208_vm3, %v827_v45, 0.0  ;;  %v956_v60 = vsel %vm208_vm3, %v828_v46, 0.0 }
 0x1be   :  { %v3133_v55 = vadd.f32 %v5448_v43, %v3062_v18  ;;  %v697_v42 = vadd.f32 %v569_v48, %v373_v32  ;;  %v1023_v56 = vmul.f32 %v4293_v22, %v955_v53  ;;  %v1024_v57 = vmul.f32 %v4293_v22, %v956_v60 }
 0x1bf   :  { %v3134_v61 = vadd.f32 %v5448_v43, %v3063_v54  ;;  %v698_v40 = vadd.f32 %v570_v47, %v374_v16  ;;  %v1283_v50 = vmul.f32 %v4302_v26, %v1215_v49  ;;  %v1284_v63 = vmul.f32 %v4302_v26, %v1216_v52  ;;  %v1153_v52 = vld [vmem:[#allocation2 + $0x168] sm:$0x3f] }
 0x1c0   :  { %v3197_v3 = vmax.f32 %v3133_v55, 0.0  ;;  %v1087_v15 = vadd.f32 %v1023_v56, %v697_v42  ;;  %v1415_v5 = vmul.f32 %v4304_v27, %v1151_v34  ;;  %v1416_v6 = vmul.f32 %v4304_v27, %v1152_v35  ;;  %v1154_v55 = vld [vmem:[#allocation2 + $0x170] sm:$0x3f] }
 0x1c1   :  { %v3198_v8 = vmax.f32 %v3134_v61, 0.0  ;;  %v1088_v9 = vadd.f32 %v1024_v57, %v698_v40  ;;  %v1799_v10 = vrot.slane %v1151_v34, 2  ;;  %v1800_v7 = vrot.slane %v1152_v35, 2 }
 0x1c2   :  { %v1347_v4 = vadd.f32 %v1283_v50, %v1087_v15  ;;  %v1543_v11 = vrot.slane %v1415_v5, 1  ;;  %v1544_v12 = vrot.slane %v1416_v6, 1  ;;  %v2188_v13 = vsel %vm207_vm2, %v2124_v1, 0.0 }
 0x1c3   :  { %v3311_v14 = vcombine.low %v3197_v3, %v3198_v8  ;;  %v1348_v23 = vadd.f32 %v1284_v63, %v1088_v9  ;;  %v1927_v17 = vsel %vm208_vm3, %v1799_v10, 0.0  ;;  %v1928_v59 = vsel %vm208_vm3, %v1800_v7, 0.0 }
 0x1c4   :  { %v1671_v0 = vadd.f32 %v1543_v11, %v1347_v4  ;;  %v1995_v19 = vmul.f32 %v4311_v33, %v1927_v17  ;;  %v1996_v24 = vmul.f32 %v4311_v33, %v1928_v59  ;;  %v2189_v25 = vsel %vm207_vm2, %v2125_v62, 0.0  ;;  %v2126_v59 = vld [vmem:[#allocation2 + $0x170] sm:$0x3f] }
 0x1c5   :  { %4086 = vmatmul.mubr.msk.f32.gmra.mxu1 %vm3314_vm4, %v3311_v14  ;;  %v1672_v30 = vadd.f32 %v1544_v12, %v1348_v23  ;;  %v2256_v31 = vmul.f32 %v4318_v38, %v2188_v13  ;;  %v2257_v32 = vmul.f32 %v4318_v38, %v2189_v25  ;;  %v2388_v34 = vmul.f32 %v4320_v39, %v2124_v1 }
 0x1c6   :  { %v2059_v35 = vadd.f32 %v1995_v19, %v1671_v0  ;;  %v2389_v36 = vmul.f32 %v4320_v39, %v2125_v62  ;;  %v2772_v37 = vrot.slane %v2124_v1, 2  ;;  %v2773_v16 = vrot.slane %v2125_v62, 2 }
 0x1c7   :  { %v2060_v51 = vadd.f32 %v1996_v24, %v1672_v30  ;;  %v2516_v41 = vrot.slane %v2388_v34, 1  ;;  %v307_v44 = vsel %vm207_vm2, %v241_v28, 0.0  ;;  %v308_v45 = vsel %vm207_vm2, %v242_v29, 0.0 }
 0x1c8   :  { %v2320_v46 = vadd.f32 %v2256_v31, %v2059_v35  ;;  %v2517_v18 = vrot.slane %v2389_v36, 1  ;;  %v2900_v48 = vsel %vm208_vm3, %v2772_v37, 0.0  ;;  %v2901_v49 = vsel %vm208_vm3, %v2773_v16, 0.0 }
 0x1c9   :  { %v2321_v54 = vadd.f32 %v2257_v32, %v2060_v51  ;;  %v2968_v47 = vmul.f32 %v5383_v58, %v2900_v48  ;;  %v2969_v53 = vmul.f32 %v5383_v58, %v2901_v49  ;;  %v375_v60 = vmul.f32 %v4289_v20, %v307_v44  ;;  %v2127_v32 = vld [vmem:[#allocation2 + $0x178] sm:$0x3f] }
 0x1ca   :  { %v2644_v42 = vadd.f32 %v2516_v41, %v2320_v46  ;;  %v376_v56 = vmul.f32 %v4289_v20, %v308_v45  ;;  %v443_v57 = vmul.f32 %v4291_v21, %v241_v28  ;;  %v444_v61 = vmul.f32 %v4291_v21, %v242_v29  ;;  %v271_v45 = vld [vmem:[#allocation2 + $0x2d0] sm:$0x3f] }
 0x1cb   :  { %v2645_v40 = vadd.f32 %v2517_v18, %v2321_v54  ;;  %v829_v50 = vrot.slane %v241_v28, 2  ;;  %v830_v63 = vrot.slane %v242_v29, 2  ;;  %v1217_v1 = vsel %vm207_vm2, %v1153_v52, 0.0 }
 0x1cc   :  { %v3032_v3 = vadd.f32 %v2968_v47, %v2644_v42  ;;  %v571_v15 = vrot.slane %v443_v57, 1  ;;  %v572_v5 = vrot.slane %v444_v61, 1  ;;  %v1218_v6 = vsel %vm207_vm2, %v1154_v55, 0.0 }
 0x1cd   :  { %v3033_v8 = vadd.f32 %v2969_v53, %v2645_v40  ;;  %v957_v9 = vsel %vm208_vm3, %v829_v50, 0.0  ;;  %v958_v10 = vsel %vm208_vm3, %v830_v63, 0.0  ;;  %v1285_v7 = vmul.f32 %v4302_v26, %v1217_v1 }
 0x1ce   :  { %v3103_v62 = vadd.f32 %v5448_v43, %v3032_v3  ;;  %v699_v4 = vadd.f32 %v571_v15, %v375_v60  ;;  %v700_v11 = vadd.f32 %v572_v5, %v376_v56  ;;  %v1025_v12 = vmul.f32 %v4293_v22, %v957_v9 }
 0x1cf   :  { %v3104_v13 = vadd.f32 %v5448_v43, %v3033_v8  ;;  %v1026_v14 = vmul.f32 %v4293_v22, %v958_v10  ;;  %v1286_v23 = vmul.f32 %v4302_v26, %v1218_v6  ;;  %v1417_v17 = vmul.f32 %v4304_v27, %v1153_v52  ;;  %v1183_v6 = vld [vmem:[#allocation2 + $0x2d8] sm:$0x3f]  ;;  %v1184_v8 = vld [vmem:[#allocation2 + $0x2e0] sm:$0x3f] }
 0x1d0   :  { %v3167_v0 = vmax.f32 %v3103_v62, 0.0  ;;  %v1089_v19 = vadd.f32 %v1025_v12, %v699_v4  ;;  %v1418_v24 = vmul.f32 %v4304_v27, %v1154_v55  ;;  %v1801_v25 = vrot.slane %v1153_v52, 2  ;;  %v272_v52 = vld [vmem:[#allocation2 + $0x2d8] sm:$0x3f] }
 0x1d1   :  { %v3168_v28 = vmax.f32 %v3104_v13, 0.0  ;;  %v1090_v29 = vadd.f32 %v1026_v14, %v700_v11  ;;  %v1545_v30 = vrot.slane %v1417_v17, 1  ;;  %v1802_v31 = vrot.slane %v1154_v55, 2 }
 0x1d2   :  { %v1349_v34 = vadd.f32 %v1285_v7, %v1089_v19  ;;  %v1546_v35 = vrot.slane %v1418_v24, 1  ;;  %v1929_v36 = vsel %vm208_vm3, %v1801_v25, 0.0  ;;  %v2190_v37 = vsel %vm207_vm2, %v2126_v59, 0.0 }
 0x1d3   :  { %v3296_v16 = vcombine.low %v3167_v0, %v3168_v28  ;;  %v1350_v51 = vadd.f32 %v1286_v23, %v1090_v29  ;;  %v1930_v41 = vsel %vm208_vm3, %v1802_v31, 0.0  ;;  %v1997_v44 = vmul.f32 %v4311_v33, %v1929_v36 }
 0x1d4   :  { %v1673_v46 = vadd.f32 %v1545_v30, %v1349_v34  ;;  %v1998_v18 = vmul.f32 %v4311_v33, %v1930_v41  ;;  %v2191_v48 = vsel %vm207_vm2, %v2127_v32, 0.0  ;;  %v2258_v49 = vmul.f32 %v4318_v38, %v2190_v37  ;;  %v2156_v41 = vld [vmem:[#allocation2 + $0x2e0] sm:$0x3f] }
 0x1d5   :  { %4064 = vmatprep.mubr.msk.f32.mxu0 %vm3314_vm4, %v3296_v16  ;;  %v1674_v54 = vadd.f32 %v1546_v35, %v1350_v51  ;;  %v2259_v47 = vmul.f32 %v4318_v38, %v2191_v48  ;;  %v2390_v53 = vmul.f32 %v4320_v39, %v2126_v59  ;;  %v2391_v60 = vmul.f32 %v4320_v39, %v2127_v32  ;;  %v2157_v48 = vld [vmem:[#allocation2 + $0x2e8] sm:$0x3f] }
 0x1d6   :  { %v2061_v55 = vadd.f32 %v1997_v44, %v1673_v46  ;;  %v2774_v42 = vrot.slane %v2126_v59, 2  ;;  %v2775_v56 = vrot.slane %v2127_v32, 2  ;;  %v337_v57 = vsel %vm207_vm2, %v271_v45, 0.0 }
 0x1d7   :  { %v2062_v61 = vadd.f32 %v1998_v18, %v1674_v54  ;;  %v2518_v40 = vrot.slane %v2390_v53, 1  ;;  %v2519_v50 = vrot.slane %v2391_v60, 1  ;;  %v338_v63 = vsel %vm207_vm2, %v272_v52, 0.0 }
 0x1d8   :  { %v2322_v1 = vadd.f32 %v2258_v49, %v2061_v55  ;;  %v2902_v3 = vsel %vm208_vm3, %v2774_v42, 0.0  ;;  %v2903_v15 = vsel %vm208_vm3, %v2775_v56, 0.0  ;;  %v405_v5 = vmul.f32 %v4289_v20, %v337_v57 }
 0x1d9   :  { %v2323_v9 = vadd.f32 %v2259_v47, %v2062_v61  ;;  %v2970_v10 = vmul.f32 %v5383_v58, %v2902_v3  ;;  %v2971_v7 = vmul.f32 %v5383_v58, %v2903_v15  ;;  %v406_v62 = vmul.f32 %v4289_v20, %v338_v63 }
 0x1da   :  { %v2646_v4 = vadd.f32 %v2518_v40, %v2322_v1  ;;  %v473_v11 = vmul.f32 %v4291_v21, %v271_v45  ;;  %v474_v12 = vmul.f32 %v4291_v21, %v272_v52  ;;  %v859_v13 = vrot.slane %v271_v45, 2 }
 0x1db   :  { %v2647_v14 = vadd.f32 %v2519_v50, %v2323_v9  ;;  %v860_v23 = vrot.slane %v272_v52, 2  ;;  %v1247_v17 = vsel %vm207_vm2, %v1183_v6, 0.0  ;;  %v1248_v59 = vsel %vm207_vm2, %v1184_v8, 0.0  ;;  %v273_v50 = vld [vmem:[#allocation2 + $0x2e0] sm:$0x3f] }
 0x1dc   :  { %v3034_v0 = vadd.f32 %v2970_v10, %v2646_v4  ;;  %v601_v19 = vrot.slane %v473_v11, 1  ;;  %v602_v24 = vrot.slane %v474_v12, 1  ;;  %v987_v58 = vsel %vm208_vm3, %v859_v13, 0.0 }
 0x1dd   :  { %v3035_v25 = vadd.f32 %v2971_v7, %v2647_v14  ;;  %v988_v28 = vsel %vm208_vm3, %v860_v23, 0.0  ;;  %v1055_v29 = vmul.f32 %v4293_v22, %v987_v58  ;;  %v1315_v30 = vmul.f32 %v4302_v26, %v1247_v17  ;;  %v1185_v58 = vld [vmem:[#allocation2 + $0x2e8] sm:$0x3f] }
 0x1de   :  { %v3105_v31 = vadd.f32 %v5448_v43, %v3034_v0  ;;  %v729_v32 = vadd.f32 %v601_v19, %v405_v5  ;;  %v730_v34 = vadd.f32 %v602_v24, %v406_v62  ;;  %v1056_v35 = vmul.f32 %v4293_v22, %v988_v28  ;;  %v274_v5 = vld [vmem:[#allocation2 + $0x2e8] sm:$0x3f] }
 0x1df   :  { %v3106_v36 = vadd.f32 %v5448_v43, %v3035_v25  ;;  %v1316_v37 = vmul.f32 %v4302_v26, %v1248_v59  ;;  %v1447_v16 = vmul.f32 %v4304_v27, %v1183_v6  ;;  %v1448_v51 = vmul.f32 %v4304_v27, %v1184_v8  ;;  %v5754_v19 = vld [vmem:[%s6010_s1 + $0x8] ss:$0 sm:$0xff]  ;;  %v1186_v25 = vld [vmem:[#allocation2 + $0x2f0] sm:$0x3f] }
 0x1e0   :  { %v3169_v44 = vmax.f32 %v3105_v31, 0.0  ;;  %v1119_v45 = vadd.f32 %v1055_v29, %v729_v32  ;;  %v1120_v46 = vadd.f32 %v1056_v35, %v730_v34  ;;  %v1831_v18 = vrot.slane %v1183_v6, 2 }
 0x1e1   :  { %v3170_v49 = vmax.f32 %v3106_v36, 0.0  ;;  %v1575_v52 = vrot.slane %v1447_v16, 1  ;;  %v1576_v54 = vrot.slane %v1448_v51, 1  ;;  %v1832_v47 = vrot.slane %v1184_v8, 2 }
 0x1e2   :  { %v1379_v53 = vadd.f32 %v1315_v30, %v1119_v45  ;;  %v1380_v60 = vadd.f32 %v1316_v37, %v1120_v46  ;;  %v1959_v55 = vsel %vm208_vm3, %v1831_v18, 0.0  ;;  %v2220_v42 = vsel %vm207_vm2, %v2156_v41, 0.0 }
 0x1e3   :  { %v3297_v56 = vcombine.low %v3169_v44, %v3170_v49  ;;  %v1960_v57 = vsel %vm208_vm3, %v1832_v47, 0.0  ;;  %v2027_v61 = vmul.f32 %v4311_v33, %v1959_v55  ;;  %v2221_v40 = vsel %vm207_vm2, %v2157_v48, 0.0 }
 0x1e4   :  { %v1703_v63 = vadd.f32 %v1575_v52, %v1379_v53  ;;  %v1704_v1 = vadd.f32 %v1576_v54, %v1380_v60  ;;  %v2028_v3 = vmul.f32 %v4311_v33, %v1960_v57  ;;  %v2288_v15 = vmul.f32 %v4318_v38, %v2220_v42 }
 0x1e5   :  { %4065 = vmatmul.mubr.msk.f32.gmra.mxu0 %vm3314_vm4, %v3297_v56  ;;  %v2289_v6 = vmul.f32 %v4318_v38, %v2221_v40  ;;  %v2420_v8 = vmul.f32 %v4320_v39, %v2156_v41  ;;  %v2421_v9 = vmul.f32 %v4320_v39, %v2157_v48  ;;  %v2804_v10 = vrot.slane %v2156_v41, 2  ;;  %v2158_v40 = vld [vmem:[#allocation2 + $0x2f0] sm:$0x3f] }
 0x1e6   :  { %v2091_v7 = vadd.f32 %v2027_v61, %v1703_v63  ;;  %v2092_v62 = vadd.f32 %v2028_v3, %v1704_v1  ;;  %v2805_v4 = vrot.slane %v2157_v48, 2  ;;  %v339_v11 = vsel %vm207_vm2, %v273_v50, 0.0 }
 0x1e7   :  { %v2548_v12 = vrot.slane %v2420_v8, 1  ;;  %v2549_v13 = vrot.slane %v2421_v9, 1  ;;  %v2932_v14 = vsel %vm208_vm3, %v2804_v10, 0.0  ;;  %v340_v23 = vsel %vm207_vm2, %v274_v5, 0.0 }
 0x1e8   :  { %v2352_v17 = vadd.f32 %v2288_v15, %v2091_v7  ;;  %v2353_v59 = vadd.f32 %v2289_v6, %v2092_v62  ;;  %v2933_v0 = vsel %vm208_vm3, %v2805_v4, 0.0  ;;  %v3000_v24 = vmul.f32 %v5754_v19, %v2932_v14  ;;  %v2159_v15 = vld [vmem:[#allocation2 + $0x2f8] sm:$0x3f]  ;;  %v243_v14 = vld [vmem:[#allocation2 + $0x180] sm:$0x3f] }
 0x1e9   :  { %v3001_v28 = vmul.f32 %v5754_v19, %v2933_v0  ;;  %v407_v29 = vmul.f32 %v4289_v20, %v339_v11  ;;  %v408_v30 = vmul.f32 %v4289_v20, %v340_v23  ;;  %v475_v31 = vmul.f32 %v4291_v21, %v273_v50  ;;  %v244_v23 = vld [vmem:[#allocation2 + $0x188] sm:$0x3f] }
 0x1ea   :  { %v2676_v32 = vadd.f32 %v2548_v12, %v2352_v17  ;;  %v2677_v34 = vadd.f32 %v2549_v13, %v2353_v59  ;;  %v476_v35 = vmul.f32 %v4291_v21, %v274_v5  ;;  %v861_v36 = vrot.slane %v273_v50, 2 }
 0x1eb   :  { %v603_v37 = vrot.slane %v475_v31, 1  ;;  %v862_v16 = vrot.slane %v274_v5, 2  ;;  %v1249_v51 = vsel %vm207_vm2, %v1185_v58, 0.0  ;;  %v1250_v41 = vsel %vm207_vm2, %v1186_v25, 0.0 }
 0x1ec   :  { %v3064_v44 = vadd.f32 %v3000_v24, %v2676_v32  ;;  %v3065_v45 = vadd.f32 %v3001_v28, %v2677_v34  ;;  %v604_v46 = vrot.slane %v476_v35, 1  ;;  %v989_v18 = vsel %vm208_vm3, %v861_v36, 0.0 }
 0x1ed   :  { %v731_v48 = vadd.f32 %v603_v37, %v407_v29  ;;  %v990_v49 = vsel %vm208_vm3, %v862_v16, 0.0  ;;  %v1057_v52 = vmul.f32 %v4293_v22, %v989_v18  ;;  %v1317_v54 = vmul.f32 %v4302_v26, %v1249_v51  ;;  %v1156_v18 = vld [vmem:[#allocation2 + $0x190] sm:$0x3f] }
 0x1ee   :  { %v3135_v47 = vadd.f32 %v5448_v43, %v3064_v44  ;;  %v3136_v53 = vadd.f32 %v5448_v43, %v3065_v45  ;;  %v732_v60 = vadd.f32 %v604_v46, %v408_v30  ;;  %v1058_v55 = vmul.f32 %v4293_v22, %v990_v49  ;;  %v1155_v46 = vld [vmem:[#allocation2 + $0x188] sm:$0x3f] }
 0x1ef   :  { %v1121_v42 = vadd.f32 %v1057_v52, %v731_v48  ;;  %v1318_v56 = vmul.f32 %v4302_v26, %v1250_v41  ;;  %v1449_v57 = vmul.f32 %v4304_v27, %v1185_v58  ;;  %v1450_v61 = vmul.f32 %v4304_v27, %v1186_v25 }
 0x1f0   :  { %v3199_v50 = vmax.f32 %v3135_v47, 0.0  ;;  %v3200_v63 = vmax.f32 %v3136_v53, 0.0  ;;  %v1122_v1 = vadd.f32 %v1058_v55, %v732_v60  ;;  %v1833_v3 = vrot.slane %v1185_v58, 2 }
 0x1f1   :  { %v1381_v5 = vadd.f32 %v1317_v54, %v1121_v42  ;;  %v1577_v6 = vrot.slane %v1449_v57, 1  ;;  %v1578_v8 = vrot.slane %v1450_v61, 1  ;;  %v1834_v43 = vrot.slane %v1186_v25, 2 }
 0x1f2   :  { %v3312_v9 = vcombine.low %v3199_v50, %v3200_v63  ;;  %v1382_v10 = vadd.f32 %v1318_v56, %v1122_v1  ;;  %v1961_v7 = vsel %vm208_vm3, %v1833_v3, 0.0  ;;  %v2222_v62 = vsel %vm207_vm2, %v2158_v40, 0.0  ;;  %v5818_v3 = vld [vmem:[%s6011_s2] ss:$0 sm:$0xff] }
 0x1f3   :  { %v1705_v4 = vadd.f32 %v1577_v6, %v1381_v5  ;;  %v1962_v11 = vsel %vm208_vm3, %v1834_v43, 0.0  ;;  %v2029_v12 = vmul.f32 %v4311_v33, %v1961_v7  ;;  %v2223_v13 = vsel %vm207_vm2, %v2159_v15, 0.0 }
 0x1f4   :  { %4088 = vmatprep.mubr.msk.f32.mxu1 %vm3314_vm4, %v3312_v9  ;;  %v1706_v17 = vadd.f32 %v1578_v8, %v1382_v10  ;;  %v2030_v59 = vmul.f32 %v4311_v33, %v1962_v11  ;;  %v2290_v0 = vmul.f32 %v4318_v38, %v2222_v62  ;;  %v2291_v24 = vmul.f32 %v4318_v38, %v2223_v13  ;;  %v2128_v62 = vld [vmem:[#allocation2 + $0x190] sm:$0x3f] }
 0x1f5   :  { %v2093_v58 = vadd.f32 %v2029_v12, %v1705_v4  ;;  %v2422_v25 = vmul.f32 %v4320_v39, %v2158_v40  ;;  %v2423_v28 = vmul.f32 %v4320_v39, %v2159_v15  ;;  %v2806_v29 = vrot.slane %v2158_v40, 2 }
 0x1f6   :  { %v2094_v30 = vadd.f32 %v2030_v59, %v1706_v17  ;;  %v2807_v31 = vrot.slane %v2159_v15, 2  ;;  %v309_v32 = vsel %vm207_vm2, %v243_v14, 0.0  ;;  %v310_v34 = vsel %vm207_vm2, %v244_v23, 0.0 }
 0x1f7   :  { %v2354_v35 = vadd.f32 %v2290_v0, %v2093_v58  ;;  %v2550_v36 = vrot.slane %v2422_v25, 1  ;;  %v2551_v37 = vrot.slane %v2423_v28, 1  ;;  %v2934_v16 = vsel %vm208_vm3, %v2806_v29, 0.0  ;;  %v2129_v0 = vld [vmem:[#allocation2 + $0x198] sm:$0x3f] }
 0x1f8   :  { %v2355_v51 = vadd.f32 %v2291_v24, %v2094_v30  ;;  %v2935_v41 = vsel %vm208_vm3, %v2807_v31, 0.0  ;;  %v3002_v44 = vmul.f32 %v5754_v19, %v2934_v16  ;;  %v377_v45 = vmul.f32 %v4289_v20, %v309_v32  ;;  %v245_v16 = vld [vmem:[#allocation2 + $0x190] sm:$0x3f] }
 0x1f9   :  { %v2678_v48 = vadd.f32 %v2550_v36, %v2354_v35  ;;  %v3003_v49 = vmul.f32 %v5754_v19, %v2935_v41  ;;  %v378_v52 = vmul.f32 %v4289_v20, %v310_v34  ;;  %v445_v54 = vmul.f32 %v4291_v21, %v243_v14 }
 0x1fa   :  { %v2679_v47 = vadd.f32 %v2551_v37, %v2355_v51  ;;  %v446_v53 = vmul.f32 %v4291_v21, %v244_v23  ;;  %v831_v60 = vrot.slane %v243_v14, 2  ;;  %v832_v55 = vrot.slane %v244_v23, 2  ;;  %v246_v51 = vld [vmem:[#allocation2 + $0x198] sm:$0x3f] }
 0x1fb   :  { %v3066_v42 = vadd.f32 %v3002_v44, %v2678_v48  ;;  %v573_v56 = vrot.slane %v445_v54, 1  ;;  %v1219_v57 = vsel %vm207_vm2, %v1155_v46, 0.0  ;;  %v1220_v61 = vsel %vm207_vm2, %v1156_v18, 0.0 }
 0x1fc   :  { %v3067_v40 = vadd.f32 %v3003_v49, %v2679_v47  ;;  %v574_v50 = vrot.slane %v446_v53, 1  ;;  %v959_v63 = vsel %vm208_vm3, %v831_v60, 0.0  ;;  %v960_v1 = vsel %vm208_vm3, %v832_v55, 0.0 }
 0x1fd   :  { %v3137_v15 = vadd.f32 %v5818_v3, %v3066_v42  ;;  %v701_v5 = vadd.f32 %v573_v56, %v377_v45  ;;  %v1027_v6 = vmul.f32 %v4293_v22, %v959_v63  ;;  %v1028_v8 = vmul.f32 %v4293_v22, %v960_v1 }
 0x1fe   :  { %v3138_v43 = vadd.f32 %v5818_v3, %v3067_v40  ;;  %v702_v9 = vadd.f32 %v574_v50, %v378_v52  ;;  %v1287_v10 = vmul.f32 %v4302_v26, %v1219_v57  ;;  %v1288_v7 = vmul.f32 %v4302_v26, %v1220_v61  ;;  %v1157_v61 = vld [vmem:[#allocation2 + $0x198] sm:$0x3f] }
 0x1ff   :  { %v3201_v4 = vmax.f32 %v3137_v15, 0.0  ;;  %v1091_v11 = vadd.f32 %v1027_v6, %v701_v5  ;;  %v1419_v12 = vmul.f32 %v4304_v27, %v1155_v46  ;;  %v1420_v13 = vmul.f32 %v4304_v27, %v1156_v18  ;;  %v1158_v15 = vld [vmem:[#allocation2 + $0x1a0] sm:$0x3f] }
 0x200   :  { %v3202_v14 = vmax.f32 %v3138_v43, 0.0  ;;  %v1092_v23 = vadd.f32 %v1028_v8, %v702_v9  ;;  %v1803_v17 = vrot.slane %v1155_v46, 2  ;;  %v1804_v59 = vrot.slane %v1156_v18, 2 }
 0x201   :  { %v1351_v24 = vadd.f32 %v1287_v10, %v1091_v11  ;;  %v1547_v58 = vrot.slane %v1419_v12, 1  ;;  %v1548_v25 = vrot.slane %v1420_v13, 1  ;;  %v2192_v28 = vsel %vm207_vm2, %v2128_v62, 0.0 }
 0x202   :  { %v3313_v29 = vcombine.low %v3201_v4, %v3202_v14  ;;  %v1352_v30 = vadd.f32 %v1288_v7, %v1092_v23  ;;  %v1931_v31 = vsel %vm208_vm3, %v1803_v17, 0.0  ;;  %v1932_v32 = vsel %vm208_vm3, %v1804_v59, 0.0 }
 0x203   :  { %v1675_v34 = vadd.f32 %v1547_v58, %v1351_v24  ;;  %v1999_v35 = vmul.f32 %v4311_v33, %v1931_v31  ;;  %v2000_v36 = vmul.f32 %v4311_v33, %v1932_v32  ;;  %v2193_v37 = vsel %vm207_vm2, %v2129_v0, 0.0 }
 0x204   :  { %4089 = vmatmul.mubr.msk.f32.gmra.mxu1 %vm3314_vm4, %v3313_v29  ;;  %v1676_v41 = vadd.f32 %v1548_v25, %v1352_v30  ;;  %v2260_v44 = vmul.f32 %v4318_v38, %v2192_v28  ;;  %v2261_v45 = vmul.f32 %v4318_v38, %v2193_v37  ;;  %v2392_v46 = vmul.f32 %v4320_v39, %v2128_v62  ;;  %v2130_v30 = vld [vmem:[#allocation2 + $0x1a0] sm:$0x3f] }
 0x205   :  { %v2063_v18 = vadd.f32 %v1999_v35, %v1675_v34  ;;  %v2393_v48 = vmul.f32 %v4320_v39, %v2129_v0  ;;  %v2776_v49 = vrot.slane %v2128_v62, 2  ;;  %v2777_v52 = vrot.slane %v2129_v0, 2 }
 0x206   :  { %v2064_v54 = vadd.f32 %v2000_v36, %v1676_v41  ;;  %v2520_v47 = vrot.slane %v2392_v46, 1  ;;  %v311_v53 = vsel %vm207_vm2, %v245_v16, 0.0  ;;  %v312_v60 = vsel %vm207_vm2, %v246_v51, 0.0  ;;  %v2131_v41 = vld [vmem:[#allocation2 + $0x1a8] sm:$0x3f] }
 0x207   :  { %v2324_v55 = vadd.f32 %v2260_v44, %v2063_v18  ;;  %v2521_v42 = vrot.slane %v2393_v48, 1  ;;  %v2904_v56 = vsel %vm208_vm3, %v2776_v49, 0.0  ;;  %v2905_v57 = vsel %vm208_vm3, %v2777_v52, 0.0 }
 0x208   :  { %v2325_v40 = vadd.f32 %v2261_v45, %v2064_v54  ;;  %v2972_v50 = vmul.f32 %v5754_v19, %v2904_v56  ;;  %v2973_v63 = vmul.f32 %v5754_v19, %v2905_v57  ;;  %v379_v1 = vmul.f32 %v4289_v20, %v311_v53 }
 0x209   :  { %v2648_v5 = vadd.f32 %v2520_v47, %v2324_v55  ;;  %v380_v6 = vmul.f32 %v4289_v20, %v312_v60  ;;  %v447_v8 = vmul.f32 %v4291_v21, %v245_v16  ;;  %v448_v43 = vmul.f32 %v4291_v21, %v246_v51 }
 0x20a   :  { %v2649_v9 = vadd.f32 %v2521_v42, %v2325_v40  ;;  %v833_v10 = vrot.slane %v245_v16, 2  ;;  %v834_v7 = vrot.slane %v246_v51, 2  ;;  %v1221_v62 = vsel %vm207_vm2, %v1157_v61, 0.0 }
 0x20b   :  { %v3036_v4 = vadd.f32 %v2972_v50, %v2648_v5  ;;  %v575_v11 = vrot.slane %v447_v8, 1  ;;  %v576_v12 = vrot.slane %v448_v43, 1  ;;  %v1222_v13 = vsel %vm207_vm2, %v1158_v15, 0.0 }
 0x20c   :  { %v3037_v14 = vadd.f32 %v2973_v63, %v2649_v9  ;;  %v961_v20 = vsel %vm208_vm3, %v833_v10, 0.0  ;;  %v962_v23 = vsel %vm208_vm3, %v834_v7, 0.0  ;;  %v1289_v21 = vmul.f32 %v4302_v26, %v1221_v62 }
 0x20d   :  { %v3107_v17 = vadd.f32 %v5818_v3, %v3036_v4  ;;  %v703_v59 = vadd.f32 %v575_v11, %v379_v1  ;;  %v704_v0 = vadd.f32 %v576_v12, %v380_v6  ;;  %v1029_v24 = vmul.f32 %v4293_v22, %v961_v20  ;;  %v3445_v12 = vpop.f32.mrf.mxu0 }
 0x20e   :  { %v3108_v58 = vadd.f32 %v5818_v3, %v3037_v14  ;;  %v1030_v25 = vmul.f32 %v4293_v22, %v962_v23  ;;  %v1290_v28 = vmul.f32 %v4302_v26, %v1222_v13  ;;  %v1421_v29 = vmul.f32 %v4304_v27, %v1157_v61 }
 0x20f   :  { %v3171_v31 = vmax.f32 %v3107_v17, 0.0  ;;  %v1093_v32 = vadd.f32 %v1029_v24, %v703_v59  ;;  %v1422_v34 = vmul.f32 %v4304_v27, %v1158_v15  ;;  %v1805_v35 = vrot.slane %v1157_v61, 2  ;;  %v4048_v13 = vpop.f32.mrf.mxu0  ;;  %v3800_v59 = vld [vmem:[%s6014_s5 + $0x18] sm:$0xff] }
 0x210   :  { %v3172_v36 = vmax.f32 %v3108_v58, 0.0  ;;  %v1094_v37 = vadd.f32 %v1030_v25, %v704_v0  ;;  %v1549_v16 = vrot.slane %v1421_v29, 1  ;;  %v1806_v51 = vrot.slane %v1158_v15, 2  ;;  %4091 = vmatprep.subr.mxu1 %v3800_v59  ;;  %v3798_v0 = vld [vmem:[%s6014_s5 + $0x8] sm:$0xff]  ;;  %v3797_v58 = vld [vmem:[%s6014_s5] sm:$0xff] }
 0x211   :  { %v1353_v44 = vadd.f32 %v1289_v21, %v1093_v32  ;;  %v1550_v45 = vrot.slane %v1422_v34, 1  ;;  %v1933_v22 = vsel %vm208_vm3, %v1805_v35, 0.0  ;;  %v2194_v26 = vsel %vm207_vm2, %v2130_v30, 0.0  ;;  %v3455_v14 = vpop.f32.mrf.mxu0  ;;  %4092 = vmatpush3.msra.mxu1 %v3800_v59 }
 0x212   :  { %v3298_v46 = vcombine.low %v3171_v31, %v3172_v36  ;;  %v1354_v18 = vadd.f32 %v1290_v28, %v1094_v37  ;;  %v1934_v48 = vsel %vm208_vm3, %v1806_v51, 0.0  ;;  %v2001_v27 = vmul.f32 %v4311_v33, %v1933_v22 }
 0x213   :  { %v1677_v49 = vadd.f32 %v1549_v16, %v1353_v44  ;;  %v2002_v52 = vmul.f32 %v4311_v33, %v1934_v48  ;;  %v2195_v54 = vsel %vm207_vm2, %v2131_v41, 0.0  ;;  %v2262_v47 = vmul.f32 %v4318_v38, %v2194_v26  ;;  %v4051_v20 = vpop.f32.mrf.mxu0 }
 0x214   :  { %4067 = vmatprep.mubr.msk.f32.mxu0 %vm3314_vm4, %v3298_v46  ;;  %v1678_v53 = vadd.f32 %v1550_v45, %v1354_v18  ;;  %v2263_v60 = vmul.f32 %v4318_v38, %v2195_v54  ;;  %v2394_v55 = vmul.f32 %v4320_v39, %v2130_v30  ;;  %v2395_v42 = vmul.f32 %v4320_v39, %v2131_v41 }
 0x215   :  { %v2065_v56 = vadd.f32 %v2001_v27, %v1677_v49  ;;  %v2778_v57 = vrot.slane %v2130_v30, 2  ;;  %v2779_v61 = vrot.slane %v2131_v41, 2  ;;  %v3465_v23 = vpop.f32.mrf.mxu0  ;;  %v5912_v30 = vld [vmem:[%s6013_s4] ss:$0 sm:$0xff]  ;;  %vm3636_vm5 = vcmask 261120  }
 0x216   :  { %v2066_v40 = vadd.f32 %v2002_v52, %v1678_v53  ;;  %v2522_v50 = vrot.slane %v2394_v55, 1  ;;  %v2523_v33 = vrot.slane %v2395_v42, 1  ;;  %v3456_v31 = vadd.f32 %v5912_v30, %v3455_v14 }
 0x217   :  { %v2326_v63 = vadd.f32 %v2262_v47, %v2065_v56  ;;  %v2906_v1 = vsel %vm208_vm3, %v2778_v57, 0.0  ;;  %v2907_v15 = vsel %vm208_vm3, %v2779_v61, 0.0  ;;  %v3466_v32 = vadd.f32 %v5912_v30, %v3465_v23 }
 0x218   :  { %v2327_v5 = vadd.f32 %v2263_v60, %v2066_v40  ;;  %v2974_v38 = vmul.f32 %v5754_v19, %v2906_v1  ;;  %v2975_v6 = vmul.f32 %v5754_v19, %v2907_v15  ;;  %v4054_v19 = vpop.f32.mrf.mxu0  ;;  %v3446_v34 = vadd.f32 %v5912_v30, %v3445_v12 }
 0x219   :  { %v2650_v8 = vadd.f32 %v2522_v50, %v2326_v63  ;;  %v3461_v35 = vadd.f32 %v4048_v13, %v5912_v30  ;;  %v3471_v16 = vadd.f32 %v4051_v20, %v5912_v30  ;;  %v3451_v41 = vadd.f32 %v4045_v2, %v5912_v30 }
 0x21a   :  { %v2651_v39 = vadd.f32 %v2523_v33, %v2327_v5  ;;  %v3475_v21 = vpop.f32.mrf.mxu0  ;;  %v3606_v44 = vmax.f32 %v3456_v31, 0.0  ;;  %v3481_v45 = vadd.f32 %v4054_v19, %v5912_v30  ;;  %v3608_v26 = vmax.f32 %v3466_v32, 0.0 }
 0x21b   :  { %v3038_v43 = vadd.f32 %v2974_v38, %v2650_v8  ;;  %v3476_v36 = vadd.f32 %v5912_v30, %v3475_v21  ;;  %v3604_v48 = vmax.f32 %v3446_v34, 0.0  ;;  %v3607_v27 = vmax.f32 %v3461_v35, 0.0 }
 0x21c   :  { %v3039_v9 = vadd.f32 %v2975_v6, %v2651_v39  ;;  %v4057_v17 = vpop.f32.mrf.mxu0  ;;  %v3609_v54 = vmax.f32 %v3471_v16, 0.0  ;;  %v3605_v60 = vmax.f32 %v3451_v41, 0.0  ;;  %v3646_v55 = vsel %vm3636_vm5, %v3606_v44, 0.0 }
 0x21d   :  { %v3109_v10 = vadd.f32 %v5818_v3, %v3038_v43  ;;  %v3491_v46 = vadd.f32 %v4057_v17, %v5912_v30  ;;  %v3610_v49 = vmax.f32 %v3476_v36, 0.0  ;;  %v3611_v42 = vmax.f32 %v3481_v45, 0.0 }
 0x21e   :  { %v3110_v7 = vadd.f32 %v5818_v3, %v3039_v9  ;;  %v3799_v3 = vld [vmem:[%s6014_s5 + $0x10] sm:$0xff]  ;;  %v3485_v24 = vpop.f32.mrf.mxu0  ;;  %v3655_v57 = vsel %vm3636_vm5, %v3608_v26, 0.0  ;;  %v3637_v50 = vsel %vm3636_vm5, %v3604_v48, 0.0  ;;  %v3647_v33 = vsel %vm3636_vm5, %v3607_v27, 0.0 }
 0x21f   :  { %v3173_v62 = vmax.f32 %v3109_v10, 0.0  ;;  %4093 = vmatprep.subr.mxu1 %v3799_v3  ;;  %v3486_v51 = vadd.f32 %v5912_v30, %v3485_v24  ;;  %v3613_v61 = vmax.f32 %v3491_v46, 0.0  ;;  %v3664_v63 = vsel %vm3636_vm5, %v3610_v49, 0.0 }
 0x220   :  { %v3174_v4 = vmax.f32 %v3110_v7, 0.0  ;;  %4094 = vmatpush3.msra.mxu1 %v3799_v3  ;;  %v3648_v15 = vadd.f32 %v3647_v33, %v3646_v55  ;;  %v3656_v5 = vsel %vm3636_vm5, %v3609_v54, 0.0  ;;  %v3638_v8 = vsel %vm3636_vm5, %v3605_v60, 0.0 }
 0x221   :  { %4095 = vmatprep.subr.mxu1 %v3798_v0  ;;  %v3612_v47 = vmax.f32 %v3486_v51, 0.0  ;;  %v3657_v39 = vadd.f32 %v3656_v5, %v3655_v57  ;;  %v3665_v43 = vsel %vm3636_vm5, %v3611_v42, 0.0  ;;  %v3639_v10 = vadd.f32 %v3638_v8, %v3637_v50 }
 0x222   :  { %v3299_v11 = vcombine.low %v3173_v62, %v3174_v4  ;;  %4096 = vmatpush3.msra.mxu1 %v3798_v0  ;;  %v3666_v7 = vadd.f32 %v3665_v43, %v3664_v63  ;;  %v3674_v62 = vsel %vm3636_vm5, %v3613_v61, 0.0  ;;  %v3649_v12 = vrot.slane %v3648_v15, 4 }
 0x223   :  { %4097 = vmatprep.subr.mxu1 %v3797_v58  ;;  %v3673_v38 = vsel %vm3636_vm5, %v3612_v47, 0.0  ;;  %v3658_v20 = vrot.slane %v3657_v39, 4  ;;  %v3640_v19 = vrot.slane %v3639_v10, 4  ;;  %vm3824_vm6 = vcmask 1041409  }
 0x224   :  { %4068 = vmatmul.mubr.msk.f32.gmra.mxu0 %vm3314_vm4, %v3299_v11  ;;  %4098 = vmatpush3.msra.mxu1 %v3797_v58  ;;  %v3675_v11 = vadd.f32 %v3674_v62, %v3673_v38  ;;  %v3667_v21 = vrot.slane %v3666_v7, 4  ;;  %v3650_v59 = vadd.f32 %v3649_v12, %v3648_v15  ;;  %vm3826_vm7 = vcmask 1042434  }
 0x225   :  { %v3659_v0 = vadd.f32 %v3658_v20, %v3657_v39  ;;  %v3641_v58 = vadd.f32 %v3640_v19, %v3639_v10  ;;  %vm3828_vm8 = vcmask 1043459   ;;  %vm3830_vm9 = vcmask 1044484  }
 0x226   :  { %v3676_v17 = vrot.slane %v3675_v11, 4  ;;  %v3651_v31 = vrot.slane %v3650_v59, 2  ;;  %vm3832_vm10 = vcmask 1045509   ;;  %vm3834_vm11 = vcmask 1046534  }
 0x227   :  { %v4060_v25 = vpop.f32.mrf.mxu0  ;;  %v3660_v34 = vrot.slane %v3659_v0, 2  ;;  %v3642_v36 = vrot.slane %v3641_v58, 2  ;;  %vm3836_vm12 = vcmask 1047559  }
 0x228   :  { %v3501_v52 = vadd.f32 %v4060_v25, %v5912_v30  ;;  %v3668_v25 = vadd.f32 %v3667_v21, %v3666_v7  ;;  %v3652_v45 = vadd.f32 %v3651_v31, %v3650_v59 }
 0x229   :  { %v3495_v28 = vpop.f32.mrf.mxu0  ;;  %v3661_v46 = vadd.f32 %v3660_v34, %v3659_v0  ;;  %v3643_v49 = vadd.f32 %v3642_v36, %v3641_v58 }
 0x22a   :  { %v3496_v22 = vadd.f32 %v5912_v30, %v3495_v28  ;;  %v3615_v1 = vmax.f32 %v3501_v52, 0.0  ;;  %v5942_v28 = vpop.f32.mrf.mxu1  ;;  %v3653_v60 = vrot.slane %v3652_v45, 1 }
 0x22b   :  { %v3662_v42 = vrot.slane %v3661_v46, 1 }
 0x22c   :  { %v3614_v56 = vmax.f32 %v3496_v22, 0.0  ;;  %v3683_v2 = vsel %vm3636_vm5, %v3615_v1, 0.0  ;;  %v5944_v51 = vpop.f32.mrf.mxu1  ;;  %v3654_v15 = vadd.f32 %v3653_v60, %v3652_v45 }
 0x22e   :  { %v3682_v9 = vsel %vm3636_vm5, %v3614_v56, 0.0  ;;  %v5948_v54 = vpop.f32.mrf.mxu1  ;;  %v3782_v62 = vmul.f32 0.0625, %v3654_v15 }
 0x22f   :  { %v3684_v13 = vadd.f32 %v3683_v2, %v3682_v9 }
 0x230   :  { %v3545_v63 = vpop.f32.mrf.mxu1 }
 0x231   :  { %v3685_v3 = vrot.slane %v3684_v13, 4 }
 0x232   :  { %v4078_v10 = vpop.f32.mrf.mxu1 }
 0x233   :  { %v3686_v32 = vadd.f32 %v3685_v3, %v3684_v13 }
 0x235   :  { %v3687_v22 = vrot.slane %v3686_v32, 2 }
 0x237   :  { %v3688_v55 = vadd.f32 %v3687_v22, %v3686_v32  ;;  %v3541_v22 = vadd.f32 %v5942_v28, %v5912_v30 }
 0x239   :  { %v3689_v5 = vrot.slane %v3688_v55, 1 }
 0x266   :  { %v4063_v29 = vpop.f32.mrf.mxu0 }
 0x267   :  { %v3511_v53 = vadd.f32 %v4063_v29, %v5912_v30  ;;  %v3677_v29 = vadd.f32 %v3676_v17, %v3675_v11 }
 0x268   :  { %v3505_v37 = vpop.f32.mrf.mxu0 }
 0x269   :  { %v3506_v18 = vadd.f32 %v5912_v30, %v3505_v37  ;;  %v3617_v6 = vmax.f32 %v3511_v53, 0.0  ;;  %v3669_v37 = vrot.slane %v3668_v25, 2  ;;  %v3678_v41 = vrot.slane %v3677_v29, 2 }
 0x26b   :  { %v3616_v40 = vmax.f32 %v3506_v18, 0.0  ;;  %v3692_v14 = vsel %vm3636_vm5, %v3617_v6, 0.0  ;;  %v3670_v52 = vadd.f32 %v3669_v37, %v3668_v25  ;;  %v3679_v47 = vadd.f32 %v3678_v41, %v3677_v29 }
 0x26c   :  { %v3663_v6 = vadd.f32 %v3662_v42, %v3661_v46  ;;  %v3551_v46 = vadd.f32 %v5948_v54, %v5912_v30 }
 0x26d   :  { %v3691_v4 = vsel %vm3636_vm5, %v3616_v40, 0.0  ;;  %v3644_v40 = vrot.slane %v3643_v49, 1  ;;  %v3671_v50 = vrot.slane %v3670_v52, 1  ;;  %v3680_v1 = vrot.slane %v3679_v47, 1 }
 0x26e   :  { %v3693_v23 = vadd.f32 %v3692_v14, %v3691_v4  ;;  %v3690_v4 = vadd.f32 %v3689_v5, %v3688_v55  ;;  %v3783_v2 = vmul.f32 0.0625, %v3663_v6  ;;  %v3625_v55 = vmax.f32 %v3551_v46, 0.0 }
 0x26f   :  { %v3645_v39 = vadd.f32 %v3644_v40, %v3643_v49  ;;  %v3672_v43 = vadd.f32 %v3671_v50, %v3670_v52  ;;  %v3681_v7 = vadd.f32 %v3680_v1, %v3679_v47 }
 0x270   :  { %v3694_v24 = vrot.slane %v3693_v23, 4  ;;  %v3786_v17 = vmul.f32 0.0625, %v3690_v4  ;;  %v3728_v6 = vsel %vm3636_vm5, %v3625_v55, 0.0 }
 0x271   :  { %v3781_v13 = vmul.f32 0.0625, %v3645_v39  ;;  %v3784_v14 = vmul.f32 0.0625, %v3672_v43  ;;  %v3785_v19 = vmul.f32 0.0625, %v3681_v7 }
 0x272   :  { %v3695_v35 = vadd.f32 %v3694_v24, %v3693_v23  ;;  %v3555_v23 = vpop.f32.mrf.mxu1 }
 0x273   :  { %v3825_v21 = vsel %vm3824_vm6, %v3782_v62, %v3781_v13 }
 0x274   :  { %v3696_v18 = vrot.slane %v3695_v35, 2  ;;  %v3827_v0 = vsel %vm3826_vm7, %v3783_v2, %v3825_v21  ;;  %v4081_v25 = vpop.f32.mrf.mxu1 }
 0x275   :  { %v3829_v58 = vsel %vm3828_vm8, %v3784_v14, %v3827_v0  ;;  %v3571_v49 = vadd.f32 %v4081_v25, %v5912_v30 }
 0x276   :  { %v3697_v56 = vadd.f32 %v3696_v18, %v3695_v35  ;;  %v3831_v29 = vsel %vm3830_vm9, %v3785_v19, %v3829_v58  ;;  %v3565_v36 = vpop.f32.mrf.mxu1  ;;  %v3546_v18 = vadd.f32 %v5912_v30, %v3545_v63 }
 0x277   :  { %v3833_v32 = vsel %vm3832_vm10, %v3786_v17, %v3831_v29  ;;  %v3566_v52 = vadd.f32 %v5912_v30, %v3565_v36 }
 0x278   :  { %v3698_v8 = vrot.slane %v3697_v56, 1  ;;  %v4084_v37 = vpop.f32.mrf.mxu1  ;;  %v3624_v42 = vmax.f32 %v3546_v18, 0.0 }
 0x279   :  { %v3581_v28 = vadd.f32 %v4084_v37, %v5912_v30  ;;  %v3628_v63 = vmax.f32 %v3566_v52, 0.0 }
 0x27a   :  { %v3699_v12 = vadd.f32 %v3698_v8, %v3697_v56  ;;  %v3727_v8 = vsel %vm3636_vm5, %v3624_v42, 0.0 }
 0x27b   :  { %v3631_v5 = vmax.f32 %v3581_v28, 0.0  ;;  %v3745_v2 = vsel %vm3636_vm5, %v3628_v63, 0.0 }
 0x27c   :  { %v3787_v3 = vmul.f32 0.0625, %v3699_v12  ;;  %v3729_v12 = vadd.f32 %v3728_v6, %v3727_v8 }
 0x27d   :  { %v3755_v13 = vsel %vm3636_vm5, %v3631_v5, 0.0 }
 0x27e   :  { %v3835_v34 = vsel %vm3834_vm11, %v3787_v3, %v3833_v32 }
 0x2a5   :  { %v4066_v16 = vpop.f32.mrf.mxu0 }
 0x2a6   :  { %v3521_v44 = vadd.f32 %v4066_v16, %v5912_v30  ;;  %v3575_v16 = vpop.f32.mrf.mxu1 }
 0x2a7   :  { %v3515_v26 = vpop.f32.mrf.mxu0 }
 0x2a8   :  { %v3619_v48 = vmax.f32 %v3521_v44, 0.0  ;;  %v3516_v27 = vadd.f32 %v5912_v30, %v3515_v26  ;;  %v4087_v41 = vpop.f32.mrf.mxu1  ;;  %v3536_v26 = vadd.f32 %v5912_v30, %v5944_v51  ;;  %v3576_v51 = vadd.f32 %v5912_v30, %v3575_v16 }
 0x2a9   :  { %v3591_v54 = vadd.f32 %v4087_v41, %v5912_v30 }
 0x2aa   :  { %v3618_v53 = vmax.f32 %v3516_v27, 0.0  ;;  %v3701_v57 = vsel %vm3636_vm5, %v3619_v48, 0.0  ;;  %v3585_v44 = vpop.f32.mrf.mxu1  ;;  %v3561_v48 = vadd.f32 %v4078_v10, %v5912_v30  ;;  %v3556_v27 = vadd.f32 %v5912_v30, %v3555_v23 }
 0x2ab   :  { %v3622_v60 = vmax.f32 %v3536_v26, 0.0  ;;  %v3586_v56 = vadd.f32 %v5912_v30, %v3585_v44  ;;  %v3633_v39 = vmax.f32 %v3591_v54, 0.0 }
 0x2ac   :  { %v3700_v61 = vsel %vm3636_vm5, %v3618_v53, 0.0  ;;  %v3623_v53 = vmax.f32 %v3541_v22, 0.0 }
 0x2ad   :  { %v3702_v33 = vadd.f32 %v3701_v57, %v3700_v61  ;;  %v3627_v57 = vmax.f32 %v3561_v48, 0.0  ;;  %v3626_v61 = vmax.f32 %v3556_v27, 0.0  ;;  %v3718_v15 = vsel %vm3636_vm5, %v3622_v60, 0.0 }
 0x2ae   :  { %v3719_v1 = vsel %vm3636_vm5, %v3623_v53, 0.0  ;;  %v3632_v43 = vmax.f32 %v3586_v56, 0.0  ;;  %v3764_v23 = vsel %vm3636_vm5, %v3633_v39, 0.0 }
 0x2af   :  { %v3703_v38 = vrot.slane %v3702_v33, 4  ;;  %v3736_v10 = vsel %vm3636_vm5, %v3626_v61, 0.0  ;;  %v3720_v4 = vadd.f32 %v3719_v1, %v3718_v15 }
 0x2b0   :  { %v3763_v19 = vsel %vm3636_vm5, %v3632_v43, 0.0 }
 0x2b1   :  { %v3704_v9 = vadd.f32 %v3703_v38, %v3702_v33  ;;  %v3629_v33 = vmax.f32 %v3571_v49, 0.0  ;;  %v3630_v38 = vmax.f32 %v3576_v51, 0.0  ;;  %v3721_v3 = vrot.slane %v3720_v4, 4 }
 0x2b2   :  { %v3765_v58 = vadd.f32 %v3764_v23, %v3763_v19 }
 0x2b3   :  { %v3705_v11 = vrot.slane %v3704_v9, 2  ;;  %v3754_v14 = vsel %vm3636_vm5, %v3630_v38, 0.0 }
 0x2b4   :  { %v3756_v0 = vadd.f32 %v3755_v13, %v3754_v14  ;;  %v3766_v41 = vrot.slane %v3765_v58, 4 }
 0x2b5   :  { %v3706_v20 = vadd.f32 %v3705_v11, %v3704_v9  ;;  %v3737_v9 = vsel %vm3636_vm5, %v3627_v57, 0.0  ;;  %v3746_v11 = vsel %vm3636_vm5, %v3629_v33, 0.0 }
 0x2b6   :  { %v3747_v21 = vadd.f32 %v3746_v11, %v3745_v2  ;;  %v3757_v36 = vrot.slane %v3756_v0, 4  ;;  %v3767_v52 = vadd.f32 %v3766_v41, %v3765_v58 }
 0x2b7   :  { %v3707_v59 = vrot.slane %v3706_v20, 1 }
 0x2b8   :  { %v3748_v32 = vrot.slane %v3747_v21, 4  ;;  %v3758_v27 = vadd.f32 %v3757_v36, %v3756_v0  ;;  %v3768_v57 = vrot.slane %v3767_v52, 2 }
 0x2b9   :  { %v3708_v24 = vadd.f32 %v3707_v59, %v3706_v20  ;;  %v3738_v20 = vadd.f32 %v3737_v9, %v3736_v10 }
 0x2ba   :  { %v3749_v46 = vadd.f32 %v3748_v32, %v3747_v21  ;;  %v3759_v54 = vrot.slane %v3758_v27, 2  ;;  %v3769_v38 = vadd.f32 %v3768_v57, %v3767_v52 }
 0x2bb   :  { %v3788_v31 = vmul.f32 0.0625, %v3708_v24  ;;  %v3730_v24 = vrot.slane %v3729_v12, 4  ;;  %v3739_v25 = vrot.slane %v3738_v20, 4 }
 0x2bc   :  { %v3750_v55 = vrot.slane %v3749_v46, 2  ;;  %v3760_v1 = vadd.f32 %v3759_v54, %v3758_v27 }
 0x2bd   :  { %v3837_v35 = vsel %vm3836_vm12, %v3788_v31, %v3835_v34  ;;  %v3731_v16 = vadd.f32 %v3730_v24, %v3729_v12  ;;  %v3740_v22 = vadd.f32 %v3739_v25, %v3738_v20 }
 0x2be   :  { %4099 = vmatprep.mubr.msk.f32.mxu1 %vm3636_vm5, %v3837_v35  ;;  %v3722_v35 = vadd.f32 %v3721_v3, %v3720_v4  ;;  %v3751_v33 = vadd.f32 %v3750_v55, %v3749_v46  ;;  %v3761_v10 = vrot.slane %v3760_v1, 1  ;;  %v3770_v4 = vrot.slane %v3769_v38, 1 }
 0x2bf   :  { %v3732_v49 = vrot.slane %v3731_v16, 2  ;;  %v3741_v60 = vrot.slane %v3740_v22, 2 }
 0x2c0   :  { %v3723_v48 = vrot.slane %v3722_v35, 2  ;;  %v3752_v43 = vrot.slane %v3751_v33, 1  ;;  %v3762_v20 = vadd.f32 %v3761_v10, %v3760_v1  ;;  %v3771_v21 = vadd.f32 %v3770_v4, %v3769_v38 }
 0x2c1   :  { %v3742_v61 = vadd.f32 %v3741_v60, %v3740_v22 }
 0x2c2   :  { %v3724_v42 = vadd.f32 %v3723_v48, %v3722_v35  ;;  %v3753_v13 = vadd.f32 %v3752_v43, %v3751_v33  ;;  %v3794_v58 = vmul.f32 0.0625, %v3762_v20 }
 0x2c3   :  { %v3743_v6 = vrot.slane %v3742_v61, 1 }
 0x2c4   :  { %v4090_v45 = vpop.f32.mrf.mxu1  ;;  %v3725_v63 = vrot.slane %v3724_v42, 1  ;;  %v3793_v0 = vmul.f32 0.0625, %v3753_v13 }
 0x2c5   :  { %v3601_v40 = vadd.f32 %v4090_v45, %v5912_v30  ;;  %v3744_v11 = vadd.f32 %v3743_v6, %v3742_v61 }
 0x2c6   :  { %v3595_v47 = vpop.f32.mrf.mxu1  ;;  %v3726_v9 = vadd.f32 %v3725_v63, %v3724_v42 }
 0x2c7   :  { %v3596_v50 = vadd.f32 %v5912_v30, %v3595_v47  ;;  %v3635_v7 = vmax.f32 %v3601_v40, 0.0 }
 0x2c8   :  { %v3790_v14 = vmul.f32 0.0625, %v3726_v9 }
 0x2c9   :  { %v3634_v62 = vmax.f32 %v3596_v50, 0.0  ;;  %v3773_v17 = vsel %vm3636_vm5, %v3635_v7, 0.0 }
 0x2cb   :  { %v3772_v59 = vsel %vm3636_vm5, %v3634_v62, 0.0 }
 0x2cc   :  { %v3774_v31 = vadd.f32 %v3773_v17, %v3772_v59  ;;  %v3792_v17 = vmul.f32 0.0625, %v3744_v11 }
 0x2ce   :  { %v3775_v26 = vrot.slane %v3774_v31, 4 }
 0x2d0   :  { %v3776_v28 = vadd.f32 %v3775_v26, %v3774_v31 }
 0x2d2   :  { %v3777_v40 = vrot.slane %v3776_v28, 2 }
 0x2d4   :  { %v3778_v8 = vadd.f32 %v3777_v40, %v3776_v28 }
 0x2d6   :  { %v3779_v2 = vrot.slane %v3778_v8, 1 }
 0x2d8   :  { %v3780_v59 = vadd.f32 %v3779_v2, %v3778_v8 }
 0x2da   :  { %v3796_v32 = vmul.f32 0.0625, %v3780_v59 }
 0x2e4   :  { %v4069_v29 = vpop.f32.mrf.mxu0 }
 0x2e5   :  { %v3531_v34 = vadd.f32 %v4069_v29, %v5912_v30  ;;  %v3795_v29 = vmul.f32 0.0625, %v3771_v21 }
 0x2e6   :  { %v3525_v37 = vpop.f32.mrf.mxu0 }
 0x2e7   :  { %v3621_v44 = vmax.f32 %v3531_v34, 0.0  ;;  %v3526_v45 = vadd.f32 %v5912_v30, %v3525_v37  ;;  %v3733_v30 = vadd.f32 %v3732_v49, %v3731_v16  ;;  %v3978_v37 = vld [vmem:[%s6015_s6] ss:$0 sm:$0xff] }
 0x2e9   :  { %v3620_v18 = vmax.f32 %v3526_v45, 0.0  ;;  %v3710_v47 = vsel %vm3636_vm5, %v3621_v44, 0.0  ;;  %v3734_v5 = vrot.slane %v3733_v30, 1 }
 0x2eb   :  { %v3709_v53 = vsel %vm3636_vm5, %v3620_v18, 0.0  ;;  %v3735_v62 = vadd.f32 %v3734_v5, %v3733_v30 }
 0x2ec   :  { %v3711_v51 = vadd.f32 %v3710_v47, %v3709_v53 }
 0x2ed   :  { %v3791_v19 = vmul.f32 0.0625, %v3735_v62 }
 0x2ee   :  { %v3712_v56 = vrot.slane %v3711_v51, 4 }
 0x2f0   :  { %v3713_v50 = vadd.f32 %v3712_v56, %v3711_v51 }
 0x2f2   :  { %v3714_v15 = vrot.slane %v3713_v50, 2 }
 0x2f4   :  { %v3715_v39 = vadd.f32 %v3714_v15, %v3713_v50 }
 0x2f6   :  { %v3716_v7 = vrot.slane %v3715_v39, 1 }
 0x2f8   :  { %v3717_v12 = vadd.f32 %v3716_v7, %v3715_v39 }
 0x2fa   :  { %v3789_v23 = vmul.f32 0.0625, %v3717_v12 }
 0x2fc   :  { %v3838_v3 = vsel %vm3824_vm6, %v3790_v14, %v3789_v23 }
 0x2fd   :  { %v3839_v24 = vsel %vm3826_vm7, %v3791_v19, %v3838_v3 }
 0x2fe   :  { %v3840_v25 = vsel %vm3828_vm8, %v3792_v17, %v3839_v24 }
 0x2ff   :  { %v3841_v31 = vsel %vm3830_vm9, %v3793_v0, %v3840_v25 }
 0x300   :  { %v3842_v34 = vsel %vm3832_vm10, %v3794_v58, %v3841_v31 }
 0x301   :  { %v3843_v35 = vsel %vm3834_vm11, %v3795_v29, %v3842_v34 }
 0x302   :  { %v3844_v36 = vsel %vm3836_vm12, %v3796_v32, %v3843_v35 }
 0x303   :  { %4100 = vmatmul.mubr.msk.f32.vlgmr.msra.gmra.mxu1 %vm3636_vm5, %v3844_v36 }
 0x3c3   :  { %v4101_v16 = vpop.f32.mrf.mxu1 }
 0x3c4   :  { %v3921_v41 = vadd.f32 %v4101_v16, %v3978_v37 }
 0x3c5   :  { %v3915_v44 = vpop.f32.mrf.mxu1 }
 0x3c6   :  { %3925 = vst [vmem:[#allocation6 + $0x8] sm:$0xff] %v3921_v41  ;;  %v3916_v45 = vadd.f32 %v3978_v37, %v3915_v44 }
 0x3c8   :  { %3924 = vst [vmem:[#allocation6] sm:$0xff] %v3916_v45 }
 0x3c9   :  { %4164 = shalt.err (!%p4161_p9)
}
 0x3ca   :  { %s4182_s30 = smov 128   ;;  %s4183_s0 = smov 8  }
 0x3cb   :  { %3937 = dma.vmem_to_hbm [thread:$0]  %s3932_s28, 256, %s6016_s7, [#allocation5], %s4182_s30, %s4182_s30, %s4183_s0  }
 0x3cc   :  { %4175 = dma.done.wait [#allocation5], 256  }
 0x3cd   :  { %4176 = vsyncadd [#allocation5], 4294967040 }
 0x3ce   :  { %3941 = vsyncpa [#allocation4], 1 }
 0x3cf   :  { %3942 = vsyncpa [#allocation5], 1 }

</bundles_post_ra>
